<compile_context>
chip_gen: v7x
topology: tpu7x:2x2x1
jax: 0.10.0
libtpu: 0.0.40
codegen_flags: <defaults>
</compile_context>

<pallas_src>
import jax
import jax.numpy as jnp
from jax.experimental import pallas as pl
from jax.experimental.pallas import tpu as pltpu

B = 2
CFEAT = 512
IMG_H, IMG_W = 14, 14          # vpool4 = MaxPool2d(14, stride=14) -> 1x1
AUD_H, AUD_W = 16, 12          # apool4 = MaxPool2d((16,12))       -> 1x1
D1 = 128                       # vfc1/afc1 output dim
PSA_PLANES = 64
SPLIT = PSA_PLANES // 4        # 16
BN_EPS = 1e-5


def _vmem_specs(n):
    return [pl.BlockSpec(memory_space=pltpu.MemorySpace.VMEM) for _ in range(n)]


# ---------------------------------------------------------------------------
# Single fused kernel: pools -> fc1 -> fc2 -> BN -> fuse -> PSA -> fc3
# ---------------------------------------------------------------------------
def avenet_kernel(img_ref, aud_ref,
                  w1_ref, b1_ref, w2_ref, b2_ref, g_ref, be_ref,
                  wd_ref, sew1bd_ref, seb1_ref, sew2t_ref, seb2t_ref,
                  fc3w_ref, fc3b_ref,
                  out_ref, img_out_ref, aud_out_ref):
    # ---- global max pools over the full spatial window (vpool4 / apool4) ----
    img_pool = jnp.max(img_ref[...], axis=-1)                 # [B, 512] bf16
    aud_pool = jnp.max(aud_ref[...], axis=-1)                 # [B, 512] bf16
    pooled = jnp.concatenate([img_pool, aud_pool], axis=0)    # [2B, 512] bf16

    # ---- vfc1 & afc1 in ONE MXU call: [2B,512] @ [vw1|aw1] -> use quadrants ----
    h1 = jnp.dot(pooled, w1_ref[...],
                 preferred_element_type=jnp.float32) + b1_ref[...]   # [2B, 256]
    h1 = jnp.maximum(h1, 0.0)                                 # relu(vfc1/afc1)
    h1s = jnp.concatenate([h1[:B, :D1], h1[B:, D1:]], axis=0)  # [2B, 128]

    # ---- vfc2 & afc2 in ONE MXU call: [2B,128] @ [vw2|aw2] -> use quadrants ----
    h2 = jnp.dot(h1s, w2_ref[...],
                 preferred_element_type=jnp.float32) + b2_ref[...]   # [2B, 256]
    z = jnp.concatenate([h2[:B, :D1], h2[B:, D1:]], axis=1)   # [B, 256] = [img|aud]

    # ---- BatchNorm1d (training mode: batch stats, biased variance) ----
    mean = jnp.mean(z, axis=0, keepdims=True)
    var = jnp.mean((z - mean) ** 2, axis=0, keepdims=True)
    zn = (z - mean) * jax.lax.rsqrt(var + BN_EPS) * g_ref[...] + be_ref[...]
    img_emb = zn[:, :D1]
    aud_emb = zn[:, D1:]
    img_out_ref[...] = img_emb
    aud_out_ref[...] = aud_emb

    # ---- fusion + PSAModule (1x1 spatial; grouped convs folded to one matmul) ----
    zong = img_emb + aud_emb                                  # [B, 128]
    x_all = jnp.dot(zong, wd_ref[...],
                    preferred_element_type=jnp.float32)       # [B,64] = [x1|x2|x3|x4]

    # SEWeightModule on 1x1 spatial (AdaptiveAvgPool2d(1) is identity),
    # vectorized over the 4 branches via a block-diagonal [64,4] weight.
    h_se = jnp.maximum(
        jnp.dot(x_all, sew1bd_ref[...], preferred_element_type=jnp.float32)
        + seb1_ref[...], 0.0)                                 # [B, 4]
    h_rep = jnp.concatenate(
        [jnp.broadcast_to(h_se[:, j:j + 1], (B, SPLIT)) for j in range(4)],
        axis=1)                                               # [B, 64]
    s = jax.nn.sigmoid(h_rep * sew2t_ref[...] + seb2t_ref[...])   # [B, 64]

    # softmax over the 4 branches (dim=1 of the [B,4,16,1,1] torch view),
    # done on the lane-blocked [B,64] layout.
    s1 = s[:, 0 * SPLIT:1 * SPLIT]
    s2 = s[:, 1 * SPLIT:2 * SPLIT]
    s3 = s[:, 2 * SPLIT:3 * SPLIT]
    s4 = s[:, 3 * SPLIT:4 * SPLIT]
    m = jnp.maximum(jnp.maximum(s1, s2), jnp.maximum(s3, s4))     # [B,16]
    e = jnp.exp(s - jnp.concatenate([m, m, m, m], axis=1))        # [B,64]
    e1 = e[:, 0 * SPLIT:1 * SPLIT]
    e2 = e[:, 1 * SPLIT:2 * SPLIT]
    e3 = e[:, 2 * SPLIT:3 * SPLIT]
    e4 = e[:, 3 * SPLIT:4 * SPLIT]
    inv = pl.reciprocal(e1 + e2 + e3 + e4, approx=True)           # [B,16]
    att = e * jnp.concatenate([inv, inv, inv, inv], axis=1)       # [B,64]

    fw = x_all * att                                # [B,64] = [fw1|fw2|fw3|fw4]
    # fc3 applied on the torch concatenation order (fw4,fw3,fw2,fw1):
    # the weight rows are permuted in glue so one matmul suffices.
    out_ref[...] = (jnp.dot(fw, fc3w_ref[...], preferred_element_type=jnp.float32)
                    + fc3b_ref[...])


def avenet_forward(image_feat, audio_feat, kp):
    # Free reshapes only — no transpose, no extra HBM pass.
    img_flat = image_feat.reshape(B, CFEAT, IMG_H * IMG_W)
    aud_flat = audio_feat.reshape(B, CFEAT, AUD_H * AUD_W)
    out, img_emb, aud_emb = pl.pallas_call(
        avenet_kernel,
        out_shape=(jax.ShapeDtypeStruct((B, 3), jnp.float32),
                   jax.ShapeDtypeStruct((B, D1), jnp.float32),
                   jax.ShapeDtypeStruct((B, D1), jnp.float32)),
        in_specs=_vmem_specs(15),
        out_specs=tuple(_vmem_specs(3)),
    )(img_flat, aud_flat,
      kp["w1"], kp["b1"], kp["w2"], kp["b2"], kp["g"], kp["be"],
      kp["wd"], kp["sew1_bd"], kp["seb1"], kp["sew2_t"], kp["seb2_t"],
      kp["fc3_w"], kp["fc3_b"])
    # module returns img/aud after unsqueeze(-1).unsqueeze(-1)
    return out, img_emb.reshape(B, D1, 1, 1), aud_emb.reshape(B, D1, 1, 1)


avenet_forward_jit = jax.jit(avenet_forward)


# ---------------------------------------------------------------------------
# Glue: parameter construction & packing
# ---------------------------------------------------------------------------
def grouped_center_to_dense(w, groups):
    """Fold a grouped conv acting on 1x1 spatial input (padding=k//2) into a
    dense [Cin, Cout] matrix using only the center tap of the kernel."""
    O, Cg, k, _ = w.shape
    center = w[:, :, k // 2, k // 2]                      # [O, Cg]
    Cin = Cg * groups
    og = O // groups
    dense = jnp.zeros((O, Cin), dtype=w.dtype)
    for g in range(groups):
        dense = dense.at[g * og:(g + 1) * og, g * Cg:(g + 1) * Cg].set(
            center[g * og:(g + 1) * og])
    return dense.T                                        # [Cin, O]


def make_params(key):
    ks = jax.random.split(key, 24)

    def nrm(k, shape, scale=0.05):
        return scale * jax.random.normal(k, shape, dtype=jnp.float32)

    p = {}
    # image branch (first-layer weights carried in bf16, per perf review)
    p["vw1"] = nrm(ks[0], (CFEAT, D1)).astype(jnp.bfloat16)
    p["vb1"] = nrm(ks[1], (1, D1))
    p["vw2"] = nrm(ks[2], (D1, D1));  p["vb2"] = nrm(ks[3], (1, D1))
    p["vg"] = jnp.ones((1, D1), jnp.float32); p["vbe"] = jnp.zeros((1, D1), jnp.float32)
    # audio branch
    p["aw1"] = nrm(ks[4], (CFEAT, D1)).astype(jnp.bfloat16)
    p["ab1"] = nrm(ks[5], (1, D1))
    p["aw2"] = nrm(ks[6], (D1, D1));  p["ab2"] = nrm(ks[7], (1, D1))
    p["ag"] = jnp.ones((1, D1), jnp.float32); p["abe"] = jnp.zeros((1, D1), jnp.float32)
    # PSA grouped convs (in=128, out=16 each), kernels 3/5/7/9, groups 1/4/8/16
    conv_shapes = [(SPLIT, 128, 3, 3), (SPLIT, 32, 5, 5),
                   (SPLIT, 16, 7, 7), (SPLIT, 8, 9, 9)]
    groups = [1, 4, 8, 16]
    p["wds"] = tuple(
        grouped_center_to_dense(nrm(ks[8 + i], conv_shapes[i]), groups[i])
        for i in range(4))                                # each [128,16]
    # SEWeightModule(16): Conv2d(16,1,1)+b -> relu -> Conv2d(1,16,1)+b -> sigmoid
    p["sew1"] = nrm(ks[12], (1, SPLIT)); p["seb1"] = nrm(ks[13], (1, 1))
    p["sew2"] = nrm(ks[14], (1, SPLIT)); p["seb2"] = nrm(ks[15], (1, SPLIT))
    # fc3: Linear(64, 3), stored as [in, out]
    p["fc3_wt"] = nrm(ks[16], (64, 3))
    p["fc3_b"] = nrm(ks[17], (1, 3))
    return p, ks[18], ks[19]


def pack_kernel_params(p):
    """One-time packing of per-branch weights into the fused-kernel operands."""
    kp = {}
    kp["w1"] = jnp.concatenate([p["vw1"], p["aw1"]], axis=1)     # [512,256] bf16
    kp["b1"] = jnp.concatenate([p["vb1"], p["ab1"]], axis=1)     # [1,256]
    kp["w2"] = jnp.concatenate([p["vw2"], p["aw2"]], axis=1)     # [128,256]
    kp["b2"] = jnp.concatenate([p["vb2"], p["ab2"]], axis=1)
    kp["g"] = jnp.concatenate([p["vg"], p["ag"]], axis=1)
    kp["be"] = jnp.concatenate([p["vbe"], p["abe"]], axis=1)
    kp["wd"] = jnp.concatenate(list(p["wds"]), axis=1)           # [128,64]
    # block-diagonal SE first conv: per-branch <x, sew1> as one [B,64]@[64,4]
    sew1_bd = jnp.zeros((4 * SPLIT, 4), jnp.float32)
    for j in range(4):
        sew1_bd = sew1_bd.at[j * SPLIT:(j + 1) * SPLIT, j].set(p["sew1"][0])
    kp["sew1_bd"] = sew1_bd
    kp["seb1"] = p["seb1"]
    kp["sew2_t"] = jnp.tile(p["sew2"], (1, 4))                   # [1,64]
    kp["seb2_t"] = jnp.tile(p["seb2"], (1, 4))                   # [1,64]
    # fc3 weight permuted so kernel's natural (fw1|fw2|fw3|fw4) order matches
    # torch's (fw4,fw3,fw2,fw1) concatenation.
    W = p["fc3_wt"]
    kp["fc3_w"] = jnp.concatenate([W[3 * SPLIT:4 * SPLIT], W[2 * SPLIT:3 * SPLIT],
                                   W[1 * SPLIT:2 * SPLIT], W[0 * SPLIT:1 * SPLIT]],
                                  axis=0)                        # [64,3]
    kp["fc3_b"] = p["fc3_b"]
    return kp


# ---------------------------------------------------------------------------
# Pure-JAX reference (follows the PyTorch module structure) for validation
# ---------------------------------------------------------------------------
def reference_forward(image_feat, audio_feat, p):
    def branch_ref(feat, w1, b1, w2, b2, g, be):
        pooled = jnp.max(feat.reshape(B, CFEAT, -1), axis=-1).astype(jnp.float32)
        h = jnp.maximum(pooled @ w1.astype(jnp.float32) + b1, 0.0)
        h = h @ w2 + b2
        mean = jnp.mean(h, axis=0, keepdims=True)
        var = jnp.mean((h - mean) ** 2, axis=0, keepdims=True)
        return (h - mean) / jnp.sqrt(var + BN_EPS) * g + be

    img = branch_ref(image_feat, p["vw1"], p["vb1"], p["vw2"], p["vb2"], p["vg"], p["vbe"])
    aud = branch_ref(audio_feat, p["aw1"], p["ab1"], p["aw2"], p["ab2"], p["ag"], p["abe"])
    zong = img + aud
    xs = [zong @ wd for wd in p["wds"]]

    def se(x):
        h = jnp.maximum(jnp.sum(x * p["sew1"], -1, keepdims=True) + p["seb1"], 0.0)
        return jax.nn.sigmoid(h * p["sew2"] + p["seb2"])

    ss = jnp.stack([se(x) for x in xs], axis=1)           # [B,4,16]
    att = jax.nn.softmax(ss, axis=1)
    fw = [xs[i] * att[:, i] for i in range(4)]
    zong64 = jnp.concatenate([fw[3], fw[2], fw[1], fw[0]], axis=1)
    out = zong64 @ p["fc3_wt"] + p["fc3_b"]
    return out, img.reshape(B, D1, 1, 1), aud.reshape(B, D1, 1, 1)


if __name__ == "__main__":
    key = jax.random.PRNGKey(0)
    p, k_img, k_aud = make_params(key)
    kp = pack_kernel_params(p)

    # ConvNet output feature maps (carried in bf16, per perf review).
    image_feat = jax.random.normal(k_img, (B, CFEAT, IMG_H, IMG_W),
                                   jnp.float32).astype(jnp.bfloat16)
    audio_feat = jax.random.normal(k_aud, (B, CFEAT, AUD_H, AUD_W),
                                   jnp.float32).astype(jnp.bfloat16)

    out, img_emb, aud_emb = jax.block_until_ready(
        avenet_forward_jit(image_feat, audio_feat, kp))

    ref_out, ref_img, ref_aud = reference_forward(image_feat, audio_feat, p)
    assert out.shape == (B, 3)
    assert img_emb.shape == (B, D1, 1, 1) and aud_emb.shape == (B, D1, 1, 1)
    # bf16 feature path + batch-stat BN at B=2 -> compare at 1e-2 (per review).
    assert jnp.allclose(out, ref_out, rtol=1e-2, atol=1e-2)
    assert jnp.allclose(img_emb, ref_img, rtol=1e-2, atol=1e-2)
    assert jnp.allclose(aud_emb, ref_aud, rtol=1e-2, atol=1e-2)
    print("KERNEL_OK")
</pallas_src>

<mosaic_0001>
module attributes {stable_mosaic.version = 11 : i64} {
  func.func @avenet_kernel(%arg0: memref<2x512x196xbf16, #tpu.memory_space<vmem>>, %arg1: memref<2x512x192xbf16, #tpu.memory_space<vmem>>, %arg2: memref<512x256xbf16, #tpu.memory_space<vmem>>, %arg3: memref<1x256xf32, #tpu.memory_space<vmem>>, %arg4: memref<128x256xf32, #tpu.memory_space<vmem>>, %arg5: memref<1x256xf32, #tpu.memory_space<vmem>>, %arg6: memref<1x256xf32, #tpu.memory_space<vmem>>, %arg7: memref<1x256xf32, #tpu.memory_space<vmem>>, %arg8: memref<128x64xf32, #tpu.memory_space<vmem>>, %arg9: memref<64x4xf32, #tpu.memory_space<vmem>>, %arg10: memref<1x1xf32, #tpu.memory_space<vmem>>, %arg11: memref<1x64xf32, #tpu.memory_space<vmem>>, %arg12: memref<1x64xf32, #tpu.memory_space<vmem>>, %arg13: memref<64x3xf32, #tpu.memory_space<vmem>>, %arg14: memref<1x3xf32, #tpu.memory_space<vmem>>, %arg15: memref<2x3xf32, #tpu.memory_space<vmem>>, %arg16: memref<2x128xf32, #tpu.memory_space<vmem>>, %arg17: memref<2x128xf32, #tpu.memory_space<vmem>>) attributes {dimension_semantics = [], scalar_prefetch = 0 : i64, scratch_operands = 0 : i64, tpu.core_type = #tpu.core_type<tc>} {
    %c0 = arith.constant 0 : index
    %c0_0 = arith.constant 0 : index
    %c0_1 = arith.constant 0 : index
    %0 = vector.load %arg0[%c0, %c0_0, %c0_1] : memref<2x512x196xbf16, #tpu.memory_space<vmem>>, vector<2x512x196xbf16>
    %cst = arith.constant dense<0xFF80> : vector<2x512xbf16>
    %1 = vector.multi_reduction <maximumf>, %0, %cst [2] : vector<2x512x196xbf16> to vector<2x512xbf16>
    %c0_2 = arith.constant 0 : index
    %c0_3 = arith.constant 0 : index
    %c0_4 = arith.constant 0 : index
    %2 = vector.load %arg1[%c0_2, %c0_3, %c0_4] : memref<2x512x192xbf16, #tpu.memory_space<vmem>>, vector<2x512x192xbf16>
    %cst_5 = arith.constant dense<0xFF80> : vector<2x512xbf16>
    %3 = vector.multi_reduction <maximumf>, %2, %cst_5 [2] : vector<2x512x192xbf16> to vector<2x512xbf16>
    %4 = tpu.concatenate %1, %3 in 0 : vector<2x512xbf16>, vector<2x512xbf16> -> vector<4x512xbf16>
    %c0_6 = arith.constant 0 : index
    %c0_7 = arith.constant 0 : index
    %5 = vector.load %arg2[%c0_6, %c0_7] : memref<512x256xbf16, #tpu.memory_space<vmem>>, vector<512x256xbf16>
    %cst_8 = arith.constant dense<0.000000e+00> : vector<4x256xf32>
    %6 = tpu.matmul %4, %5, %cst_8 {dimension_numbers = #tpu.dot_dimension_numbers<[1], [0], [0], [1], [0, 0, 1, 1], [], []>} : vector<4x512xbf16>, vector<512x256xbf16>, vector<4x256xf32> -> vector<4x256xf32>
    %c0_9 = arith.constant 0 : index
    %c0_10 = arith.constant 0 : index
    %7 = vector.load %arg3[%c0_9, %c0_10] : memref<1x256xf32, #tpu.memory_space<vmem>>, vector<1x256xf32>
    %8 = vector.broadcast %7 : vector<1x256xf32> to vector<4x256xf32>
    %9 = arith.addf %6, %8 : vector<4x256xf32>
    %cst_11 = arith.constant 0.000000e+00 : f32
    %10 = vector.broadcast %cst_11 : f32 to vector<4x256xf32>
    %11 = arith.maximumf %9, %10 : vector<4x256xf32>
    %12 = vector.extract_strided_slice %11 {offsets = [0, 0], sizes = [2, 128], strides = [1, 1]} : vector<4x256xf32> to vector<2x128xf32>
    %13 = vector.extract_strided_slice %11 {offsets = [2, 128], sizes = [2, 128], strides = [1, 1]} : vector<4x256xf32> to vector<2x128xf32>
    %14 = tpu.concatenate %12, %13 in 0 : vector<2x128xf32>, vector<2x128xf32> -> vector<4x128xf32>
    %c0_12 = arith.constant 0 : index
    %c0_13 = arith.constant 0 : index
    %15 = vector.load %arg4[%c0_12, %c0_13] : memref<128x256xf32, #tpu.memory_space<vmem>>, vector<128x256xf32>
    %cst_14 = arith.constant dense<0.000000e+00> : vector<4x256xf32>
    %16 = tpu.matmul %14, %15, %cst_14 {dimension_numbers = #tpu.dot_dimension_numbers<[1], [0], [0], [1], [0, 0, 1, 1], [], []>} : vector<4x128xf32>, vector<128x256xf32>, vector<4x256xf32> -> vector<4x256xf32>
    %c0_15 = arith.constant 0 : index
    %c0_16 = arith.constant 0 : index
    %17 = vector.load %arg5[%c0_15, %c0_16] : memref<1x256xf32, #tpu.memory_space<vmem>>, vector<1x256xf32>
    %18 = vector.broadcast %17 : vector<1x256xf32> to vector<4x256xf32>
    %19 = arith.addf %16, %18 : vector<4x256xf32>
    %20 = vector.extract_strided_slice %19 {offsets = [0, 0], sizes = [2, 128], strides = [1, 1]} : vector<4x256xf32> to vector<2x128xf32>
    %21 = vector.extract_strided_slice %19 {offsets = [2, 128], sizes = [2, 128], strides = [1, 1]} : vector<4x256xf32> to vector<2x128xf32>
    %22 = tpu.concatenate %20, %21 in 1 : vector<2x128xf32>, vector<2x128xf32> -> vector<2x256xf32>
    %cst_17 = arith.constant dense<0.000000e+00> : vector<256xf32>
    %23 = vector.multi_reduction <add>, %22, %cst_17 [0] : vector<2x256xf32> to vector<256xf32>
    %24 = vector.shape_cast %23 : vector<256xf32> to vector<1x256xf32>
    %cst_18 = arith.constant 2.000000e+00 : f32
    %25 = vector.broadcast %cst_18 : f32 to vector<1x256xf32>
    %26 = arith.divf %24, %25 : vector<1x256xf32>
    %27 = vector.broadcast %26 : vector<1x256xf32> to vector<2x256xf32>
    %28 = arith.subf %22, %27 : vector<2x256xf32>
    %29 = arith.mulf %28, %28 : vector<2x256xf32>
    %cst_19 = arith.constant dense<0.000000e+00> : vector<256xf32>
    %30 = vector.multi_reduction <add>, %29, %cst_19 [0] : vector<2x256xf32> to vector<256xf32>
    %31 = vector.shape_cast %30 : vector<256xf32> to vector<1x256xf32>
    %cst_20 = arith.constant 2.000000e+00 : f32
    %32 = vector.broadcast %cst_20 : f32 to vector<1x256xf32>
    %33 = arith.divf %31, %32 : vector<1x256xf32>
    %34 = vector.broadcast %26 : vector<1x256xf32> to vector<2x256xf32>
    %35 = arith.subf %22, %34 : vector<2x256xf32>
    %cst_21 = arith.constant 9.99999974E-6 : f32
    %36 = vector.broadcast %cst_21 : f32 to vector<1x256xf32>
    %37 = arith.addf %33, %36 : vector<1x256xf32>
    %38 = math.rsqrt %37 : vector<1x256xf32>
    %39 = vector.broadcast %38 : vector<1x256xf32> to vector<2x256xf32>
    %40 = arith.mulf %35, %39 : vector<2x256xf32>
    %c0_22 = arith.constant 0 : index
    %c0_23 = arith.constant 0 : index
    %41 = vector.load %arg6[%c0_22, %c0_23] : memref<1x256xf32, #tpu.memory_space<vmem>>, vector<1x256xf32>
    %42 = vector.broadcast %41 : vector<1x256xf32> to vector<2x256xf32>
    %43 = arith.mulf %40, %42 : vector<2x256xf32>
    %c0_24 = arith.constant 0 : index
    %c0_25 = arith.constant 0 : index
    %44 = vector.load %arg7[%c0_24, %c0_25] : memref<1x256xf32, #tpu.memory_space<vmem>>, vector<1x256xf32>
    %45 = vector.broadcast %44 : vector<1x256xf32> to vector<2x256xf32>
    %46 = arith.addf %43, %45 : vector<2x256xf32>
    %47 = vector.extract_strided_slice %46 {offsets = [0, 0], sizes = [2, 128], strides = [1, 1]} : vector<2x256xf32> to vector<2x128xf32>
    %48 = vector.extract_strided_slice %46 {offsets = [0, 128], sizes = [2, 128], strides = [1, 1]} : vector<2x256xf32> to vector<2x128xf32>
    %c0_26 = arith.constant 0 : index
    %c0_27 = arith.constant 0 : index
    %49 = vector.load %arg16[%c0_26, %c0_27] : memref<2x128xf32, #tpu.memory_space<vmem>>, vector<2x128xf32>
    tpu.vector_store %arg16[%c0_26, %c0_27], %47 {strides = array<i32>} : memref<2x128xf32, #tpu.memory_space<vmem>>, vector<2x128xf32>,
    %c0_28 = arith.constant 0 : index
    %c0_29 = arith.constant 0 : index
    %50 = vector.load %arg17[%c0_28, %c0_29] : memref<2x128xf32, #tpu.memory_space<vmem>>, vector<2x128xf32>
    tpu.vector_store %arg17[%c0_28, %c0_29], %48 {strides = array<i32>} : memref<2x128xf32, #tpu.memory_space<vmem>>, vector<2x128xf32>,
    %51 = arith.addf %47, %48 : vector<2x128xf32>
    %c0_30 = arith.constant 0 : index
    %c0_31 = arith.constant 0 : index
    %52 = vector.load %arg8[%c0_30, %c0_31] : memref<128x64xf32, #tpu.memory_space<vmem>>, vector<128x64xf32>
    %cst_32 = arith.constant dense<0.000000e+00> : vector<2x64xf32>
    %53 = tpu.matmul %51, %52, %cst_32 {dimension_numbers = #tpu.dot_dimension_numbers<[1], [0], [0], [1], [0, 0, 1, 1], [], []>} : vector<2x128xf32>, vector<128x64xf32>, vector<2x64xf32> -> vector<2x64xf32>
    %c0_33 = arith.constant 0 : index
    %c0_34 = arith.constant 0 : index
    %54 = vector.load %arg9[%c0_33, %c0_34] : memref<64x4xf32, #tpu.memory_space<vmem>>, vector<64x4xf32>
    %cst_35 = arith.constant dense<0.000000e+00> : vector<2x4xf32>
    %55 = tpu.matmul %53, %54, %cst_35 {dimension_numbers = #tpu.dot_dimension_numbers<[1], [0], [0], [1], [0, 0, 1, 1], [], []>} : vector<2x64xf32>, vector<64x4xf32>, vector<2x4xf32> -> vector<2x4xf32>
    %c0_36 = arith.constant 0 : index
    %c0_37 = arith.constant 0 : index
    %56 = vector.load %arg10[%c0_36, %c0_37] : memref<1x1xf32, #tpu.memory_space<vmem>>, vector<1x1xf32>
    %57 = vector.broadcast %56 : vector<1x1xf32> to vector<2x4xf32>
    %58 = arith.addf %55, %57 : vector<2x4xf32>
    %cst_38 = arith.constant 0.000000e+00 : f32
    %59 = vector.broadcast %cst_38 : f32 to vector<2x4xf32>
    %60 = arith.maximumf %58, %59 : vector<2x4xf32>
    %61 = vector.extract_strided_slice %60 {offsets = [0, 0], sizes = [2, 1], strides = [1, 1]} : vector<2x4xf32> to vector<2x1xf32>
    %62 = vector.shape_cast %61 : vector<2x1xf32> to vector<2x1xf32>
    %63 = vector.broadcast %62 : vector<2x1xf32> to vector<2x16xf32>
    %64 = vector.extract_strided_slice %60 {offsets = [0, 1], sizes = [2, 1], strides = [1, 1]} : vector<2x4xf32> to vector<2x1xf32>
    %65 = vector.shape_cast %64 : vector<2x1xf32> to vector<2x1xf32>
    %66 = vector.broadcast %65 : vector<2x1xf32> to vector<2x16xf32>
    %67 = vector.extract_strided_slice %60 {offsets = [0, 2], sizes = [2, 1], strides = [1, 1]} : vector<2x4xf32> to vector<2x1xf32>
    %68 = vector.shape_cast %67 : vector<2x1xf32> to vector<2x1xf32>
    %69 = vector.broadcast %68 : vector<2x1xf32> to vector<2x16xf32>
    %70 = vector.extract_strided_slice %60 {offsets = [0, 3], sizes = [2, 1], strides = [1, 1]} : vector<2x4xf32> to vector<2x1xf32>
    %71 = vector.shape_cast %70 : vector<2x1xf32> to vector<2x1xf32>
    %72 = vector.broadcast %71 : vector<2x1xf32> to vector<2x16xf32>
    %73 = tpu.concatenate %63, %66, %69, %72 in 1 : vector<2x16xf32>, vector<2x16xf32>, vector<2x16xf32>, vector<2x16xf32> -> vector<2x64xf32>
    %c0_39 = arith.constant 0 : index
    %c0_40 = arith.constant 0 : index
    %74 = vector.load %arg11[%c0_39, %c0_40] : memref<1x64xf32, #tpu.memory_space<vmem>>, vector<1x64xf32>
    %75 = vector.broadcast %74 : vector<1x64xf32> to vector<2x64xf32>
    %76 = arith.mulf %73, %75 : vector<2x64xf32>
    %c0_41 = arith.constant 0 : index
    %c0_42 = arith.constant 0 : index
    %77 = vector.load %arg12[%c0_41, %c0_42] : memref<1x64xf32, #tpu.memory_space<vmem>>, vector<1x64xf32>
    %78 = vector.broadcast %77 : vector<1x64xf32> to vector<2x64xf32>
    %79 = arith.addf %76, %78 : vector<2x64xf32>
    %80 = arith.negf %79 : vector<2x64xf32>
    %81 = math.exp %80 : vector<2x64xf32>
    %cst_43 = arith.constant 1.000000e+00 : f32
    %82 = vector.broadcast %cst_43 : f32 to vector<2x64xf32>
    %83 = arith.addf %82, %81 : vector<2x64xf32>
    %84 = arith.divf %82, %83 : vector<2x64xf32>
    %85 = vector.extract_strided_slice %84 {offsets = [0, 0], sizes = [2, 16], strides = [1, 1]} : vector<2x64xf32> to vector<2x16xf32>
    %86 = vector.extract_strided_slice %84 {offsets = [0, 16], sizes = [2, 16], strides = [1, 1]} : vector<2x64xf32> to vector<2x16xf32>
    %87 = vector.extract_strided_slice %84 {offsets = [0, 32], sizes = [2, 16], strides = [1, 1]} : vector<2x64xf32> to vector<2x16xf32>
    %88 = vector.extract_strided_slice %84 {offsets = [0, 48], sizes = [2, 16], strides = [1, 1]} : vector<2x64xf32> to vector<2x16xf32>
    %89 = arith.maximumf %85, %86 : vector<2x16xf32>
    %90 = arith.maximumf %87, %88 : vector<2x16xf32>
    %91 = arith.maximumf %89, %90 : vector<2x16xf32>
    %92 = tpu.concatenate %91, %91, %91, %91 in 1 : vector<2x16xf32>, vector<2x16xf32>, vector<2x16xf32>, vector<2x16xf32> -> vector<2x64xf32>
    %93 = arith.subf %84, %92 : vector<2x64xf32>
    %94 = math.exp %93 : vector<2x64xf32>
    %95 = vector.extract_strided_slice %94 {offsets = [0, 0], sizes = [2, 16], strides = [1, 1]} : vector<2x64xf32> to vector<2x16xf32>
    %96 = vector.extract_strided_slice %94 {offsets = [0, 16], sizes = [2, 16], strides = [1, 1]} : vector<2x64xf32> to vector<2x16xf32>
    %97 = vector.extract_strided_slice %94 {offsets = [0, 32], sizes = [2, 16], strides = [1, 1]} : vector<2x64xf32> to vector<2x16xf32>
    %98 = vector.extract_strided_slice %94 {offsets = [0, 48], sizes = [2, 16], strides = [1, 1]} : vector<2x64xf32> to vector<2x16xf32>
    %99 = arith.addf %95, %96 : vector<2x16xf32>
    %100 = arith.addf %99, %97 : vector<2x16xf32>
    %101 = arith.addf %100, %98 : vector<2x16xf32>
    %102 = tpu.reciprocal %101 {approx = true} : vector<2x16xf32> -> vector<2x16xf32>
    %103 = tpu.concatenate %102, %102, %102, %102 in 1 : vector<2x16xf32>, vector<2x16xf32>, vector<2x16xf32>, vector<2x16xf32> -> vector<2x64xf32>
    %104 = arith.mulf %94, %103 : vector<2x64xf32>
    %105 = arith.mulf %53, %104 : vector<2x64xf32>
    %c0_44 = arith.constant 0 : index
    %c0_45 = arith.constant 0 : index
    %106 = vector.load %arg13[%c0_44, %c0_45] : memref<64x3xf32, #tpu.memory_space<vmem>>, vector<64x3xf32>
    %cst_46 = arith.constant dense<0.000000e+00> : vector<2x3xf32>
    %107 = tpu.matmul %105, %106, %cst_46 {dimension_numbers = #tpu.dot_dimension_numbers<[1], [0], [0], [1], [0, 0, 1, 1], [], []>} : vector<2x64xf32>, vector<64x3xf32>, vector<2x3xf32> -> vector<2x3xf32>
    %c0_47 = arith.constant 0 : index
    %c0_48 = arith.constant 0 : index
    %108 = vector.load %arg14[%c0_47, %c0_48] : memref<1x3xf32, #tpu.memory_space<vmem>>, vector<1x3xf32>
    %109 = vector.broadcast %108 : vector<1x3xf32> to vector<2x3xf32>
    %110 = arith.addf %107, %109 : vector<2x3xf32>
    %c0_49 = arith.constant 0 : index
    %c0_50 = arith.constant 0 : index
    %111 = vector.load %arg15[%c0_49, %c0_50] : memref<2x3xf32, #tpu.memory_space<vmem>>, vector<2x3xf32>
    tpu.vector_store %arg15[%c0_49, %c0_50], %110 {strides = array<i32>} : memref<2x3xf32, #tpu.memory_space<vmem>>, vector<2x3xf32>,
    return
  }
}

</mosaic_0001>

<bundles_post_ra>
// kernel: avenet_forward.1
= control target key start
LH: loop header
LB: loop body
LE: loop exit
PB: predicated region body
PF: predicated region fallthrough
CT: control target
= control target key end

     0   :  { %s8859_s0 = inlined_call_operand.vmem [shape: bf16[2,512,196], index: 0, kind: input, shape index: {}]   ;;  %s8860_s1 = inlined_call_operand.vmem [shape: bf16[2,512,192], index: 1, kind: input, shape index: {}]   ;;  %s8861_s2 = inlined_call_operand.vmem [shape: bf16[512,256], index: 2, kind: input, shape index: {}]   ;;  %s8862_s3 = inlined_call_operand.vmem [shape: f32[1,256], index: 3, kind: input, shape index: {}]   ;;  %s8863_s4 = inlined_call_operand.vmem [shape: f32[128,256], index: 4, kind: input, shape index: {}]   ;;  %s8864_s5 = inlined_call_operand.vmem [shape: f32[1,256], index: 5, kind: input, shape index: {}]   ;;  %s8865_s6 = inlined_call_operand.vmem [shape: f32[1,256], index: 6, kind: input, shape index: {}]   ;;  %s8866_s7 = inlined_call_operand.vmem [shape: f32[1,256], index: 7, kind: input, shape index: {}]   ;;  %s8867_s8 = inlined_call_operand.vmem [shape: f32[128,64], index: 8, kind: input, shape index: {}]   ;;  %s8868_s9 = inlined_call_operand.vmem [shape: f32[64,4], index: 9, kind: input, shape index: {}]   ;;  %s8869_s10 = inlined_call_operand.<no memory space> [shape: f32[1,1], index: 10, kind: input, shape index: {}]   ;;  %s8870_s11 = inlined_call_operand.vmem [shape: f32[1,64], index: 11, kind: input, shape index: {}]   ;;  %s8871_s12 = inlined_call_operand.vmem [shape: f32[1,64], index: 12, kind: input, shape index: {}]   ;;  %s8872_s13 = inlined_call_operand.vmem [shape: f32[64,3], index: 13, kind: input, shape index: {}]   ;;  %s8873_s14 = inlined_call_operand.vmem [shape: f32[1,3], index: 14, kind: input, shape index: {}]   ;;  %s8874_s15 = inlined_call_operand.hbm [shape: f32[2,3], index: 15, kind: output, shape index: {0}]   ;;  %s8875_s16 = inlined_call_operand.hbm [shape: f32[2,128], index: 16, kind: output, shape index: {1}]   ;;  %s8876_s17 = inlined_call_operand.hbm [shape: f32[2,128], index: 17, kind: output, shape index: {2}]  }
   0x1   :  { %8909 = sst [smem:[#allocation29_spill]] %s8859_s0  ;;  %v23_v0 = vstv %s8869_s10 }
   0x2   :  { %8910 = sst [smem:[#allocation30_spill]] %s8860_s1  ;;  %24 = vst [vmem:[#allocation2] sm:$0x1] %v23_v0 }
   0x3   :  { %25 = vsyncpa [#allocation4], 0  ;;  %s8911_s28 = sld [smem:[#allocation30_spill]]  ;;  %vm1852_vm0 = vcmask 523264   ;;  %vm762_vm1 = vcmask 556032   ;;  %s8912_s19 = sld [smem:[#allocation29_spill]] }
   0x9   :  { %v5578_v1 = vld [vmem:[%s8911_s28 + $0x80] ss:$8 sps:$4 sm:$0xff]   ;;  %v5580_v2 = vld [vmem:[%s8911_s28 + $0x84] ss:$8 sps:$4 sm:$0xff]   ;;  %v5592_v17 = vld [vmem:[%s8912_s19 + $0x94] ss:$8 sps:$4 sm:$0xff]  }
   0xa   :  { %v5581_v3 = vld [vmem:[%s8912_s19 + $0x80] ss:$8 sps:$4 sm:$0xff]   ;;  %v5583_v4 = vld [vmem:[%s8912_s19 + $0x84] ss:$8 sps:$4 sm:$0xff]   ;;  %v1902_v5 = vsel %vm1852_vm0, %v5580_v2, 4286644096 }
   0xb   :  { %v1904_v6 = vmax.bf16 %v5578_v1, %v1902_v5  ;;  %v813_v7 = vsel %vm762_vm1, %v5583_v4, 4286644096  ;;  %v5586_v8 = vld [vmem:[%s8911_s28 + $0x284] ss:$8 sps:$4 sm:$0xff]   ;;  %v5584_v11 = vld [vmem:[%s8911_s28 + $0x280] ss:$8 sps:$4 sm:$0xff]  }
   0xc   :  { %v815_v9 = vmax.bf16 %v5581_v3, %v813_v7  ;;  %v5589_v10 = vld [vmem:[%s8912_s19 + $0x284] ss:$8 sps:$4 sm:$0xff]   ;;  %v2094_v12 = vsel %vm1852_vm0, %v5586_v8, 4286644096  ;;  %v5587_v13 = vld [vmem:[%s8912_s19 + $0x280] ss:$8 sps:$4 sm:$0xff]  }
   0xd   :  { %1905 = vmax.xlane.bf16.xlu1 %v1904_v6  ;;  %v1005_v14 = vsel %vm762_vm1, %v5589_v10, 4286644096  ;;  %v2096_v15 = vmax.bf16 %v5584_v11, %v2094_v12  ;;  %v5595_v18 = vld [vmem:[%s8912_s19 + $0x4] ss:$8 sps:$4 sm:$0xff]   ;;  %v5590_v19 = vld [vmem:[%s8912_s19 + $0x90] ss:$8 sps:$4 sm:$0xff]  }
   0xe   :  { %816 = vmax.xlane.bf16.xlu0 %v815_v9  ;;  %v1007_v16 = vmax.bf16 %v5587_v13, %v1005_v14  ;;  %v819_v20 = vsel %vm762_vm1, %v5592_v17, 4286644096  ;;  %v5593_v21 = vld [vmem:[%s8912_s19] ss:$8 sps:$4 sm:$0xff]   ;;  %v765_v22 = vsel %vm762_vm1, %v5595_v18, 4286644096 }
   0xf   :  { %v821_v23 = vmax.bf16 %v5590_v19, %v819_v20  ;;  %v767_v24 = vmax.bf16 %v5593_v21, %v765_v22  ;;  %v5598_v25 = vld [vmem:[%s8912_s19 + $0x294] ss:$8 sps:$4 sm:$0xff]   ;;  %v5601_v26 = vld [vmem:[%s8912_s19 + $0x204] ss:$8 sps:$4 sm:$0xff]   ;;  %v5596_v27 = vld [vmem:[%s8912_s19 + $0x290] ss:$8 sps:$4 sm:$0xff]  }
  0x10   :  { %v1011_v28 = vsel %vm762_vm1, %v5598_v25, 4286644096  ;;  %v5599_v29 = vld [vmem:[%s8912_s19 + $0x200] ss:$8 sps:$4 sm:$0xff]   ;;  %v957_v30 = vsel %vm762_vm1, %v5601_v26, 4286644096 }
  0x11   :  { %v1013_v31 = vmax.bf16 %v5596_v27, %v1011_v28  ;;  %v959_v32 = vmax.bf16 %v5599_v29, %v957_v30  ;;  %v5604_v33 = vld [vmem:[%s8911_s28 + $0x94] ss:$8 sps:$4 sm:$0xff]   ;;  %v5607_v34 = vld [vmem:[%s8911_s28 + $0x4] ss:$8 sps:$4 sm:$0xff]   ;;  %v5602_v35 = vld [vmem:[%s8911_s28 + $0x90] ss:$8 sps:$4 sm:$0xff]  }
  0x12   :  { %v1908_v36 = vsel %vm1852_vm0, %v5604_v33, 4286644096  ;;  %v5605_v37 = vld [vmem:[%s8911_s28] ss:$8 sps:$4 sm:$0xff]   ;;  %v1854_v38 = vsel %vm1852_vm0, %v5607_v34, 4286644096 }
  0x13   :  { %v1910_v39 = vmax.bf16 %v5602_v35, %v1908_v36  ;;  %v1856_v40 = vmax.bf16 %v5605_v37, %v1854_v38  ;;  %v5610_v41 = vld [vmem:[%s8911_s28 + $0x294] ss:$8 sps:$4 sm:$0xff]   ;;  %v5613_v42 = vld [vmem:[%s8911_s28 + $0x204] ss:$8 sps:$4 sm:$0xff]   ;;  %v5608_v43 = vld [vmem:[%s8911_s28 + $0x290] ss:$8 sps:$4 sm:$0xff]  }
  0x14   :  { %v2100_v44 = vsel %vm1852_vm0, %v5610_v41, 4286644096  ;;  %v5611_v45 = vld [vmem:[%s8911_s28 + $0x200] ss:$8 sps:$4 sm:$0xff]   ;;  %v2046_v46 = vsel %vm1852_vm0, %v5613_v42, 4286644096 }
  0x15   :  { %2097 = vmax.xlane.bf16.xlu1 %v2096_v15  ;;  %v2102_v47 = vmax.bf16 %v5608_v43, %v2100_v44  ;;  %v2048_v48 = vmax.bf16 %v5611_v45, %v2046_v46  ;;  %v5616_v49 = vld [vmem:[%s8912_s19 + $0x214] ss:$8 sps:$4 sm:$0xff]   ;;  %v5614_v51 = vld [vmem:[%s8912_s19 + $0x210] ss:$8 sps:$4 sm:$0xff]   ;;  %v5628_v1 = vld [vmem:[%s8912_s19 + $0x2a4] ss:$8 sps:$4 sm:$0xff]  }
  0x16   :  { %1008 = vmax.xlane.bf16.xlu0 %v1007_v16  ;;  %v5619_v50 = vld [vmem:[%s8912_s19 + $0x14] ss:$8 sps:$4 sm:$0xff]   ;;  %v963_v52 = vsel %vm762_vm1, %v5616_v49, 4286644096  ;;  %v5617_v53 = vld [vmem:[%s8912_s19 + $0x10] ss:$8 sps:$4 sm:$0xff]  }
  0x17   :  { %v771_v54 = vsel %vm762_vm1, %v5619_v50, 4286644096  ;;  %v965_v55 = vmax.bf16 %v5614_v51, %v963_v52  ;;  %v5622_v57 = vld [vmem:[%s8911_s28 + $0x214] ss:$8 sps:$4 sm:$0xff]   ;;  %v5620_v59 = vld [vmem:[%s8911_s28 + $0x210] ss:$8 sps:$4 sm:$0xff]  }
  0x18   :  { %v773_v56 = vmax.bf16 %v5617_v53, %v771_v54  ;;  %v5625_v58 = vld [vmem:[%s8911_s28 + $0x14] ss:$8 sps:$4 sm:$0xff]   ;;  %v2052_v60 = vsel %vm1852_vm0, %v5622_v57, 4286644096  ;;  %v5623_v61 = vld [vmem:[%s8911_s28 + $0x10] ss:$8 sps:$4 sm:$0xff]  }
  0x19   :  { %v1860_v62 = vsel %vm1852_vm0, %v5625_v58, 4286644096  ;;  %v2054_v63 = vmax.bf16 %v5620_v59, %v2052_v60  ;;  %v5631_v2 = vld [vmem:[%s8912_s19 + $0xa4] ss:$8 sps:$4 sm:$0xff]   ;;  %v5626_v3 = vld [vmem:[%s8912_s19 + $0x2a0] ss:$8 sps:$4 sm:$0xff]  }
  0x1a   :  { %v1862_v0 = vmax.bf16 %v5623_v61, %v1860_v62  ;;  %v1017_v4 = vsel %vm762_vm1, %v5628_v1, 4286644096  ;;  %v5629_v5 = vld [vmem:[%s8912_s19 + $0xa0] ss:$8 sps:$4 sm:$0xff]   ;;  %v825_v6 = vsel %vm762_vm1, %v5631_v2, 4286644096 }
  0x1b   :  { %v1019_v7 = vmax.bf16 %v5626_v3, %v1017_v4  ;;  %v827_v8 = vmax.bf16 %v5629_v5, %v825_v6  ;;  %v5634_v9 = vld [vmem:[%s8911_s28 + $0x2a4] ss:$8 sps:$4 sm:$0xff]   ;;  %v5632_v11 = vld [vmem:[%s8911_s28 + $0x2a0] ss:$8 sps:$4 sm:$0xff]   ;;  %v5652_v33 = vld [vmem:[%s8912_s19 + $0x2b4] ss:$8 sps:$4 sm:$0xff]  }
  0x1c   :  { %v5637_v10 = vld [vmem:[%s8911_s28 + $0xa4] ss:$8 sps:$4 sm:$0xff]   ;;  %v5635_v12 = vld [vmem:[%s8911_s28 + $0xa0] ss:$8 sps:$4 sm:$0xff]   ;;  %v2106_v13 = vsel %vm1852_vm0, %v5634_v9, 4286644096 }
  0x1d   :  { %822 = vmax.xlane.bf16.xlu1 %v821_v23  ;;  %v1914_v14 = vsel %vm1852_vm0, %v5637_v10, 4286644096  ;;  %v2108_v15 = vmax.bf16 %v5632_v11, %v2106_v13  ;;  %v5640_v17 = vld [vmem:[%s8912_s19 + $0x224] ss:$8 sps:$4 sm:$0xff]   ;;  %v5638_v18 = vld [vmem:[%s8912_s19 + $0x220] ss:$8 sps:$4 sm:$0xff]  }
  0x1e   :  { %768 = vmax.xlane.bf16.xlu0 %v767_v24  ;;  %v1916_v16 = vmax.bf16 %v5635_v12, %v1914_v14  ;;  %v5643_v19 = vld [vmem:[%s8912_s19 + $0x24] ss:$8 sps:$4 sm:$0xff]   ;;  %v5641_v20 = vld [vmem:[%s8912_s19 + $0x20] ss:$8 sps:$4 sm:$0xff]   ;;  %v969_v21 = vsel %vm762_vm1, %v5640_v17, 4286644096 }
  0x1f   :  { %v777_v22 = vsel %vm762_vm1, %v5643_v19, 4286644096  ;;  %v971_v23 = vmax.bf16 %v5638_v18, %v969_v21  ;;  %v5646_v25 = vld [vmem:[%s8911_s28 + $0x224] ss:$8 sps:$4 sm:$0xff]   ;;  %v5644_v26 = vld [vmem:[%s8911_s28 + $0x220] ss:$8 sps:$4 sm:$0xff]  }
  0x20   :  { %v779_v24 = vmax.bf16 %v5641_v20, %v777_v22  ;;  %v5649_v27 = vld [vmem:[%s8911_s28 + $0x24] ss:$8 sps:$4 sm:$0xff]   ;;  %v2058_v28 = vsel %vm1852_vm0, %v5646_v25, 4286644096  ;;  %v5647_v29 = vld [vmem:[%s8911_s28 + $0x20] ss:$8 sps:$4 sm:$0xff]  }
  0x21   :  { %v1866_v30 = vsel %vm1852_vm0, %v5649_v27, 4286644096  ;;  %v5650_v34 = vld [vmem:[%s8912_s19 + $0x2b0] ss:$8 sps:$4 sm:$0xff]   ;;  %v5655_v35 = vld [vmem:[%s8912_s19 + $0xb4] ss:$8 sps:$4 sm:$0xff]  }
  0x22   :  { %v5653_v36 = vld [vmem:[%s8912_s19 + $0xb0] ss:$8 sps:$4 sm:$0xff]   ;;  %v1023_v37 = vsel %vm762_vm1, %v5652_v33, 4286644096  ;;  %v831_v38 = vsel %vm762_vm1, %v5655_v35, 4286644096 }
  0x23   :  { %v5658_v41 = vld [vmem:[%s8911_s28 + $0x2b4] ss:$8 sps:$4 sm:$0xff]   ;;  %v5656_v42 = vld [vmem:[%s8911_s28 + $0x2b0] ss:$8 sps:$4 sm:$0xff]   ;;  %v5676_v1 = vld [vmem:[%s8912_s19 + $0x2c4] ss:$8 sps:$4 sm:$0xff]  }
  0x24   :  { %v5661_v43 = vld [vmem:[%s8911_s28 + $0xb4] ss:$8 sps:$4 sm:$0xff]   ;;  %v5659_v44 = vld [vmem:[%s8911_s28 + $0xb0] ss:$8 sps:$4 sm:$0xff]   ;;  %v2112_v45 = vsel %vm1852_vm0, %v5658_v41, 4286644096 }
  0x25   :  { %1014 = vmax.xlane.bf16.xlu1 %v1013_v31  ;;  %v2060_v31 = vmax.bf16 %v5644_v26, %v2058_v28  ;;  %v1920_v46 = vsel %vm1852_vm0, %v5661_v43, 4286644096  ;;  %v5664_v49 = vld [vmem:[%s8912_s19 + $0x234] ss:$8 sps:$4 sm:$0xff]   ;;  %v5662_v50 = vld [vmem:[%s8912_s19 + $0x230] ss:$8 sps:$4 sm:$0xff]  }
  0x26   :  { %960 = vmax.xlane.bf16.xlu0 %v959_v32  ;;  %v1868_v32 = vmax.bf16 %v5647_v29, %v1866_v30  ;;  %v5667_v51 = vld [vmem:[%s8912_s19 + $0x34] ss:$8 sps:$4 sm:$0xff]   ;;  %v5665_v52 = vld [vmem:[%s8912_s19 + $0x30] ss:$8 sps:$4 sm:$0xff]   ;;  %v975_v53 = vsel %vm762_vm1, %v5664_v49, 4286644096 }
  0x27   :  { %v783_v54 = vsel %vm762_vm1, %v5667_v51, 4286644096  ;;  %v5670_v57 = vld [vmem:[%s8911_s28 + $0x234] ss:$8 sps:$4 sm:$0xff]   ;;  %v5668_v58 = vld [vmem:[%s8911_s28 + $0x230] ss:$8 sps:$4 sm:$0xff]  }
  0x28   :  { %v5673_v59 = vld [vmem:[%s8911_s28 + $0x34] ss:$8 sps:$4 sm:$0xff]   ;;  %v2064_v60 = vsel %vm1852_vm0, %v5670_v57, 4286644096  ;;  %v5671_v61 = vld [vmem:[%s8911_s28 + $0x30] ss:$8 sps:$4 sm:$0xff]  }
  0x29   :  { %v1872_v62 = vsel %vm1852_vm0, %v5673_v59, 4286644096  ;;  %v5674_v2 = vld [vmem:[%s8912_s19 + $0x2c0] ss:$8 sps:$4 sm:$0xff]   ;;  %v5679_v3 = vld [vmem:[%s8912_s19 + $0xc4] ss:$8 sps:$4 sm:$0xff]  }
  0x2a   :  { %v5677_v4 = vld [vmem:[%s8912_s19 + $0xc0] ss:$8 sps:$4 sm:$0xff]   ;;  %v1029_v5 = vsel %vm762_vm1, %v5676_v1, 4286644096  ;;  %v837_v6 = vsel %vm762_vm1, %v5679_v3, 4286644096 }
  0x2b   :  { %v5682_v9 = vld [vmem:[%s8911_s28 + $0x2c4] ss:$8 sps:$4 sm:$0xff]   ;;  %v5680_v10 = vld [vmem:[%s8911_s28 + $0x2c0] ss:$8 sps:$4 sm:$0xff]   ;;  %v5700_v33 = vld [vmem:[%s8912_s19 + $0x2d4] ss:$8 sps:$4 sm:$0xff]  }
  0x2c   :  { %v5685_v11 = vld [vmem:[%s8911_s28 + $0xc4] ss:$8 sps:$4 sm:$0xff]   ;;  %v5683_v12 = vld [vmem:[%s8911_s28 + $0xc0] ss:$8 sps:$4 sm:$0xff]   ;;  %v2118_v13 = vsel %vm1852_vm0, %v5682_v9, 4286644096 }
  0x2d   :  { %1911 = vmax.xlane.bf16.xlu1 %v1910_v39  ;;  %v1025_v39 = vmax.bf16 %v5650_v34, %v1023_v37  ;;  %v1926_v14 = vsel %vm1852_vm0, %v5685_v11, 4286644096  ;;  %v5688_v17 = vld [vmem:[%s8912_s19 + $0x244] ss:$8 sps:$4 sm:$0xff]   ;;  %v5686_v18 = vld [vmem:[%s8912_s19 + $0x240] ss:$8 sps:$4 sm:$0xff]  }
  0x2e   :  { %1857 = vmax.xlane.bf16.xlu0 %v1856_v40  ;;  %v833_v40 = vmax.bf16 %v5653_v36, %v831_v38  ;;  %v5691_v19 = vld [vmem:[%s8912_s19 + $0x44] ss:$8 sps:$4 sm:$0xff]   ;;  %v5689_v20 = vld [vmem:[%s8912_s19 + $0x40] ss:$8 sps:$4 sm:$0xff]   ;;  %v981_v21 = vsel %vm762_vm1, %v5688_v17, 4286644096 }
  0x2f   :  { %v789_v22 = vsel %vm762_vm1, %v5691_v19, 4286644096  ;;  %v5694_v25 = vld [vmem:[%s8911_s28 + $0x244] ss:$8 sps:$4 sm:$0xff]   ;;  %v5692_v26 = vld [vmem:[%s8911_s28 + $0x240] ss:$8 sps:$4 sm:$0xff]  }
  0x30   :  { %v5697_v27 = vld [vmem:[%s8911_s28 + $0x44] ss:$8 sps:$4 sm:$0xff]   ;;  %v2070_v28 = vsel %vm1852_vm0, %v5694_v25, 4286644096  ;;  %v5695_v29 = vld [vmem:[%s8911_s28 + $0x40] ss:$8 sps:$4 sm:$0xff]  }
  0x31   :  { %v1878_v30 = vsel %vm1852_vm0, %v5697_v27, 4286644096  ;;  %v5698_v34 = vld [vmem:[%s8912_s19 + $0x2d0] ss:$8 sps:$4 sm:$0xff]   ;;  %v5703_v35 = vld [vmem:[%s8912_s19 + $0xd4] ss:$8 sps:$4 sm:$0xff]  }
  0x32   :  { %v5701_v36 = vld [vmem:[%s8912_s19 + $0xd0] ss:$8 sps:$4 sm:$0xff]   ;;  %v1035_v37 = vsel %vm762_vm1, %v5700_v33, 4286644096  ;;  %v843_v38 = vsel %vm762_vm1, %v5703_v35, 4286644096 }
  0x33   :  { %v5706_v41 = vld [vmem:[%s8911_s28 + $0x2d4] ss:$8 sps:$4 sm:$0xff]  }
  0x35   :  { %2103 = vmax.xlane.bf16.xlu1 %v2102_v47  ;;  %v2114_v47 = vmax.bf16 %v5656_v42, %v2112_v45  ;;  %v5709_v42 = vld [vmem:[%s8911_s28 + $0xd4] ss:$8 sps:$4 sm:$0xff]  }
  0x36   :  { %2049 = vmax.xlane.bf16.xlu0 %v2048_v48  ;;  %v1922_v48 = vmax.bf16 %v5659_v44, %v1920_v46 }
  0x3d   :  { %966 = vmax.xlane.bf16.xlu1 %v965_v55  ;;  %v977_v55 = vmax.bf16 %v5662_v50, %v975_v53 }
  0x3e   :  { %774 = vmax.xlane.bf16.xlu0 %v773_v56  ;;  %v785_v56 = vmax.bf16 %v5665_v52, %v783_v54 }
  0x45   :  { %2055 = vmax.xlane.bf16.xlu1 %v2054_v63  ;;  %v2066_v63 = vmax.bf16 %v5668_v58, %v2064_v60 }
  0x46   :  { %1863 = vmax.xlane.bf16.xlu0 %v1862_v0  ;;  %v1874_v0 = vmax.bf16 %v5671_v61, %v1872_v62 }
  0x4d   :  { %1020 = vmax.xlane.bf16.xlu1 %v1019_v7  ;;  %v1031_v7 = vmax.bf16 %v5674_v2, %v1029_v5 }
  0x4e   :  { %828 = vmax.xlane.bf16.xlu0 %v827_v8  ;;  %v839_v8 = vmax.bf16 %v5677_v4, %v837_v6 }
  0x55   :  { %2109 = vmax.xlane.bf16.xlu1 %v2108_v15  ;;  %v2120_v15 = vmax.bf16 %v5680_v10, %v2118_v13 }
  0x56   :  { %1917 = vmax.xlane.bf16.xlu0 %v1916_v16  ;;  %v1928_v16 = vmax.bf16 %v5683_v12, %v1926_v14 }
  0x5d   :  { %972 = vmax.xlane.bf16.xlu1 %v971_v23  ;;  %v983_v23 = vmax.bf16 %v5686_v18, %v981_v21 }
  0x5e   :  { %780 = vmax.xlane.bf16.xlu0 %v779_v24  ;;  %v791_v24 = vmax.bf16 %v5689_v20, %v789_v22 }
  0x65   :  { %2061 = vmax.xlane.bf16.xlu1 %v2060_v31  ;;  %v2072_v31 = vmax.bf16 %v5692_v26, %v2070_v28 }
  0x66   :  { %1869 = vmax.xlane.bf16.xlu0 %v1868_v32  ;;  %v1880_v32 = vmax.bf16 %v5695_v29, %v1878_v30 }
  0x6d   :  { %1026 = vmax.xlane.bf16.xlu1 %v1025_v39  ;;  %v1037_v39 = vmax.bf16 %v5698_v34, %v1035_v37 }
  0x6e   :  { %834 = vmax.xlane.bf16.xlu0 %v833_v40  ;;  %v845_v40 = vmax.bf16 %v5701_v36, %v843_v38 }
  0x75   :  { %2115 = vmax.xlane.bf16.xlu1 %v2114_v47 }
  0x76   :  { %1923 = vmax.xlane.bf16.xlu0 %v1922_v48 }
  0x7d   :  { %978 = vmax.xlane.bf16.xlu1 %v977_v55 }
  0x7e   :  { %786 = vmax.xlane.bf16.xlu0 %v785_v56 }
  0x85   :  { %2067 = vmax.xlane.bf16.xlu1 %v2066_v63 }
  0x86   :  { %1875 = vmax.xlane.bf16.xlu0 %v1874_v0 }
  0x8d   :  { %1032 = vmax.xlane.bf16.xlu1 %v1031_v7 }
  0x8e   :  { %840 = vmax.xlane.bf16.xlu0 %v839_v8 }
  0x95   :  { %2121 = vmax.xlane.bf16.xlu1 %v2120_v15 }
  0x96   :  { %1929 = vmax.xlane.bf16.xlu0 %v1928_v16 }
  0x9d   :  { %984 = vmax.xlane.bf16.xlu1 %v983_v23 }
  0x9e   :  { %792 = vmax.xlane.bf16.xlu0 %v791_v24 }
  0xa5   :  { %2073 = vmax.xlane.bf16.xlu1 %v2072_v31 }
  0xa6   :  { %1881 = vmax.xlane.bf16.xlu0 %v1880_v32 }
  0xa7   :  { %26 = vsyncpa [#allocation6], 0  ;;  %v5704_v43 = vld [vmem:[%s8911_s28 + $0x2d0] ss:$8 sps:$4 sm:$0xff]   ;;  %v2124_v44 = vsel %vm1852_vm0, %v5706_v41, 4286644096 }
  0xa8   :  { %v5707_v45 = vld [vmem:[%s8911_s28 + $0xd0] ss:$8 sps:$4 sm:$0xff]   ;;  %v1932_v46 = vsel %vm1852_vm0, %v5709_v42, 4286644096  ;;  %v2126_v47 = vmax.bf16 %v5704_v43, %v2124_v44  ;;  %v5712_v49 = vld [vmem:[%s8912_s19 + $0x254] ss:$8 sps:$4 sm:$0xff]  }
  0xa9   :  { %v1934_v48 = vmax.bf16 %v5707_v45, %v1932_v46  ;;  %v5715_v50 = vld [vmem:[%s8912_s19 + $0x54] ss:$8 sps:$4 sm:$0xff]   ;;  %v5710_v51 = vld [vmem:[%s8912_s19 + $0x250] ss:$8 sps:$4 sm:$0xff]   ;;  %v987_v52 = vsel %vm762_vm1, %v5712_v49, 4286644096 }
  0xaa   :  { %v5713_v53 = vld [vmem:[%s8912_s19 + $0x50] ss:$8 sps:$4 sm:$0xff]   ;;  %v795_v54 = vsel %vm762_vm1, %v5715_v50, 4286644096  ;;  %v989_v55 = vmax.bf16 %v5710_v51, %v987_v52  ;;  %v5718_v57 = vld [vmem:[%s8911_s28 + $0x254] ss:$8 sps:$4 sm:$0xff]  }
  0xab   :  { %v797_v56 = vmax.bf16 %v5713_v53, %v795_v54  ;;  %v5721_v58 = vld [vmem:[%s8911_s28 + $0x54] ss:$8 sps:$4 sm:$0xff]   ;;  %v5716_v59 = vld [vmem:[%s8911_s28 + $0x250] ss:$8 sps:$4 sm:$0xff]   ;;  %v2076_v60 = vsel %vm1852_vm0, %v5718_v57, 4286644096 }
  0xac   :  { %v5719_v61 = vld [vmem:[%s8911_s28 + $0x50] ss:$8 sps:$4 sm:$0xff]   ;;  %v1884_v62 = vsel %vm1852_vm0, %v5721_v58, 4286644096  ;;  %v2078_v63 = vmax.bf16 %v5716_v59, %v2076_v60  ;;  %v5724_v1 = vld [vmem:[%s8912_s19 + $0x2e4] ss:$8 sps:$4 sm:$0xff]  }
  0xad   :  { %1038 = vmax.xlane.bf16.xlu1 %v1037_v39  ;;  %v1886_v0 = vmax.bf16 %v5719_v61, %v1884_v62  ;;  %v5727_v2 = vld [vmem:[%s8912_s19 + $0xe4] ss:$8 sps:$4 sm:$0xff]   ;;  %v5722_v3 = vld [vmem:[%s8912_s19 + $0x2e0] ss:$8 sps:$4 sm:$0xff]   ;;  %v1041_v4 = vsel %vm762_vm1, %v5724_v1, 4286644096 }
  0xae   :  { %846 = vmax.xlane.bf16.xlu0 %v845_v40  ;;  %v5725_v5 = vld [vmem:[%s8912_s19 + $0xe0] ss:$8 sps:$4 sm:$0xff]   ;;  %v849_v6 = vsel %vm762_vm1, %v5727_v2, 4286644096  ;;  %v1043_v7 = vmax.bf16 %v5722_v3, %v1041_v4  ;;  %v5730_v9 = vld [vmem:[%s8911_s28 + $0x2e4] ss:$8 sps:$4 sm:$0xff]  }
  0xaf   :  { %v851_v8 = vmax.bf16 %v5725_v5, %v849_v6  ;;  %v5733_v10 = vld [vmem:[%s8911_s28 + $0xe4] ss:$8 sps:$4 sm:$0xff]   ;;  %v5728_v11 = vld [vmem:[%s8911_s28 + $0x2e0] ss:$8 sps:$4 sm:$0xff]   ;;  %v2130_v12 = vsel %vm1852_vm0, %v5730_v9, 4286644096 }
  0xb0   :  { %v5731_v13 = vld [vmem:[%s8911_s28 + $0xe0] ss:$8 sps:$4 sm:$0xff]   ;;  %v1938_v14 = vsel %vm1852_vm0, %v5733_v10, 4286644096  ;;  %v2132_v15 = vmax.bf16 %v5728_v11, %v2130_v12  ;;  %v5736_v17 = vld [vmem:[%s8912_s19 + $0x264] ss:$8 sps:$4 sm:$0xff]  }
  0xb1   :  { %v1940_v16 = vmax.bf16 %v5731_v13, %v1938_v14  ;;  %v5739_v18 = vld [vmem:[%s8912_s19 + $0x64] ss:$8 sps:$4 sm:$0xff]   ;;  %v5734_v19 = vld [vmem:[%s8912_s19 + $0x260] ss:$8 sps:$4 sm:$0xff]   ;;  %v993_v20 = vsel %vm762_vm1, %v5736_v17, 4286644096 }
  0xb2   :  { %v5737_v21 = vld [vmem:[%s8912_s19 + $0x60] ss:$8 sps:$4 sm:$0xff]   ;;  %v801_v22 = vsel %vm762_vm1, %v5739_v18, 4286644096  ;;  %v995_v23 = vmax.bf16 %v5734_v19, %v993_v20  ;;  %v5742_v25 = vld [vmem:[%s8911_s28 + $0x264] ss:$8 sps:$4 sm:$0xff]  }
  0xb3   :  { %v803_v24 = vmax.bf16 %v5737_v21, %v801_v22  ;;  %v5745_v26 = vld [vmem:[%s8911_s28 + $0x64] ss:$8 sps:$4 sm:$0xff]   ;;  %v5740_v27 = vld [vmem:[%s8911_s28 + $0x260] ss:$8 sps:$4 sm:$0xff]   ;;  %v2082_v28 = vsel %vm1852_vm0, %v5742_v25, 4286644096 }
  0xb4   :  { %v5743_v29 = vld [vmem:[%s8911_s28 + $0x60] ss:$8 sps:$4 sm:$0xff]   ;;  %v1890_v30 = vsel %vm1852_vm0, %v5745_v26, 4286644096  ;;  %v5836_v31 = vld [vmem:[%s8861_s2 + $0x4] ss:$8 sps:$4 sm:$0xff]   ;;  %v2084_v32 = vmax.bf16 %v5740_v27, %v2082_v28 }
  0xb5   :  { %2127 = vmax.xlane.bf16.xlu1 %v2126_v47  ;;  %v5838_v33 = vld [vmem:[%s8861_s2] ss:$8 sps:$4 sm:$0xff]   ;;  %v1892_v34 = vmax.bf16 %v5743_v29, %v1890_v30  ;;  %v5748_v35 = vld [vmem:[%s8912_s19 + $0x2f4] ss:$8 sps:$4 sm:$0xff]   ;;  %4348 = vmatprep.subr.bf16.mxu0 %v5836_v31  ;;  %v5746_v38 = vld [vmem:[%s8912_s19 + $0x2f0] ss:$8 sps:$4 sm:$0xff]  }
  0xb6   :  { %1935 = vmax.xlane.bf16.xlu0 %v1934_v48  ;;  %v5751_v36 = vld [vmem:[%s8912_s19 + $0xf4] ss:$8 sps:$4 sm:$0xff]   ;;  %4349 = vmatpush1.bf16.msra.mxu0 %v5838_v33  ;;  %v5847_v39 = vld [vmem:[%s8861_s2 + $0x10] ss:$8 sps:$4 sm:$0xff]   ;;  %v1047_v40 = vsel %vm762_vm1, %v5748_v35, 4286644096 }
  0xb7   :  { %v5839_v37 = vld [vmem:[%s8861_s2 + $0x14] ss:$8 sps:$4 sm:$0xff]   ;;  %v5749_v41 = vld [vmem:[%s8912_s19 + $0xf0] ss:$8 sps:$4 sm:$0xff]   ;;  %v855_v42 = vsel %vm762_vm1, %v5751_v36, 4286644096  ;;  %v1049_v44 = vmax.bf16 %v5746_v38, %v1047_v40  ;;  %v6792_v36 = vpop.xlane.xlu1 %1905 }
  0xb8   :  { %4350 = vmatprep.subr.bf16.mxu0 %v5839_v37  ;;  %v5848_v43 = vld [vmem:[%s8861_s2 + $0x24] ss:$8 sps:$4 sm:$0xff]   ;;  %v5850_v45 = vld [vmem:[%s8861_s2 + $0x20] ss:$8 sps:$4 sm:$0xff]   ;;  %v857_v46 = vmax.bf16 %v5749_v41, %v855_v42  ;;  %v5754_v47 = vld [vmem:[%s8911_s28 + $0x2f4] ss:$8 sps:$4 sm:$0xff]  }
  0xb9   :  { %v5757_v48 = vld [vmem:[%s8911_s28 + $0xf4] ss:$8 sps:$4 sm:$0xff]   ;;  %v5752_v50 = vld [vmem:[%s8911_s28 + $0x2f0] ss:$8 sps:$4 sm:$0xff]   ;;  %v2136_v52 = vsel %vm1852_vm0, %v5754_v47, 4286644096 }
  0xba   :  { %4351 = vmatpush1.bf16.msra.mxu0 %v5847_v39  ;;  %v5851_v49 = vld [vmem:[%s8861_s2 + $0x34] ss:$8 sps:$4 sm:$0xff]   ;;  %v5859_v51 = vld [vmem:[%s8861_s2 + $0x30] ss:$8 sps:$4 sm:$0xff]   ;;  %v1944_v54 = vsel %vm1852_vm0, %v5757_v48, 4286644096  ;;  %v6798_v39 = vpop.xlane.xlu0 %816 }
  0xbb   :  { %4352 = vmatprep.subr.bf16.mxu0 %v5848_v43  ;;  %v5755_v53 = vld [vmem:[%s8911_s28 + $0xf0] ss:$8 sps:$4 sm:$0xff]   ;;  %v5862_v57 = vld [vmem:[%s8861_s2 + $0x40] ss:$8 sps:$4 sm:$0xff]   ;;  %v5760_v59 = vld [vmem:[%s8912_s19 + $0x274] ss:$8 sps:$4 sm:$0xff]  }
  0xbc   :  { %v1946_v58 = vmax.bf16 %v5755_v53, %v1944_v54  ;;  %v5763_v60 = vld [vmem:[%s8912_s19 + $0x74] ss:$8 sps:$4 sm:$0xff]   ;;  %v5758_v62 = vld [vmem:[%s8912_s19 + $0x270] ss:$8 sps:$4 sm:$0xff]   ;;  %v5872_v3 = vld [vmem:[%s8861_s2 + $0x64] ss:$8 sps:$4 sm:$0xff]  }
  0xbd   :  { %990 = vmax.xlane.bf16.xlu1 %v989_v55  ;;  %v5860_v55 = vld [vmem:[%s8861_s2 + $0x44] ss:$8 sps:$4 sm:$0xff]   ;;  %v5863_v61 = vld [vmem:[%s8861_s2 + $0x54] ss:$8 sps:$4 sm:$0xff]   ;;  %v5761_v1 = vld [vmem:[%s8912_s19 + $0x70] ss:$8 sps:$4 sm:$0xff]  }
  0xbe   :  { %798 = vmax.xlane.bf16.xlu0 %v797_v56  ;;  %4353 = vmatpush1.bf16.msra.mxu0 %v5850_v45  ;;  %v2138_v56 = vmax.bf16 %v5752_v50, %v2136_v52  ;;  %v807_v2 = vsel %vm762_vm1, %v5763_v60, 4286644096  ;;  %v5874_v5 = vld [vmem:[%s8861_s2 + $0x60] ss:$8 sps:$4 sm:$0xff]   ;;  %v5875_v9 = vld [vmem:[%s8861_s2 + $0x74] ss:$8 sps:$4 sm:$0xff]   ;;  %v6812_v47 = vpop.xlane.xlu0 %1008 }
  0xbf   :  { %4354 = vmatprep.subr.bf16.mxu0 %v5851_v49  ;;  %v809_v6 = vmax.bf16 %v5761_v1, %v807_v2  ;;  %v5764_v10 = vld [vmem:[%s8911_s28 + $0x270] ss:$8 sps:$4 sm:$0xff]   ;;  %v5886_v17 = vld [vmem:[%s8861_s2 + $0x80] ss:$8 sps:$4 sm:$0xff]   ;;  %v5772_v19 = vld [vmem:[%s8912_s19 + $0x384] ss:$8 sps:$4 sm:$0xff]   ;;  %v2429_v1 = vlaneseq }
  0xc0   :  { %v5883_v11 = vld [vmem:[%s8861_s2 + $0x70] ss:$8 sps:$4 sm:$0xff]   ;;  %v5775_v20 = vld [vmem:[%s8912_s19 + $0x184] ss:$8 sps:$4 sm:$0xff]   ;;  %v5887_v21 = vld [vmem:[%s8861_s2 + $0x94] ss:$8 sps:$4 sm:$0xff]  }
  0xc1   :  { %v5767_v13 = vld [vmem:[%s8911_s28 + $0x70] ss:$8 sps:$4 sm:$0xff]   ;;  %v5770_v22 = vld [vmem:[%s8912_s19 + $0x380] ss:$8 sps:$4 sm:$0xff]   ;;  %v909_v26 = vsel %vm762_vm1, %v5775_v20, 4286644096 }
  0xc2   :  { %4355 = vmatpush1.bf16.msra.mxu0 %v5859_v51  ;;  %v5773_v25 = vld [vmem:[%s8912_s19 + $0x180] ss:$8 sps:$4 sm:$0xff]   ;;  %v5896_v27 = vld [vmem:[%s8861_s2 + $0xa4] ss:$8 sps:$4 sm:$0xff]   ;;  %v5899_v33 = vld [vmem:[%s8861_s2 + $0xb4] ss:$8 sps:$4 sm:$0xff]  }
  0xc3   :  { %4356 = vmatprep.subr.bf16.mxu0 %v5860_v55  ;;  %v5898_v29 = vld [vmem:[%s8861_s2 + $0xa0] ss:$8 sps:$4 sm:$0xff]   ;;  %v911_v30 = vmax.bf16 %v5773_v25, %v909_v26  ;;  %v5778_v31 = vld [vmem:[%s8911_s28 + $0x384] ss:$8 sps:$4 sm:$0xff]   ;;  %v5907_v35 = vld [vmem:[%s8861_s2 + $0xb0] ss:$8 sps:$4 sm:$0xff]   ;;  %v6832_v55 = vpop.xlane.xlu0 %768 }
  0xc4   :  { %v2190_v37 = vsel %vm1852_vm0, %v5778_v31, 4286644096  ;;  %v5779_v38 = vld [vmem:[%s8911_s28 + $0x180] ss:$8 sps:$4 sm:$0xff]   ;;  %v5908_v41 = vld [vmem:[%s8861_s2 + $0xc4] ss:$8 sps:$4 sm:$0xff]  }
  0xc5   :  { %2079 = vmax.xlane.bf16.xlu1 %v2078_v63  ;;  %v5871_v63 = vld [vmem:[%s8861_s2 + $0x50] ss:$8 sps:$4 sm:$0xff]   ;;  %v5910_v43 = vld [vmem:[%s8861_s2 + $0xc0] ss:$8 sps:$4 sm:$0xff]   ;;  %v5787_v48 = vld [vmem:[%s8912_s19 + $0x104] ss:$8 sps:$4 sm:$0xff]  }
  0xc6   :  { %1887 = vmax.xlane.bf16.xlu0 %v1886_v0  ;;  %4357 = vmatpush1.bf16.msra.mxu0 %v5862_v57  ;;  %v999_v0 = vsel %vm762_vm1, %v5760_v59, 4286644096  ;;  %v5911_v49 = vld [vmem:[%s8861_s2 + $0xd4] ss:$8 sps:$4 sm:$0xff]   ;;  %v5782_v50 = vld [vmem:[%s8912_s19 + $0x190] ss:$8 sps:$4 sm:$0xff]  }
  0xc7   :  { %4358 = vmatprep.subr.bf16.mxu0 %v5863_v61  ;;  %v1001_v4 = vmax.bf16 %v5758_v62, %v999_v0  ;;  %v5919_v51 = vld [vmem:[%s8861_s2 + $0xd0] ss:$8 sps:$4 sm:$0xff]   ;;  %v5785_v54 = vld [vmem:[%s8912_s19 + $0x100] ss:$8 sps:$4 sm:$0xff]   ;;  %v5920_v57 = vld [vmem:[%s8861_s2 + $0xe4] ss:$8 sps:$4 sm:$0xff]  }
  0xc8   :  { %v5922_v59 = vld [vmem:[%s8861_s2 + $0xe0] ss:$8 sps:$4 sm:$0xff]   ;;  %v5790_v62 = vld [vmem:[%s8912_s19 + $0x394] ss:$8 sps:$4 sm:$0xff]   ;;  %v5793_v0 = vld [vmem:[%s8912_s19 + $0x304] ss:$8 sps:$4 sm:$0xff]  }
  0xc9   :  { %v5923_v2 = vld [vmem:[%s8861_s2 + $0xf4] ss:$8 sps:$4 sm:$0xff]   ;;  %v5794_v20 = vld [vmem:[%s8911_s28 + $0x190] ss:$8 sps:$4 sm:$0xff]   ;;  %v5797_v25 = vld [vmem:[%s8911_s28 + $0x100] ss:$8 sps:$4 sm:$0xff]  }
  0xca   :  { %4359 = vmatpush1.bf16.msra.mxu0 %v5871_v63  ;;  %v6846_v63 = vpop.xlane.xlu0 %960  ;;  %vm2440_vm2 = vcmask 130112   ;;  %vm2447_vm3 = vcmask 195712   ;;  %vm2454_vm4 = vcmask 261312   ;;  %vm2461_vm5 = vcmask 326912   ;;  %s6151_s25 = smov 48   ;;  %s6152_s26 = smov 80  }
  0xcb   :  { %4360 = vmatprep.subr.bf16.mxu0 %v5872_v3  ;;  %v5788_v3 = vld [vmem:[%s8912_s19 + $0x390] ss:$8 sps:$4 sm:$0xff]   ;;  %vm2468_vm6 = vcmask 392512   ;;  %vm8908_vm7 = vcmask 458112   ;;  %vm8907_vm8 = vcmask 523712   ;;  %vm8906_vm9 = vcmask 589312  }
  0xcc   :  { %vm8905_vm10 = vcmask 654912   ;;  %vm2503_vm11 = vcmask 720512   ;;  %vm2510_vm12 = vcmask 786112   ;;  %vm2517_vm13 = vcmask 851712  }
  0xcd   :  { %1044 = vmax.xlane.bf16.xlu1 %v1043_v7  ;;  %v5766_v7 = vld [vmem:[%s8911_s28 + $0x274] ss:$8 sps:$4 sm:$0xff]   ;;  %vm2524_vm14 = vcmask 917312   ;;  %vm2531_vm15 = vcmask 982912  }
  0xce   :  { %852 = vmax.xlane.bf16.xlu0 %v851_v8  ;;  %v5769_v8 = vld [vmem:[%s8911_s28 + $0x74] ss:$8 sps:$4 sm:$0xff]   ;;  %4361 = vmatpush1.bf16.msra.mxu0 %v5874_v5  ;;  %v2088_v12 = vsel %vm1852_vm0, %v5766_v7, 4286644096  ;;  %v5791_v7 = vld [vmem:[%s8912_s19 + $0x300] ss:$8 sps:$4 sm:$0xff]  }
  0xcf   :  { %4362 = vmatprep.subr.bf16.mxu0 %v5875_v9  ;;  %v1896_v14 = vsel %vm1852_vm0, %v5769_v8, 4286644096  ;;  %v6866_v8 = vpop.xlane.xlu0 %1857  ;;  %v1053_v9 = vsel %vm762_vm1, %v5793_v0, 4286644096 }
  0xd0   :  { %v1898_v18 = vmax.bf16 %v5767_v13, %v1896_v14  ;;  %v1055_v13 = vmax.bf16 %v5791_v7, %v1053_v9  ;;  %v5796_v14 = vld [vmem:[%s8911_s28 + $0x194] ss:$8 sps:$4 sm:$0xff]   ;;  %v2301_v9 = vunpack.c.l.b16 %v6832_v55 }
  0xd2   :  { %4363 = vmatpush1.bf16.msra.mxu0 %v5883_v11 }
  0xd5   :  { %2133 = vmax.xlane.bf16.xlu1 %v2132_v15  ;;  %v5884_v15 = vld [vmem:[%s8861_s2 + $0x84] ss:$8 sps:$4 sm:$0xff]  }
  0xd6   :  { %1941 = vmax.xlane.bf16.xlu0 %v1940_v16  ;;  %v2090_v16 = vmax.bf16 %v5764_v10, %v2088_v12  ;;  %4364 = vmatprep.subr.bf16.mxu0 %v5884_v15  ;;  %v6869_v10 = vand.u32 127, %v2429_v1  ;;  %v6876_v15 = vpop.xlane.xlu0 %2049 }
  0xd7   :  { %4365 = vmatpush1.bf16.msra.mxu0 %v5886_v17  ;;  %v6881_v17 = vshrl.u32 %v2429_v1, 7 }
  0xd8   :  { %4366 = vmatprep.subr.bf16.mxu0 %v5887_v21  ;;  %v2449_v21 = vadd.s32 4294967272, %v6869_v10 }
  0xd9   :  { %8913 = vst [vmem:[#allocation10_spill] sm:$0xff] %v6881_v17  ;;  %v6904_v31 = vsub.s32 %v6869_v10, %v6881_v17 }
  0xda   :  { %v6896_v26 = vpop.xlane.xlu0 %774 }
  0xdb   :  { %8914 = vst [vmem:[#allocation11_spill] sm:$0xff] %v6904_v31 }
  0xdd   :  { %996 = vmax.xlane.bf16.xlu1 %v995_v23  ;;  %v5895_v23 = vld [vmem:[%s8861_s2 + $0x90] ss:$8 sps:$4 sm:$0xff]  }
  0xde   :  { %804 = vmax.xlane.bf16.xlu0 %v803_v24  ;;  %v1101_v24 = vsel %vm762_vm1, %v5772_v19, 4286644096  ;;  %4367 = vmatpush1.bf16.msra.mxu0 %v5895_v23  ;;  %v2442_v19 = vadd.s32 4294967280, %v6869_v10  ;;  %v2456_v23 = vadd.s32 4294967264, %v6869_v10 }
  0xdf   :  { %v1103_v28 = vmax.bf16 %v5770_v22, %v1101_v24  ;;  %4368 = vmatprep.subr.bf16.mxu0 %v5896_v27  ;;  %v2004_v24 = vsel %vm1852_vm0, %v5796_v14, 4286644096  ;;  %v2463_v27 = vadd.s32 4294967256, %v6869_v10 }
  0xe2   :  { %4369 = vmatpush1.bf16.msra.mxu0 %v5898_v29  ;;  %v2477_v29 = vadd.s32 4294967240, %v6869_v10 }
  0xe3   :  { %4370 = vmatprep.subr.bf16.mxu0 %v5899_v33  ;;  %v6910_v33 = vsub.s32 %v2442_v19, %v6881_v17 }
  0xe5   :  { %2085 = vmax.xlane.bf16.xlu1 %v2084_v32  ;;  %v5781_v32 = vld [vmem:[%s8911_s28 + $0x184] ss:$8 sps:$4 sm:$0xff]   ;;  %8916 = vst [vmem:[#allocation13_spill] sm:$0xff] %v6910_v33 }
  0xe6   :  { %1893 = vmax.xlane.bf16.xlu0 %v1892_v34  ;;  %v5776_v34 = vld [vmem:[%s8911_s28 + $0x380] ss:$8 sps:$4 sm:$0xff]   ;;  %v1998_v40 = vsel %vm1852_vm0, %v5781_v32, 4286644096  ;;  %4371 = vmatpush1.bf16.msra.mxu0 %v5907_v35  ;;  %v2484_v35 = vadd.s32 4294967232, %v6869_v10 }
  0xe7   :  { %v2192_v42 = vmax.bf16 %v5776_v34, %v2190_v37  ;;  %v2000_v45 = vmax.bf16 %v5779_v38, %v1998_v40  ;;  %4372 = vmatprep.subr.bf16.mxu0 %v5908_v41  ;;  %v2317_v34 = vunpack.c.l.b16 %v6798_v39  ;;  %v2491_v37 = vadd.s32 4294967224, %v6869_v10 }
  0xe8   :  { %v2006_v38 = vmax.bf16 %v5794_v20, %v2004_v24  ;;  %v2318_v40 = vunpack.c.h.b16 %v6798_v39  ;;  %v6917_v41 = vsub.s32 %v2449_v21, %v6881_v17 }
  0xe9   :  { %v6952_v0 = vsub.s32 %v2491_v37, %v6881_v17 }
  0xea   :  { %4373 = vmatpush1.bf16.msra.mxu0 %v5910_v43  ;;  %8917 = vst [vmem:[#allocation14_spill] sm:$0xff] %v6917_v41  ;;  %v6922_v43 = vsub.s32 %v2456_v23, %v6881_v17 }
  0xeb   :  { %4374 = vmatprep.subr.bf16.mxu0 %v5911_v49  ;;  %v6928_v49 = vpop.xlane.xlu0 %1863  ;;  %8920 = vst [vmem:[#allocation17_spill] sm:$0xff] %v6952_v0 }
  0xec   :  { %8918 = vst [vmem:[#allocation15_spill] sm:$0xff] %v6922_v43 }
  0xed   :  { %1050 = vmax.xlane.bf16.xlu1 %v1049_v44  ;;  %v6807_v44 = vpop.xlane.xlu1 %2097 }
  0xee   :  { %858 = vmax.xlane.bf16.xlu0 %v857_v46  ;;  %v5784_v46 = vld [vmem:[%s8912_s19 + $0x194] ss:$8 sps:$4 sm:$0xff]   ;;  %4375 = vmatpush1.bf16.msra.mxu0 %v5919_v51  ;;  %v6937_v51 = vsub.s32 %v2477_v29, %v6881_v17  ;;  %v3246_v1 = vunpack.c.l.b16 %v6807_v44 }
  0xef   :  { %v915_v53 = vsel %vm762_vm1, %v5784_v46, 4286644096  ;;  %4376 = vmatprep.subr.bf16.mxu0 %v5920_v57  ;;  %v5802_v46 = vld [vmem:[%s8911_s28 + $0x394] ss:$8 sps:$4 sm:$0xff]   ;;  %v2382_v57 = vunpack.c.h.b16 %v6812_v47 }
  0xf1   :  { %v6826_v52 = vpop.xlane.xlu1 %822 }
  0xf2   :  { %4377 = vmatpush1.bf16.msra.mxu0 %v5922_v59  ;;  %v2543_v59 = vrot.slane %v2317_v34, %v6904_v31  ;;  %v2320_v7 = vunpack.c.h.b16 %v6826_v52  ;;  %v2434_v34 = vrot.slane %v2301_v9, %v6904_v31 }
  0xf3   :  { %4378 = vmatprep.subr.bf16.mxu0 %v5923_v2  ;;  %v3247_v2 = vunpack.c.h.b16 %v6807_v44 }
  0xf5   :  { %2139 = vmax.xlane.bf16.xlu1 %v2138_v56  ;;  %v861_v56 = vsel %vm762_vm1, %v5787_v48, 4286644096  ;;  %v6841_v60 = vpop.xlane.xlu1 %1014  ;;  %v3182_v48 = vunpack.c.l.b16 %v6792_v36 }
  0xf6   :  { %1947 = vmax.xlane.bf16.xlu0 %v1946_v58  ;;  %v917_v58 = vmax.bf16 %v5782_v50, %v915_v53  ;;  %v863_v61 = vmax.bf16 %v5785_v54, %v861_v56  ;;  %v6931_v50 = vsub.s32 %v2463_v27, %v6881_v17  ;;  %v5805_v53 = vld [vmem:[%s8911_s28 + $0x304] ss:$8 sps:$4 sm:$0xff]   ;;  %v3183_v54 = vunpack.c.h.b16 %v6792_v36  ;;  %v5800_v36 = vld [vmem:[%s8911_s28 + $0x390] ss:$8 sps:$4 sm:$0xff]  }
  0xf7   :  { %v2381_v56 = vunpack.c.l.b16 %v6812_v47  ;;  %v2142_v14 = vsel %vm1852_vm0, %v5805_v53, 4286644096  ;;  %v3376_v44 = vrot.slane %v3182_v48, %v6904_v31  ;;  %v2366_v48 = vunpack.c.h.b16 %v6846_v63 }
  0xf8   :  { %8919 = vst [vmem:[#allocation16_spill] sm:$0xff] %v6931_v50 }
  0xf9   :  { %v6860_v5 = vpop.xlane.xlu1 %1911 }
  0xfa   :  { %v3184_v37 = vunpack.c.l.b16 %v6860_v5 }
  0xfd   :  { %1002 = vmax.xlane.bf16.xlu1 %v1001_v4  ;;  %v5931_v4 = vld [vmem:[%s8861_s2 + $0xf0] ss:$8 sps:$4 sm:$0xff]   ;;  %v6871_v12 = vpop.xlane.xlu1 %2103 }
  0xfe   :  { %810 = vmax.xlane.bf16.xlu0 %v809_v6  ;;  %v1107_v6 = vsel %vm762_vm1, %v5790_v62, 4286644096  ;;  %4379 = vmatpush1.bf16.msra.mxu0 %v5931_v4  ;;  %v6949_v62 = vsub.s32 %v2484_v35, %v6881_v17  ;;  %v2196_v4 = vsel %vm1852_vm0, %v5802_v46, 4286644096  ;;  %v2365_v46 = vunpack.c.l.b16 %v6846_v63 }
  0xff   :  { %v1109_v11 = vmax.bf16 %v5788_v3, %v1107_v6  ;;  %v5803_v6 = vld [vmem:[%s8911_s28 + $0x300] ss:$8 sps:$4 sm:$0xff]   ;;  %v2198_v23 = vmax.bf16 %v5800_v36, %v2196_v4  ;;  %v3166_v63 = vunpack.c.l.b16 %v6866_v8  ;;  %v3167_v36 = vunpack.c.h.b16 %v6866_v8 }
 0x100   :  { %v2144_v29 = vmax.bf16 %v5803_v6, %v2142_v14  ;;  %v2780_v9 = vrot.slane %v2365_v46, %v6904_v31  ;;  %v2498_v14 = vadd.s32 4294967216, %v6869_v10 }
 0x101   :  { %v6889_v22 = vpop.xlane.xlu1 %966 }
 0x105   :  { %2091 = vmax.xlane.bf16.xlu1 %v2090_v16  ;;  %v5799_v16 = vld [vmem:[%s8911_s28 + $0x104] ss:$8 sps:$4 sm:$0xff]  }
 0x106   :  { %1899 = vmax.xlane.bf16.xlu0 %v1898_v18  ;;  %v2435_v18 = vadd.s32 4294967288, %v6869_v10 }
 0x108   :  { %v6907_v32 = vsub.s32 %v2435_v18, %v6881_v17 }
 0x10a   :  { %8915 = vst [vmem:[#allocation12_spill] sm:$0xff] %v6907_v32  ;;  %v2547_v47 = vrot.slane %v2318_v40, %v6907_v32  ;;  %v2863_v18 = vrot.slane %v2382_v57, %v6907_v32  ;;  %v3380_v20 = vrot.slane %v3183_v54, %v6907_v32  ;;  %v3696_v27 = vrot.slane %v3247_v2, %v6907_v32  ;;  %v5806_v57 = vld [vmem:[%s8912_s19 + $0x310] ss:$8 sps:$4 sm:$0xff]  }
 0x10b   :  { %v2784_v8 = vrot.slane %v2366_v48, %v6907_v32  ;;  %v2303_v48 = vunpack.c.l.b16 %v6896_v26 }
 0x10c   :  { %v2548_v24 = vsel %vm2440_vm2, %v2547_v47, %v2543_v59  ;;  %v3381_v53 = vsel %vm2440_vm2, %v3380_v20, %v3376_v44  ;;  %v5809_v59 = vld [vmem:[%s8912_s19 + $0x110] ss:$8 sps:$4 sm:$0xff]   ;;  %v5814_v44 = vld [vmem:[%s8911_s28 + $0x314] ss:$8 sps:$4 sm:$0xff]   ;;  %v2505_v20 = vadd.s32 4294967208, %v6869_v10 }
 0x10d   :  { %1104 = vmax.xlane.bf16.xlu1 %v1103_v28  ;;  %v2470_v28 = vadd.s32 4294967248, %v6869_v10  ;;  %v2148_v46 = vsel %vm1852_vm0, %v5814_v44, 4286644096  ;;  %v2304_v44 = vunpack.c.h.b16 %v6896_v26  ;;  %v2446_v26 = vrot.slane %v2303_v48, %v6910_v33 }
 0x10e   :  { %912 = vmax.xlane.bf16.xlu0 %v911_v30  ;;  %v1950_v30 = vsel %vm1852_vm0, %v5799_v16, 4286644096  ;;  %v2859_v16 = vrot.slane %v2381_v56, %v6904_v31 }
 0x10f   :  { %v6934_v39 = vsub.s32 %v2470_v28, %v6881_v17  ;;  %v2453_v48 = vrot.slane %v2304_v44, %v6917_v41 }
 0x110   :  { %v2864_v40 = vsel %vm2440_vm2, %v2863_v18, %v2859_v16 }
 0x115   :  { %2193 = vmax.xlane.bf16.xlu1 %v2192_v42  ;;  %v6919_v42 = vpop.xlane.xlu1 %2055 }
 0x116   :  { %2001 = vmax.xlane.bf16.xlu0 %v2000_v45  ;;  %v1952_v45 = vmax.bf16 %v5797_v25, %v1950_v30  ;;  %v3692_v25 = vrot.slane %v3246_v1, %v6904_v31  ;;  %v2557_v30 = vrot.slane %v2320_v7, %v6917_v41  ;;  %v3385_v7 = vrot.slane %v3184_v37, %v6910_v33 }
 0x117   :  { %v2785_v37 = vsel %vm2440_vm2, %v2784_v8, %v2780_v9 }
 0x118   :  { %v3697_v2 = vsel %vm2440_vm2, %v3696_v27, %v3692_v25  ;;  %v3386_v27 = vsel %vm2447_vm3, %v3385_v7, %v3381_v53  ;;  %v7067_v53 = vsub.s32 %v2505_v20, %v6881_v17 }
 0x119   :  { %v6960_v3 = vpop.xlane.xlu1 %1020 }
 0x11a   :  { %8922 = vst [vmem:[#allocation19_spill] sm:$0xff] %v7067_v53  ;;  %v2386_v44 = vunpack.c.h.b16 %v6960_v3 }
 0x11d   :  { %918 = vmax.xlane.bf16.xlu1 %v917_v58  ;;  %v2319_v58 = vunpack.c.l.b16 %v6826_v52  ;;  %v2384_v52 = vunpack.c.h.b16 %v6841_v60  ;;  %v6985_v28 = vpop.xlane.xlu1 %2109 }
 0x11e   :  { %864 = vmax.xlane.bf16.xlu0 %v863_v61  ;;  %v2383_v61 = vunpack.c.l.b16 %v6841_v60  ;;  %v5811_v60 = vld [vmem:[%s8912_s19 + $0x114] ss:$8 sps:$4 sm:$0xff]  }
 0x11f   :  { %v2552_v19 = vrot.slane %v2319_v58, %v6910_v33  ;;  %v2873_v56 = vrot.slane %v2384_v52, %v6917_v41  ;;  %v867_v1 = vsel %vm762_vm1, %v5811_v60, 4286644096  ;;  %v5817_v52 = vld [vmem:[%s8911_s28 + $0x114] ss:$8 sps:$4 sm:$0xff]   ;;  %v3230_v60 = vunpack.c.l.b16 %v6876_v15 }
 0x120   :  { %v2868_v21 = vrot.slane %v2383_v61, %v6910_v33  ;;  %v3185_v61 = vunpack.c.h.b16 %v6860_v5 }
 0x121   :  { %v7013_v47 = vpop.xlane.xlu1 %972 }
 0x122   :  { %v2869_v54 = vsel %vm2447_vm3, %v2868_v21, %v2864_v40  ;;  %v3390_v21 = vrot.slane %v3185_v61, %v6917_v41 }
 0x123   :  { %v7034_v16 = vsel %vm2454_vm4, %v2873_v56, %v2869_v54  ;;  %v1956_v54 = vsel %vm1852_vm0, %v5817_v52, 4286644096  ;;  %v5823_v56 = vld [vmem:[%s8912_s19 + $0x1a4] ss:$8 sps:$4 sm:$0xff]   ;;  %v7108_v52 = vld [vmem:[%s8912_s19 + $0x1a0] ss:$8 sps:$4 sm:$0xff]  }
 0x125   :  { %1110 = vmax.xlane.bf16.xlu1 %v1109_v11  ;;  %v2302_v11 = vunpack.c.h.b16 %v6832_v55  ;;  %v5808_v55 = vld [vmem:[%s8912_s19 + $0x314] ss:$8 sps:$4 sm:$0xff]   ;;  %v7044_v25 = vpop.xlane.xlu1 %2061 }
 0x126   :  { %1056 = vmax.xlane.bf16.xlu0 %v1055_v13  ;;  %v6969_v13 = vpop.xlane.xlu0 %828  ;;  %v1059_v58 = vsel %vm762_vm1, %v5808_v55, 4286644096  ;;  %v3301_v55 = vrot.slane %v3167_v36, %v6907_v32 }
 0x127   :  { %v2439_v35 = vrot.slane %v2302_v11, %v6907_v32  ;;  %v3248_v11 = vunpack.c.l.b16 %v6871_v12  ;;  %v1061_v18 = vmax.bf16 %v5806_v57, %v1059_v58  ;;  %v7074_v57 = vsel %vm2454_vm4, %v3390_v21, %v3386_v27 }
 0x128   :  { %v3233_v21 = vunpack.c.h.b16 %v6919_v42 }
 0x129   :  { %v7021_v6 = vsel %vm2440_vm2, %v2439_v35, %v2434_v34  ;;  %v5812_v35 = vld [vmem:[%s8911_s28 + $0x310] ss:$8 sps:$4 sm:$0xff]   ;;  %v3701_v40 = vrot.slane %v3248_v11, %v6910_v33  ;;  %v7081_v61 = vpop.xlane.xlu1 %1026  ;;  %v5826_v11 = vld [vmem:[%s8911_s28 + $0x3a4] ss:$8 sps:$4 sm:$0xff]  }
 0x12a   :  { %v2150_v8 = vmax.bf16 %v5812_v35, %v2148_v46 }
 0x12d   :  { %2007 = vmax.xlane.bf16.xlu1 %v2006_v38  ;;  %v6994_v38 = vpop.xlane.xlu0 %1917 }
 0x12e   :  { %1953 = vmax.xlane.bf16.xlu0 %v1952_v45  ;;  %v2553_v45 = vsel %vm2447_vm3, %v2552_v19, %v2548_v24  ;;  %v869_v19 = vmax.bf16 %v5809_v59, %v867_v1  ;;  %v2367_v24 = vunpack.c.l.b16 %v6889_v22  ;;  %v3232_v59 = vunpack.c.l.b16 %v6919_v42  ;;  %v7127_v42 = vld [vmem:[%s8911_s28 + $0x3a0] ss:$8 sps:$4 sm:$0xff]  }
 0x12f   :  { %v7018_v4 = vsel %vm2454_vm4, %v2557_v30, %v2553_v45  ;;  %v3231_v30 = vunpack.c.h.b16 %v6876_v15  ;;  %v7058_v45 = vsub.s32 %v2498_v14, %v6881_v17  ;;  %v2368_v15 = vunpack.c.h.b16 %v6889_v22 }
 0x130   :  { %v2789_v22 = vrot.slane %v2367_v24, %v6910_v33  ;;  %v3613_v1 = vrot.slane %v3230_v60, %v6904_v31  ;;  %v3702_v14 = vsel %vm2447_vm3, %v3701_v40, %v3697_v2  ;;  %v3622_v27 = vrot.slane %v3232_v59, %v6910_v33  ;;  %v7122_v60 = vpop.xlane.xlu1 %2115  ;;  %v7154_v59 = vld [vmem:[%s8911_s28 + $0x1a0] ss:$8 sps:$4 sm:$0xff]  }
 0x131   :  { %v7024_v5 = vpop.xlane.xlu0 %780  ;;  %8921 = vst [vmem:[#allocation18_spill] sm:$0xff] %v7058_v45  ;;  %v3617_v7 = vrot.slane %v3231_v30, %v6907_v32  ;;  %v2794_v2 = vrot.slane %v2368_v15, %v6917_v41  ;;  %v5835_v15 = vld [vmem:[%s8912_s19 + $0x124] ss:$8 sps:$4 sm:$0xff]   ;;  %v3234_v32 = vunpack.c.l.b16 %v7044_v25 }
 0x132   :  { %v2790_v24 = vsel %vm2447_vm3, %v2789_v22, %v2785_v37  ;;  %v2385_v37 = vunpack.c.l.b16 %v6960_v3  ;;  %v2321_v3 = vunpack.c.l.b16 %v6969_v13 }
 0x133   :  { %v3618_v40 = vsel %vm2440_vm2, %v3617_v7, %v3613_v1  ;;  %v3627_v1 = vrot.slane %v3233_v21, %v6917_v41 }
 0x135   :  { %2199 = vmax.xlane.bf16.xlu1 %v2198_v23  ;;  %v3297_v23 = vrot.slane %v3166_v63, %v6904_v31  ;;  %v7050_v34 = vpop.xlane.xlu0 %1869  ;;  %v5815_v63 = vld [vmem:[%s8911_s28 + $0x110] ss:$8 sps:$4 sm:$0xff]  }
 0x136   :  { %2145 = vmax.xlane.bf16.xlu0 %v2144_v29  ;;  %v3249_v29 = vunpack.c.h.b16 %v6871_v12  ;;  %v5820_v12 = vld [vmem:[%s8912_s19 + $0x3a4] ss:$8 sps:$4 sm:$0xff]   ;;  %v1958_v30 = vmax.bf16 %v5815_v63, %v1956_v54  ;;  %v7157_v63 = vsel %vm2454_vm4, %v2794_v2, %v2790_v24 }
 0x137   :  { %v7077_v58 = vsel %vm2440_vm2, %v3301_v55, %v3297_v23  ;;  %v7103_v20 = vsel %vm762_vm1, %v5820_v12, 4286644096  ;;  %v7114_v23 = vsel %vm762_vm1, %v5823_v56, 4286644096  ;;  %v5829_v55 = vld [vmem:[%s8911_s28 + $0x1a4] ss:$8 sps:$4 sm:$0xff]  }
 0x138   :  { %v3706_v36 = vrot.slane %v3249_v29, %v6917_v41  ;;  %v3169_v29 = vunpack.c.h.b16 %v6928_v49  ;;  %v5832_v12 = vld [vmem:[%s8912_s19 + $0x324] ss:$8 sps:$4 sm:$0xff]   ;;  %v923_v22 = vmax.bf16 %v7108_v52, %v7114_v23  ;;  %v7163_v7 = vsel %vm1852_vm0, %v5829_v55, 4286644096 }
 0x139   :  { %v7089_v9 = vpop.xlane.xlu0 %834  ;;  %v7187_v2 = vsel %vm762_vm1, %v5832_v12, 4286644096  ;;  %v3250_v55 = vunpack.c.l.b16 %v6985_v28  ;;  %v2883_v12 = vrot.slane %v2386_v44, %v6931_v50  ;;  %v2369_v44 = vunpack.c.l.b16 %v7013_v47 }
 0x13a   :  { %v7130_v35 = vsel %vm2454_vm4, %v3706_v36, %v3702_v14  ;;  %v2448_v36 = vsel %vm2447_vm3, %v2446_v26, %v7021_v6  ;;  %v3311_v14 = vrot.slane %v3169_v29, %v6917_v41  ;;  %v7175_v6 = vld [vmem:[%s8912_s19 + $0x320] ss:$8 sps:$4 sm:$0xff]   ;;  %v7190_v26 = vsel %vm762_vm1, %v5835_v15, 4286644096 }
 0x13b   :  { %v7193_v21 = vsel %vm2454_vm4, %v2453_v48, %v2448_v36  ;;  %v3186_v15 = vunpack.c.l.b16 %v6994_v38 }
 0x13d   :  { %1062 = vmax.xlane.bf16.xlu1 %v1061_v18  ;;  %v3168_v18 = vunpack.c.l.b16 %v6928_v49  ;;  %v7134_v46 = vpop.xlane.xlu0 %1923  ;;  %v7137_v49 = vsel %vm1852_vm0, %v5826_v11, 4286644096  ;;  %v3623_v11 = vsel %vm2447_vm3, %v3622_v27, %v3618_v40  ;;  %v5843_v27 = vld [vmem:[%s8911_s28 + $0x324] ss:$8 sps:$4 sm:$0xff]   ;;  %v2512_v40 = vadd.s32 4294967200, %v6869_v10 }
 0x13e   :  { %870 = vmax.xlane.bf16.xlu0 %v869_v19  ;;  %v7100_v19 = vld [vmem:[%s8912_s19 + $0x3a0] ss:$8 sps:$4 sm:$0xff]   ;;  %v7204_v29 = vsel %vm2454_vm4, %v3627_v1, %v3623_v11  ;;  %v2562_v11 = vrot.slane %v2321_v3, %v6922_v43 }
 0x13f   :  { %v3306_v54 = vrot.slane %v3168_v18, %v6910_v33  ;;  %v1115_v56 = vmax.bf16 %v7100_v19, %v7103_v20  ;;  %v7168_v18 = vpop.xlane.xlu1 %978  ;;  %v2878_v20 = vrot.slane %v2385_v37, %v6922_v43  ;;  %v2519_v37 = vadd.s32 4294967192, %v6869_v10  ;;  %v7232_v19 = vld [vmem:[%s8911_s28 + $0x320] ss:$8 sps:$4 sm:$0xff]  }
 0x140   :  { %v7247_v3 = vsub.s32 %v2512_v40, %v6881_v17  ;;  %v2370_v40 = vunpack.c.h.b16 %v7013_v47  ;;  %v2799_v33 = vrot.slane %v2369_v44, %v6922_v43  ;;  %v5867_v47 = vld [vmem:[%s8911_s28 + $0x3b4] ss:$8 sps:$4 sm:$0xff]  }
 0x141   :  { %v7184_v52 = vpop.xlane.xlu0 %786  ;;  %v3307_v23 = vsel %vm2447_vm3, %v3306_v54, %v7077_v58  ;;  %v5846_v58 = vld [vmem:[%s8911_s28 + $0x124] ss:$8 sps:$4 sm:$0xff]   ;;  %v2879_v1 = vsel %vm2461_vm5, %v2878_v20, %v7034_v16  ;;  %v3251_v54 = vunpack.c.h.b16 %v6985_v28  ;;  %v7243_v16 = vld [vmem:[%s8911_s28 + $0x120] ss:$8 sps:$4 sm:$0xff]   ;;  %v7250_v28 = vsub.s32 %v2519_v37, %v6881_v17  ;;  %v5870_v44 = vld [vmem:[%s8911_s28 + $0x1b4] ss:$8 sps:$4 sm:$0xff]  }
 0x142   :  { %v7221_v36 = vsel %vm2454_vm4, %v3311_v14, %v3307_v23  ;;  %v3187_v14 = vunpack.c.h.b16 %v6994_v38  ;;  %v7238_v23 = vsel %vm1852_vm0, %v5843_v27, 4286644096  ;;  %8923 = vst [vmem:[#allocation20_spill] sm:$0xff] %v7247_v3  ;;  %v5855_v38 = vld [vmem:[%s8912_s19 + $0x3b4] ss:$8 sps:$4 sm:$0xff]   ;;  %v2305_v37 = vunpack.c.l.b16 %v7024_v5 }
 0x143   :  { %v7214_v48 = vpop.xlane.xlu1 %2067  ;;  %8924 = vst [vmem:[#allocation21_spill] sm:$0xff] %v7250_v28  ;;  %v5858_v27 = vld [vmem:[%s8912_s19 + $0x1b4] ss:$8 sps:$4 sm:$0xff]   ;;  %v2804_v28 = vrot.slane %v2370_v40, %v6931_v50  ;;  %v3235_v3 = vunpack.c.h.b16 %v7044_v25  ;;  %v2800_v45 = vsel %vm2461_vm5, %v2799_v33, %v7157_v63  ;;  %v7328_v25 = vsel %vm1852_vm0, %v5867_v47, 4286644096 }
 0x144   :  { %v5879_v40 = vld [vmem:[%s8912_s19 + $0x334] ss:$8 sps:$4 sm:$0xff]  }
 0x145   :  { %2151 = vmax.xlane.bf16.xlu1 %v2150_v8  ;;  %v7180_v8 = vld [vmem:[%s8912_s19 + $0x120] ss:$8 sps:$4 sm:$0xff]   ;;  %v7227_v24 = vpop.xlane.xlu0 %1875 }
 0x146   :  { %1959 = vmax.xlane.bf16.xlu0 %v1958_v30  ;;  %v2322_v30 = vunpack.c.h.b16 %v6969_v13  ;;  %v3711_v13 = vrot.slane %v3250_v55, %v6922_v43  ;;  %v7253_v55 = vsel %vm1852_vm0, %v5846_v58, 4286644096  ;;  %v2563_v58 = vsel %vm2461_vm5, %v2562_v11, %v7018_v4  ;;  %v7289_v11 = vld [vmem:[%s8912_s19 + $0x3b0] ss:$8 sps:$4 sm:$0xff]  }
 0x147   :  { %v7267_v41 = vpop.xlane.xlu1 %1032  ;;  %v3400_v4 = vrot.slane %v3187_v14, %v6931_v50  ;;  %v7305_v14 = vsel %vm762_vm1, %v5858_v27, 4286644096  ;;  %v3632_v27 = vrot.slane %v3234_v32, %v6922_v43  ;;  %v3171_v32 = vunpack.c.h.b16 %v7050_v34 }
 0x148   :  { %v2567_v20 = vrot.slane %v2322_v30, %v6931_v50  ;;  %v7262_v30 = vsel %vm2468_vm6, %v2883_v12, %v2879_v1  ;;  %v2306_v12 = vunpack.c.h.b16 %v7024_v5  ;;  %v2460_v5 = vrot.slane %v2305_v37, %v6922_v43  ;;  %v5882_v37 = vld [vmem:[%s8912_s19 + $0x134] ss:$8 sps:$4 sm:$0xff]  }
 0x149   :  { %v7273_v31 = vpop.xlane.xlu0 %840 }
 0x14a   :  { %v2467_v47 = vrot.slane %v2306_v12, %v6931_v50  ;;  %v2462_v63 = vsel %vm2461_vm5, %v2460_v5, %v7193_v21  ;;  %v2387_v12 = vunpack.c.l.b16 %v7081_v61  ;;  %v7394_v5 = vsel %vm762_vm1, %v5879_v40, 4286644096 }
 0x14b   :  { %v7312_v53 = vpop.xlane.xlu1 %2121  ;;  %8928 = vst [vmem:[#allocation23_spill] sm:$0xff] %v7394_v5  ;;  %v2526_v21 = vadd.s32 4294967184, %v6869_v10  ;;  %v3189_v5 = vunpack.c.h.b16 %v7134_v46 }
 0x14c   :  { %v2888_v40 = vrot.slane %v2387_v12, %v6934_v39 }
 0x14d   :  { %1116 = vmax.xlane.bf16.xlu1 %v1115_v56  ;;  %v3395_v56 = vrot.slane %v3186_v15, %v6922_v43  ;;  %v3712_v15 = vsel %vm2461_vm5, %v3711_v13, %v7130_v35  ;;  %v3170_v35 = vunpack.c.l.b16 %v7050_v34  ;;  %v7302_v13 = vld [vmem:[%s8912_s19 + $0x1b0] ss:$8 sps:$4 sm:$0xff]   ;;  %v7320_v0 = vpop.xlane.xlu0 %1929 }
 0x14e   :  { %924 = vmax.xlane.bf16.xlu0 %v923_v22  ;;  %v3716_v22 = vrot.slane %v3251_v54, %v6931_v50  ;;  %v7297_v54 = vsel %vm762_vm1, %v5855_v38, 4286644096  ;;  %v7315_v38 = vsel %vm2468_vm6, %v2567_v20, %v2563_v58  ;;  %v7333_v20 = vld [vmem:[%s8911_s28 + $0x1b0] ss:$8 sps:$4 sm:$0xff]  }
 0x14f   :  { %v3396_v1 = vsel %vm2461_vm5, %v3395_v56, %v7074_v57  ;;  %v7325_v57 = vld [vmem:[%s8911_s28 + $0x3b0] ss:$8 sps:$4 sm:$0xff]   ;;  %v7342_v56 = vsel %vm1852_vm0, %v5870_v44, 4286644096  ;;  %v3316_v34 = vrot.slane %v3170_v35, %v6922_v43  ;;  %v7361_v44 = vsel %vm2468_vm6, %v2804_v28, %v2800_v45 }
 0x150   :  { %v7336_v33 = vsel %vm2468_vm6, %v3716_v22, %v3712_v15  ;;  %8925 = vst [vmem:[#allocation22_spill] sm:$0xff] %v7342_v56  ;;  %v7351_v58 = vsel %vm2468_vm6, %v3400_v4, %v3396_v1  ;;  %v8926_v15 = vmax.bf16 %v7127_v42, %v7137_v49  ;;  %v3637_v4 = vrot.slane %v3235_v3, %v6931_v50  ;;  %v7367_v1 = vpop.xlane.xlu1 %984  ;;  %v7384_v35 = vld [vmem:[%s8912_s19 + $0x330] ss:$8 sps:$4 sm:$0xff]  }
 0x151   :  { %v8927_v42 = vmax.bf16 %v7154_v59, %v7163_v7  ;;  %v3633_v49 = vsel %vm2461_vm5, %v3632_v27, %v7204_v29  ;;  %v2323_v45 = vunpack.c.l.b16 %v7089_v9  ;;  %v7375_v28 = vpop.xlane.xlu0 %792  ;;  %v7389_v59 = vld [vmem:[%s8912_s19 + $0x130] ss:$8 sps:$4 sm:$0xff]   ;;  %v3321_v7 = vrot.slane %v3171_v32, %v6931_v50 }
 0x152   :  { %v3252_v29 = vunpack.c.l.b16 %v7122_v60  ;;  %v7397_v27 = vsel %vm762_vm1, %v5882_v37, 4286644096  ;;  %v2324_v3 = vunpack.c.h.b16 %v7089_v9  ;;  %v7405_v22 = vsel %vm2468_vm6, %v2467_v47, %v2462_v63  ;;  %v5894_v9 = vld [vmem:[%s8911_s28 + $0x134] ss:$8 sps:$4 sm:$0xff]  }
 0x153   :  { %v7408_v32 = vsel %vm2468_vm6, %v3637_v4, %v3633_v49  ;;  %v3188_v37 = vunpack.c.l.b16 %v7134_v46  ;;  %v3253_v63 = vunpack.c.h.b16 %v7122_v60  ;;  %v2371_v43 = vunpack.c.l.b16 %v7168_v18  ;;  %v5903_v60 = vld [vmem:[%s8912_s19 + $0x3c4] ss:$8 sps:$4 sm:$0xff]  }
 0x154   :  { %v7412_v50 = vpop.xlane.xlu1 %2073  ;;  %v3721_v49 = vrot.slane %v3252_v29, %v6934_v39  ;;  %v2533_v56 = vadd.s32 4294967176, %v6869_v10  ;;  %v7444_v29 = vsub.s32 %v2526_v21, %v6881_v17  ;;  %v7449_v10 = vld [vmem:[%s8911_s28 + $0x330] ss:$8 sps:$4 sm:$0xff]   ;;  %v3410_v4 = vrot.slane %v3189_v5, %v6937_v51  ;;  %v5918_v5 = vld [vmem:[%s8911_s28 + $0x1c4] ss:$8 sps:$4 sm:$0xff]  }
 0x155   :  { %2205 = vmax.xlane.bf16.xlu1 %v8926_v15  ;;  %v3317_v15 = vsel %vm2461_vm5, %v3316_v34, %v7221_v36  ;;  %v2572_v36 = vrot.slane %v2323_v45, %v6934_v39  ;;  %v7422_v47 = vpop.xlane.xlu0 %1881  ;;  %v2577_v34 = vrot.slane %v2324_v3, %v6937_v51  ;;  %v2889_v3 = vsel %vm8908_vm7, %v2888_v40, %v7262_v30  ;;  %v7468_v21 = vld [vmem:[%s8911_s28 + $0x130] ss:$8 sps:$4 sm:$0xff]  }
 0x156   :  { %2013 = vmax.xlane.bf16.xlu0 %v8927_v42  ;;  %v2388_v42 = vunpack.c.h.b16 %v7081_v61  ;;  %v5891_v61 = vld [vmem:[%s8911_s28 + $0x334] ss:$8 sps:$4 sm:$0xff]   ;;  %v7429_v12 = vsel %vm2468_vm6, %v3321_v7, %v3317_v15  ;;  %v8929_v7 = vmax.bf16 %v7175_v6, %v7187_v2  ;;  %v5906_v15 = vld [vmem:[%s8912_s19 + $0x1c4] ss:$8 sps:$4 sm:$0xff]   ;;  %v3405_v46 = vrot.slane %v3188_v37, %v6934_v39 }
 0x157   :  { %v8930_v6 = vmax.bf16 %v7180_v8, %v7190_v26  ;;  %v7463_v2 = vsel %vm1852_vm0, %v5891_v61, 4286644096  ;;  %v2573_v30 = vsel %vm8908_vm7, %v2572_v36, %v7315_v38  ;;  %v3726_v40 = vrot.slane %v3253_v63, %v6937_v51  ;;  %v7483_v61 = vld [vmem:[%s8912_s19 + $0x3c0] ss:$8 sps:$4 sm:$0xff]  }
 0x158   :  { %v2893_v45 = vrot.slane %v2388_v42, %v6937_v51  ;;  %v7457_v42 = vpop.xlane.xlu1 %1038  ;;  %v2372_v37 = vunpack.c.h.b16 %v7168_v18  ;;  %v2307_v8 = vunpack.c.l.b16 %v7184_v52  ;;  %8932 = vst [vmem:[#allocation25_spill] sm:$0xff] %v7483_v61  ;;  %v7489_v38 = vsub.s32 %v2533_v56, %v6881_v17  ;;  %v7497_v18 = vld [vmem:[%s8912_s19 + $0x1c0] ss:$8 sps:$4 sm:$0xff]  }
 0x159   :  { %v7478_v26 = vpop.xlane.xlu0 %846  ;;  %v7492_v36 = vsel %vm762_vm1, %v5903_v60, 4286644096  ;;  %8934 = vst [vmem:[#allocation27_spill] sm:$0xff] %v7497_v18  ;;  %v2578_v56 = vsel %vm8907_vm8, %v2577_v34, %v2573_v30  ;;  %v3172_v17 = vunpack.c.l.b16 %v7227_v24  ;;  %v3237_v18 = vunpack.c.h.b16 %v7214_v48 }
 0x15a   :  { %8933 = vst [vmem:[#allocation26_spill] sm:$0xff] %v7492_v36  ;;  %v7500_v63 = vsel %vm8907_vm8, %v2893_v45, %v2889_v3  ;;  %v3236_v45 = vunpack.c.l.b16 %v7214_v48  ;;  %v2390_v36 = vunpack.c.h.b16 %v7267_v41  ;;  %v3191_v48 = vunpack.c.h.b16 %v7320_v0 }
 0x15c   :  { %v7510_v60 = vpop.xlane.xlu1 %2127 }
 0x15d   :  { %1068 = vmax.xlane.bf16.xlu1 %v8929_v7  ;;  %v7471_v7 = vsel %vm1852_vm0, %v5894_v9, 4286644096  ;;  %v3722_v9 = vsel %vm8908_vm7, %v3721_v49, %v7336_v33  ;;  %v2308_v33 = vunpack.c.h.b16 %v7184_v52  ;;  %v3406_v49 = vsel %vm8908_vm7, %v3405_v46, %v7351_v58  ;;  %v5915_v52 = vld [vmem:[%s8911_s28 + $0x3c4] ss:$8 sps:$4 sm:$0xff]   ;;  %v7525_v3 = vpop.xlane.xlu0 %1935 }
 0x15e   :  { %876 = vmax.xlane.bf16.xlu0 %v8930_v6  ;;  %8931 = vst [vmem:[#allocation24_spill] sm:$0xff] %v7471_v7  ;;  %v2809_v6 = vrot.slane %v2371_v43, %v6934_v39  ;;  %v7505_v43 = vsel %vm762_vm1, %v5906_v15, 4286644096  ;;  %v3727_v34 = vsel %vm8907_vm8, %v3726_v40, %v3722_v9  ;;  %v2814_v58 = vrot.slane %v2372_v37, %v6937_v51 }
 0x15f   :  { %8935 = vst [vmem:[#allocation28_spill] sm:$0xff] %v7505_v43  ;;  %v2474_v15 = vrot.slane %v2307_v8, %v6934_v39  ;;  %v3411_v40 = vsel %vm8907_vm8, %v3410_v4, %v3406_v49  ;;  %v2481_v37 = vrot.slane %v2308_v33, %v6937_v51  ;;  %v2389_v8 = vunpack.c.l.b16 %v7267_v41 }
 0x160   :  { %v2810_v30 = vsel %vm8908_vm7, %v2809_v6, %v7361_v44  ;;  %v2325_v9 = vunpack.c.l.b16 %v7273_v31  ;;  %v8936_v46 = vmax.bf16 %v7232_v19, %v7238_v23  ;;  %v7545_v44 = vld [vmem:[%s8911_s28 + $0x3c0] ss:$8 sps:$4 sm:$0xff]   ;;  %v3254_v6 = vunpack.c.l.b16 %v7312_v53  ;;  %v7549_v49 = vpop.xlane.xlu1 %990 }
 0x161   :  { %v3190_v4 = vunpack.c.l.b16 %v7320_v0  ;;  %v8937_v33 = vmax.bf16 %v7243_v16, %v7253_v55  ;;  %v7555_v7 = vsel %vm1852_vm0, %v5915_v52, 4286644096  ;;  %v7560_v19 = vld [vmem:[%s8911_s28 + $0x1c0] ss:$8 sps:$4 sm:$0xff]   ;;  %v7563_v23 = vsel %vm1852_vm0, %v5918_v5, 4286644096  ;;  %v7570_v55 = vpop.xlane.xlu0 %798 }
 0x162   :  { %v2476_v43 = vsel %vm8908_vm7, %v2474_v15, %v7405_v22  ;;  %v3173_v16 = vunpack.c.h.b16 %v7227_v24  ;;  %v3642_v52 = vrot.slane %v3236_v45, %v6934_v39  ;;  %v2326_v5 = vunpack.c.h.b16 %v7273_v31 }
 0x163   :  { %v2898_v61 = vrot.slane %v2389_v8, %v6949_v62  ;;  %v3255_v22 = vunpack.c.h.b16 %v7312_v53  ;;  %v3731_v24 = vrot.slane %v3254_v6, %v6949_v62  ;;  %v3415_v15 = vrot.slane %v3190_v4, %v6949_v62  ;;  %v8938_v4 = vld [vmem:[#allocation17_spill] sm:$0xff] }
 0x164   :  { %v2483_v41 = vsel %vm8907_vm8, %v2481_v37, %v2476_v43  ;;  %v3647_v45 = vrot.slane %v3237_v18, %v6937_v51  ;;  %v3331_v53 = vrot.slane %v3173_v16, %v6937_v51  ;;  %v2373_v0 = vunpack.c.l.b16 %v7367_v1 }
 0x165   :  { %2157 = vmax.xlane.bf16.xlu1 %v8936_v46  ;;  %v2815_v46 = vsel %vm8907_vm8, %v2814_v58, %v2810_v30  ;;  %v2582_v58 = vrot.slane %v2325_v9, %v6949_v62  ;;  %v7582_v30 = vpop.xlane.xlu1 %2079  ;;  %v7592_v8 = vpop.xlane.xlu0 %1887  ;;  %v3643_v9 = vsel %vm8908_vm7, %v3642_v52, %v7408_v32  ;;  %v2587_v31 = vrot.slane %v2326_v5, %v8938_v4 }
 0x166   :  { %1965 = vmax.xlane.bf16.xlu0 %v8937_v33  ;;  %v3326_v33 = vrot.slane %v3172_v17, %v6934_v39  ;;  %v2903_v17 = vrot.slane %v2390_v36, %v8938_v4  ;;  %v2899_v43 = vsel %vm8906_vm9, %v2898_v61, %v7500_v63  ;;  %v3736_v37 = vrot.slane %v3255_v22, %v8938_v4 }
 0x167   :  { %v2583_v18 = vsel %vm8906_vm9, %v2582_v58, %v2578_v56  ;;  %v3420_v16 = vrot.slane %v3191_v48, %v8938_v4  ;;  %v8939_v32 = vmax.bf16 %v7289_v11, %v7297_v54  ;;  %v3416_v36 = vsel %vm8906_vm9, %v3415_v15, %v3411_v40 }
 0x168   :  { %v3327_v6 = vsel %vm8908_vm7, %v3326_v33, %v7429_v12  ;;  %v3732_v12 = vsel %vm8906_vm9, %v3731_v24, %v3727_v34  ;;  %v2374_v52 = vunpack.c.h.b16 %v7367_v1  ;;  %v2309_v33 = vunpack.c.l.b16 %v7375_v28 }
 0x169   :  { %v7612_v61 = vpop.xlane.xlu1 %1044  ;;  %v8940_v63 = vmax.bf16 %v7302_v13, %v7305_v14  ;;  %v3648_v56 = vsel %vm8907_vm8, %v3647_v45, %v3643_v9  ;;  %v3332_v5 = vsel %vm8907_vm8, %v3331_v53, %v3327_v6  ;;  %v2819_v11 = vrot.slane %v2373_v0, %v6949_v62  ;;  %v7621_v34 = vpop.xlane.xlu0 %852 }
 0x16a   :  { %v3238_v54 = vunpack.c.l.b16 %v7412_v50  ;;  %v2904_v1 = vsel %vm8905_vm10, %v2903_v17, %v2899_v43  ;;  %v2588_v40 = vsel %vm8905_vm10, %v2587_v31, %v2583_v18  ;;  %v3174_v58 = vunpack.c.l.b16 %v7422_v47 }
 0x16b   :  { %v2391_v22 = vunpack.c.l.b16 %v7457_v42  ;;  %v3737_v13 = vsel %vm8905_vm10, %v3736_v37, %v3732_v12  ;;  %v3421_v14 = vsel %vm8905_vm10, %v3420_v16, %v3416_v36  ;;  %v2310_v48 = vunpack.c.h.b16 %v7375_v28  ;;  %v8941_v16 = vld [vmem:[#allocation18_spill] sm:$0xff] }
 0x16c   :  { %v2327_v24 = vunpack.c.l.b16 %v7478_v26  ;;  %v2824_v15 = vrot.slane %v2374_v52, %v8938_v4  ;;  %v2488_v45 = vrot.slane %v2309_v33, %v6949_v62  ;;  %v3239_v17 = vunpack.c.h.b16 %v7412_v50 }
 0x16d   :  { %1122 = vmax.xlane.bf16.xlu1 %v8939_v32  ;;  %v3256_v31 = vunpack.c.l.b16 %v7510_v60  ;;  %v7635_v53 = vpop.xlane.xlu1 %2133  ;;  %v2820_v0 = vsel %vm8906_vm9, %v2819_v11, %v2815_v46  ;;  %v3652_v9 = vrot.slane %v3238_v54, %v6949_v62  ;;  %v3175_v6 = vunpack.c.h.b16 %v7422_v47  ;;  %v7641_v43 = vpop.xlane.xlu0 %1941  ;;  %v8943_v54 = vld [vmem:[#allocation22_spill] sm:$0xff] }
 0x16e   :  { %930 = vmax.xlane.bf16.xlu0 %v8940_v63  ;;  %v3192_v28 = vunpack.c.l.b16 %v7525_v3  ;;  %v3336_v18 = vrot.slane %v3174_v58, %v6949_v62  ;;  %v2392_v37 = vunpack.c.h.b16 %v7457_v42  ;;  %v2908_v50 = vrot.slane %v2391_v22, %v8941_v16 }
 0x16f   :  { %v2328_v32 = vunpack.c.h.b16 %v7478_v26  ;;  %v2495_v12 = vrot.slane %v2310_v48, %v8938_v4  ;;  %v2592_v46 = vrot.slane %v2327_v24, %v8941_v16  ;;  %v3257_v36 = vunpack.c.h.b16 %v7510_v60  ;;  %v8945_v24 = vld [vmem:[#allocation19_spill] sm:$0xff] }
 0x170   :  { %v3193_v47 = vunpack.c.h.b16 %v7525_v3  ;;  %v8942_v52 = vmax.bf16 %v7325_v57, %v7328_v25  ;;  %v2825_v33 = vsel %vm8905_vm10, %v2824_v15, %v2820_v0  ;;  %v2490_v42 = vsel %vm8906_vm9, %v2488_v45, %v2483_v41 }
 0x171   :  { %v3657_v63 = vrot.slane %v3239_v17, %v8938_v4  ;;  %v3741_v26 = vrot.slane %v3256_v31, %v8941_v16  ;;  %v7658_v11 = vpop.xlane.xlu1 %996  ;;  %v8944_v60 = vmax.bf16 %v7333_v20, %v8943_v54  ;;  %v3653_v3 = vsel %vm8906_vm9, %v3652_v9, %v3648_v56  ;;  %v7667_v41 = vpop.xlane.xlu0 %804 }
 0x172   :  { %v3341_v57 = vrot.slane %v3175_v6, %v8938_v4  ;;  %v3425_v25 = vrot.slane %v3192_v28, %v8941_v16  ;;  %v2375_v58 = vunpack.c.l.b16 %v7549_v49  ;;  %v3337_v22 = vsel %vm8906_vm9, %v3336_v18, %v3332_v5 }
 0x173   :  { %v2909_v48 = vsel %vm2503_vm11, %v2908_v50, %v2904_v1  ;;  %v2913_v15 = vrot.slane %v2392_v37, %v8945_v24  ;;  %v2597_v45 = vrot.slane %v2328_v32, %v8945_v24  ;;  %v2593_v20 = vsel %vm2503_vm11, %v2592_v46, %v2588_v40 }
 0x174   :  { %v3746_v56 = vrot.slane %v3257_v36, %v8945_v24  ;;  %v3430_v17 = vrot.slane %v3193_v47, %v8945_v24  ;;  %v2393_v31 = vunpack.c.l.b16 %v7612_v61  ;;  %v3742_v0 = vsel %vm2503_vm11, %v3741_v26, %v3737_v13  ;;  %v8946_v36 = vld [vmem:[#allocation20_spill] sm:$0xff] }
 0x175   :  { %2211 = vmax.xlane.bf16.xlu1 %v8942_v52  ;;  %v2376_v9 = vunpack.c.h.b16 %v7549_v49  ;;  %v2311_v5 = vunpack.c.l.b16 %v7570_v55  ;;  %v2329_v1 = vunpack.c.l.b16 %v7621_v34  ;;  %v2497_v28 = vsel %vm8905_vm10, %v2495_v12, %v2490_v42  ;;  %v8947_v52 = vld [vmem:[#allocation23_spill] sm:$0xff] }
 0x176   :  { %2019 = vmax.xlane.bf16.xlu0 %v8944_v60  ;;  %v7681_v6 = vpop.xlane.xlu1 %2085  ;;  %v3426_v40 = vsel %vm2503_vm11, %v3425_v25, %v3421_v14  ;;  %v2829_v18 = vrot.slane %v2375_v58, %v8941_v16  ;;  %v2312_v37 = vunpack.c.h.b16 %v7570_v55  ;;  %v7690_v49 = vsel %vm8905_vm10, %v3657_v63, %v3653_v3 }
 0x177   :  { %v7687_v50 = vpop.xlane.xlu0 %1893  ;;  %v7693_v13 = vsel %vm8905_vm10, %v3341_v57, %v3337_v22  ;;  %v2914_v32 = vsel %vm2510_vm12, %v2913_v15, %v2909_v48  ;;  %v2394_v46 = vunpack.c.h.b16 %v7612_v61  ;;  %v2598_v12 = vsel %vm2510_vm12, %v2597_v45, %v2593_v20  ;;  %v8950_v48 = vld [vmem:[#allocation21_spill] sm:$0xff] }
 0x178   :  { %v3747_v14 = vsel %vm2510_vm12, %v3746_v56, %v3742_v0  ;;  %v2918_v47 = vrot.slane %v2393_v31, %v8946_v36  ;;  %v2330_v55 = vunpack.c.h.b16 %v7621_v34  ;;  %v8948_v42 = vmax.bf16 %v7384_v35, %v8947_v52 }
 0x179   :  { %v3431_v63 = vsel %vm2510_vm12, %v3430_v17, %v3426_v40  ;;  %v2834_v26 = vrot.slane %v2376_v9, %v8945_v24  ;;  %v2502_v54 = vrot.slane %v2311_v5, %v8941_v16  ;;  %v2602_v61 = vrot.slane %v2329_v1, %v8946_v36 }
 0x17a   :  { %v8949_v60 = vmax.bf16 %v7389_v59, %v7397_v27  ;;  %vm2538_vm10 = vcmask 1048512   ;;  %v2830_v34 = vsel %vm2503_vm11, %v2829_v18, %v2825_v33  ;;  %v2509_v57 = vrot.slane %v2312_v37, %v8945_v24 }
 0x17b   :  { %v3258_v35 = vunpack.c.l.b16 %v7635_v53  ;;  %v3240_v22 = vunpack.c.l.b16 %v7582_v30  ;;  %v2923_v15 = vrot.slane %v2394_v46, %v8950_v48  ;;  %v3194_v45 = vunpack.c.l.b16 %v7641_v43 }
 0x17c   :  { %v2919_v59 = vsel %vm2517_vm13, %v2918_v47, %v2914_v32  ;;  %v2607_v27 = vrot.slane %v2330_v55, %v8950_v48  ;;  %vm3093_vm9 = vcmask 1041409   ;;  %v2603_v33 = vsel %vm2517_vm13, %v2602_v61, %v2598_v12 }
 0x17d   :  { %1074 = vmax.xlane.bf16.xlu1 %v8948_v42  ;;  %v3259_v31 = vunpack.c.h.b16 %v7635_v53  ;;  %v7724_v5 = vsel %vm2510_vm12, %v2834_v26, %v2830_v34  ;;  %v2504_v1 = vsel %vm2503_vm11, %v2502_v54, %v2497_v28  ;;  %v3751_v40 = vrot.slane %v3258_v35, %v8946_v36  ;;  %v8952_v26 = vld [vmem:[#allocation24_spill] sm:$0xff] }
 0x17e   :  { %882 = vmax.xlane.bf16.xlu0 %v8949_v60  ;;  %v1051_v3 = vpop.xlane.xlu1 %1050  ;;  %v3195_v18 = vunpack.c.h.b16 %v7641_v43  ;;  %vm3926_vm8 = vcmask 1043459   ;;  %v3241_v37 = vunpack.c.h.b16 %v7582_v30  ;;  %v3176_v32 = vunpack.c.l.b16 %v7592_v8 }
 0x17f   :  { %v2395_v25 = vunpack.c.l.b16 %v1051_v3  ;;  %v859_v58 = vpop.xlane.xlu0 %858  ;;  %v2396_v56 = vunpack.c.h.b16 %v1051_v3  ;;  %v3177_v53 = vunpack.c.h.b16 %v7592_v8  ;;  %v3435_v46 = vrot.slane %v3194_v45, %v8946_v36 }
 0x180   :  { %v2331_v20 = vunpack.c.l.b16 %v859_v58  ;;  %v2332_v17 = vunpack.c.h.b16 %v859_v58  ;;  %v2924_v12 = vsel %vm2524_vm14, %v2923_v15, %v2919_v59  ;;  %v2608_v47 = vsel %vm2524_vm14, %v2607_v27, %v2603_v33 }
 0x181   :  { %v2928_v0 = vrot.slane %v2395_v25, %v7444_v29  ;;  %v2933_v55 = vrot.slane %v2396_v56, %v7489_v38  ;;  %v8951_v43 = vmax.bf16 %v7449_v10, %v7463_v2  ;;  %v3662_v30 = vrot.slane %v3240_v22, %v8941_v16 }
 0x182   :  { %v2612_v9 = vrot.slane %v2331_v20, %v7444_v29  ;;  %v2617_v28 = vrot.slane %v2332_v17, %v7489_v38  ;;  %v3756_v52 = vrot.slane %v3259_v31, %v8950_v48  ;;  %v8953_v54 = vmax.bf16 %v7468_v21, %v8952_v26 }
 0x183   :  { %v2929_v8 = vsel %vm2531_vm15, %v2928_v0, %v2924_v12  ;;  %vm3935_vm7 = vcmask 1040384   ;;  %v3752_v60 = vsel %vm2517_vm13, %v3751_v40, %v3747_v14  ;;  %v3440_v3 = vrot.slane %v3195_v18, %v8950_v48 }
 0x184   :  { %v2613_v42 = vsel %vm2531_vm15, %v2612_v9, %v2608_v47  ;;  %v3436_v35 = vsel %vm2517_vm13, %v3435_v46, %v3431_v63  ;;  %v2377_v25 = vunpack.c.l.b16 %v7658_v11  ;;  %v2934_v20 = vsel %vm2538_vm10, %v2933_v55, %v2929_v8  ;;  %v8955_v47 = vld [vmem:[#allocation26_spill] sm:$0xff]  ;;  %v8958_v8 = vld [vmem:[#allocation28_spill] sm:$0xff] }
 0x185   :  { %2163 = vmax.xlane.bf16.xlu1 %v8951_v43  ;;  %v2618_v45 = vsel %vm2538_vm10, %v2617_v28, %v2613_v42  ;;  %v3757_v14 = vsel %vm2524_vm14, %v3756_v52, %v3752_v60  ;;  %v2313_v59 = vunpack.c.l.b16 %v7667_v41  ;;  %v2511_v56 = vsel %vm2510_vm12, %v2509_v57, %v2504_v1  ;;  %v8954_v1 = vld [vmem:[#allocation25_spill] sm:$0xff]  ;;  %v8957_v52 = vld [vmem:[#allocation27_spill] sm:$0xff] }
 0x186   :  { %1971 = vmax.xlane.bf16.xlu0 %v8953_v54  ;;  %v2140_v61 = vpop.xlane.xlu1 %2139  ;;  %v3441_v17 = vsel %vm2524_vm14, %v3440_v3, %v3436_v35  ;;  %v2378_v33 = vunpack.c.h.b16 %v7658_v11  ;;  %v2314_v0 = vunpack.c.h.b16 %v7667_v41  ;;  %v3095_v40 = vsel %vm3093_vm9, %v2934_v20, %v2618_v45 }
 0x187   :  { %v3260_v10 = vunpack.c.l.b16 %v2140_v61  ;;  %v3261_v2 = vunpack.c.h.b16 %v2140_v61  ;;  %v1948_v34 = vpop.xlane.xlu0 %1947  ;;  %v3667_v46 = vrot.slane %v3241_v37, %v8945_v24  ;;  %v3346_v12 = vrot.slane %v3176_v32, %v8941_v16 }
 0x188   :  { %v3196_v58 = vunpack.c.l.b16 %v1948_v34  ;;  %v3197_v22 = vunpack.c.h.b16 %v1948_v34  ;;  %v2839_v57 = vrot.slane %v2377_v25, %v8946_v36  ;;  %v8956_v55 = vmax.bf16 %v8954_v1, %v8955_v47  ;;  %v5930_v34 = vld [vmem:[%s8912_s19 + $0x144] ss:$8 sps:$4 sm:$0xff]   ;;  %v5928_v1 = vld [vmem:[%s8912_s19 + $0x140] ss:$8 sps:$4 sm:$0xff]  }
 0x189   :  { %v3761_v15 = vrot.slane %v3260_v10, %v7444_v29  ;;  %v3766_v21 = vrot.slane %v3261_v2, %v7489_v38  ;;  %v3663_v41 = vsel %vm2503_vm11, %v3662_v30, %v7690_v49  ;;  %v3351_v28 = vrot.slane %v3177_v53, %v8945_v24  ;;  %v5927_v2 = vld [vmem:[%s8912_s19 + $0x344] ss:$8 sps:$4 sm:$0xff]  }
 0x18a   :  { %v3445_v27 = vrot.slane %v3196_v58, %v7444_v29  ;;  %v3450_v63 = vrot.slane %v3197_v22, %v7489_v38  ;;  %v2516_v43 = vrot.slane %v2313_v59, %v8946_v36  ;;  %v8959_v37 = vmax.bf16 %v8957_v52, %v8958_v8 }
 0x18b   :  { %v3762_v31 = vsel %vm2531_vm15, %v3761_v15, %v3757_v14  ;;  %v3242_v26 = vunpack.c.l.b16 %v7681_v6  ;;  %v3099_v60 = vpack.c.b16 %v3095_v40, %v3095_v40  ;;  %v2844_v10 = vrot.slane %v2378_v33, %v8950_v48 }
 0x18c   :  { %v3446_v9 = vsel %vm2531_vm15, %v3445_v27, %v3441_v17  ;;  %v3767_v18 = vsel %vm2538_vm10, %v3766_v21, %v3762_v31  ;;  %v2523_v49 = vrot.slane %v2314_v0, %v8950_v48  ;;  %v3178_v53 = vunpack.c.l.b16 %v7687_v50 }
 0x18d   :  { %1128 = vmax.xlane.bf16.xlu1 %v8956_v55  ;;  %v3451_v11 = vsel %vm2538_vm10, %v3450_v63, %v3446_v9  ;;  %v2840_v35 = vsel %vm2517_vm13, %v2839_v57, %v7724_v5  ;;  %v2518_v15 = vsel %vm2517_vm13, %v2516_v43, %v2511_v56  ;;  %v3243_v21 = vunpack.c.h.b16 %v7681_v6  ;;  %v5925_v6 = vld [vmem:[%s8912_s19 + $0x340] ss:$8 sps:$4 sm:$0xff]  }
 0x18e   :  { %936 = vmax.xlane.bf16.xlu0 %v8959_v37  ;;  %v1003_v32 = vpop.xlane.xlu1 %1002  ;;  %v3928_v42 = vsel %vm3926_vm8, %v3767_v18, %v3451_v11  ;;  %v3347_v14 = vsel %vm2503_vm11, %v3346_v12, %v7693_v13  ;;  %v3672_v59 = vrot.slane %v3242_v26, %v8946_v36  ;;  %v3179_v5 = vunpack.c.h.b16 %v7687_v50 }
 0x18f   :  { %v2379_v54 = vunpack.c.l.b16 %v1003_v32  ;;  %v811_v61 = vpop.xlane.xlu0 %810  ;;  %v3932_v3 = vpack.c.b16 %v3928_v42, %v3928_v42  ;;  %v2380_v25 = vunpack.c.h.b16 %v1003_v32  ;;  %v3668_v27 = vsel %vm2510_vm12, %v3667_v46, %v3663_v41 }
 0x190   :  { %v2315_v30 = vunpack.c.l.b16 %v811_v61  ;;  %v2316_v58 = vunpack.c.h.b16 %v811_v61  ;;  %v3356_v63 = vrot.slane %v3178_v53, %v8946_v36  ;;  %v1077_v56 = vsel %vm762_vm1, %v5927_v2, 4286644096  ;;  %v5934_v61 = vld [vmem:[%s8911_s28 + $0x344] ss:$8 sps:$4 sm:$0xff]  }
 0x191   :  { %v3942_v22 = vsel %vm3935_vm7, %v3099_v60, %v3932_v3  ;;  %v2849_v45 = vrot.slane %v2379_v54, %v7444_v29  ;;  %v885_v17 = vsel %vm762_vm1, %v5930_v34, 4286644096  ;;  %v2845_v33 = vsel %vm2524_vm14, %v2844_v10, %v2840_v35  ;;  %v5937_v10 = vld [vmem:[%s8911_s28 + $0x144] ss:$8 sps:$4 sm:$0xff]   ;;  %v5932_v34 = vld [vmem:[%s8911_s28 + $0x340] ss:$8 sps:$4 sm:$0xff]  }
 0x192   :  { %v2530_v20 = vrot.slane %v2315_v30, %v7444_v29  ;;  %4380 = vmatprep.mubr.bf16.mxu0 %v3942_v22  ;;  %v2525_v13 = vsel %vm2524_vm14, %v2523_v49, %v2518_v15  ;;  %v2854_v31 = vrot.slane %v2380_v25, %v7489_v38  ;;  %v2537_v50 = vrot.slane %v2316_v58, %v7489_v38  ;;  %v5935_v58 = vld [vmem:[%s8911_s28 + $0x140] ss:$8 sps:$4 sm:$0xff]  }
 0x193   :  { %v8960_v0 = vmax.bf16 %v7545_v44, %v7555_v7  ;;  %v3352_v9 = vsel %vm2510_vm12, %v3351_v28, %v3347_v14  ;;  %v3677_v40 = vrot.slane %v3243_v21, %v8950_v48  ;;  %v2850_v18 = vsel %vm2531_vm15, %v2849_v45, %v2845_v33 }
 0x194   :  { %v2532_v46 = vsel %vm2531_vm15, %v2530_v20, %v2525_v13  ;;  %v8961_v12 = vmax.bf16 %v7560_v19, %v7563_v23  ;;  %v3673_v7 = vsel %vm2517_vm13, %v3672_v59, %v3668_v27  ;;  %v3361_v44 = vrot.slane %v3179_v5, %v8950_v48  ;;  %v5940_v59 = vld [vmem:[%s8912_s19 + $0x3d4] ss:$8 sps:$4 sm:$0xff]   ;;  %v5938_v27 = vld [vmem:[%s8912_s19 + $0x3d0] ss:$8 sps:$4 sm:$0xff]  }
 0x195   :  { %2217 = vmax.xlane.bf16.xlu1 %v8960_v0  ;;  %v3357_v41 = vsel %vm2517_vm13, %v3356_v63, %v3352_v9  ;;  %v1079_v52 = vmax.bf16 %v5925_v6, %v1077_v56  ;;  %v2855_v19 = vsel %vm2538_vm10, %v2854_v31, %v2850_v18  ;;  %v2539_v23 = vsel %vm2538_vm10, %v2537_v50, %v2532_v46  ;;  %v5943_v5 = vld [vmem:[%s8912_s19 + $0x1d4] ss:$8 sps:$4 sm:$0xff]   ;;  %v5941_v56 = vld [vmem:[%s8912_s19 + $0x1d0] ss:$8 sps:$4 sm:$0xff]  }
 0x196   :  { %2025 = vmax.xlane.bf16.xlu0 %v8961_v12  ;;  %v2092_v57 = vpop.xlane.xlu1 %2091  ;;  %v3678_v32 = vsel %vm2524_vm14, %v3677_v40, %v3673_v7  ;;  %v887_v54 = vmax.bf16 %v5928_v1, %v885_v17  ;;  %v3362_v60 = vsel %vm2524_vm14, %v3361_v44, %v3357_v41  ;;  %v3094_v30 = vsel %vm3093_vm9, %v2855_v19, %v2539_v23  ;;  %v5946_v40 = vld [vmem:[%s8911_s28 + $0x3d4] ss:$8 sps:$4 sm:$0xff]   ;;  %v5944_v46 = vld [vmem:[%s8911_s28 + $0x3d0] ss:$8 sps:$4 sm:$0xff]   ;;  %v8965_v19 = vld [vmem:[#allocation14_spill] sm:$0xff] }
 0x197   :  { %v3244_v47 = vunpack.c.l.b16 %v2092_v57  ;;  %v3245_v55 = vunpack.c.h.b16 %v2092_v57  ;;  %v1900_v11 = vpop.xlane.xlu0 %1899  ;;  %v2166_v25 = vsel %vm1852_vm0, %v5934_v61, 4286644096  ;;  %v3098_v22 = vpack.c.b16 %v3094_v30, %v3094_v30  ;;  %v5949_v18 = vld [vmem:[%s8911_s28 + $0x1d4] ss:$8 sps:$4 sm:$0xff]  }
 0x198   :  { %v3180_v28 = vunpack.c.l.b16 %v1900_v11  ;;  %v3181_v43 = vunpack.c.h.b16 %v1900_v11  ;;  %v1974_v21 = vsel %vm1852_vm0, %v5937_v10, 4286644096  ;;  %v2168_v20 = vmax.bf16 %v5932_v34, %v2166_v25  ;;  %v8962_v12 = vld [vmem:[#allocation11_spill] sm:$0xff]  ;;  %v8963_v1 = vld [vmem:[#allocation12_spill] sm:$0xff] }
 0x199   :  { %v3682_v8 = vrot.slane %v3244_v47, %v7444_v29  ;;  %v3687_v37 = vrot.slane %v3245_v55, %v7489_v38  ;;  %v1976_v14 = vmax.bf16 %v5935_v58, %v1974_v21  ;;  %v1131_v6 = vsel %vm762_vm1, %v5940_v59, 4286644096  ;;  %v5947_v55 = vld [vmem:[%s8911_s28 + $0x1d0] ss:$8 sps:$4 sm:$0xff]  }
 0x19a   :  { %v3366_v42 = vrot.slane %v3180_v28, %v7444_v29  ;;  %v3371_v26 = vrot.slane %v3181_v43, %v7489_v38  ;;  %v939_v33 = vsel %vm762_vm1, %v5943_v5, 4286644096  ;;  %v1133_v13 = vmax.bf16 %v5938_v27, %v1131_v6  ;;  %v8964_v43 = vld [vmem:[#allocation13_spill] sm:$0xff]  ;;  %v5950_v10 = vld [vmem:[%s8912_s19 + $0x350] ss:$8 sps:$4 sm:$0xff]  }
 0x19b   :  { %v3683_v3 = vsel %vm2531_vm15, %v3682_v8, %v3678_v32  ;;  %v941_v9 = vmax.bf16 %v5941_v56, %v939_v33  ;;  %v2220_v47 = vsel %vm1852_vm0, %v5946_v40, 4286644096  ;;  %v2028_v28 = vsel %vm1852_vm0, %v5949_v18, 4286644096  ;;  %v5953_v34 = vld [vmem:[%s8912_s19 + $0x150] ss:$8 sps:$4 sm:$0xff]  }
 0x19c   :  { %v3688_v49 = vsel %vm2538_vm10, %v3687_v37, %v3683_v3  ;;  %v3367_v53 = vsel %vm2531_vm15, %v3366_v42, %v3362_v60  ;;  %v2222_v8 = vmax.bf16 %v5944_v46, %v2220_v47  ;;  %v5955_v60 = vld [vmem:[%s8912_s19 + $0x154] ss:$8 sps:$4 sm:$0xff]  }
 0x19d   :  { %v3372_v2 = vsel %vm2538_vm10, %v3371_v26, %v3367_v53  ;;  %1080 = vmax.xlane.bf16.xlu1 %v1079_v52  ;;  %v2030_v26 = vmax.bf16 %v5947_v55, %v2028_v28  ;;  %v5958_v27 = vld [vmem:[%s8911_s28 + $0x354] ss:$8 sps:$4 sm:$0xff]   ;;  %v5964_v55 = vld [vmem:[%s8912_s19 + $0x3e4] ss:$8 sps:$4 sm:$0xff]  }
 0x19e   :  { %888 = vmax.xlane.bf16.xlu0 %v887_v54  ;;  %v3927_v35 = vsel %vm3926_vm8, %v3688_v49, %v3372_v2  ;;  %v1105_v63 = vpop.xlane.xlu1 %1104  ;;  %v5952_v54 = vld [vmem:[%s8912_s19 + $0x354] ss:$8 sps:$4 sm:$0xff]  }
 0x19f   :  { %v3931_v15 = vpack.c.b16 %v3927_v35, %v3927_v35  ;;  %v913_v17 = vpop.xlane.xlu0 %912  ;;  %v2413_v37 = vunpack.c.l.b16 %v1105_v63  ;;  %v2414_v32 = vunpack.c.h.b16 %v1105_v63  ;;  %v1083_v2 = vsel %vm762_vm1, %v5952_v54, 4286644096  ;;  %v5961_v6 = vld [vmem:[%s8911_s28 + $0x154] ss:$8 sps:$4 sm:$0xff]  }
 0x1a0   :  { %v2349_v31 = vunpack.c.l.b16 %v913_v17  ;;  %v2350_v50 = vunpack.c.h.b16 %v913_v17  ;;  %v5956_v17 = vld [vmem:[%s8911_s28 + $0x350] ss:$8 sps:$4 sm:$0xff]  }
 0x1a1   :  { %v3938_v45 = vsel %vm3935_vm7, %v3098_v22, %v3931_v15  ;;  %v3017_v49 = vrot.slane %v2413_v37, %v8962_v12  ;;  %v3021_v53 = vrot.slane %v2414_v32, %v8963_v1  ;;  %v891_v22 = vsel %vm762_vm1, %v5955_v60, 4286644096  ;;  %v5967_v37 = vld [vmem:[%s8912_s19 + $0x1e4] ss:$8 sps:$4 sm:$0xff]   ;;  %v5965_v60 = vld [vmem:[%s8912_s19 + $0x1e0] ss:$8 sps:$4 sm:$0xff]  }
 0x1a2   :  { %4381 = vmatmul.mubr.bf16.vlgmr.msra.gmra.mrb[0].mxu0 %v3938_v45  ;;  %v2701_v57 = vrot.slane %v2349_v31, %v8962_v12  ;;  %v2705_v7 = vrot.slane %v2350_v50, %v8963_v1  ;;  %v1085_v45 = vmax.bf16 %v5950_v10, %v1083_v2  ;;  %v893_v5 = vmax.bf16 %v5953_v34, %v891_v22  ;;  %v5970_v22 = vld [vmem:[%s8911_s28 + $0x3e4] ss:$8 sps:$4 sm:$0xff]  }
 0x1a3   :  { %v2172_v50 = vsel %vm1852_vm0, %v5958_v27, 4286644096 }
 0x1a4   :  { %v2706_v42 = vsel %vm2440_vm2, %v2705_v7, %v2701_v57  ;;  %v1980_v57 = vsel %vm1852_vm0, %v5961_v6, 4286644096  ;;  %v2174_v47 = vmax.bf16 %v5956_v17, %v2172_v50 }
 0x1a5   :  { %2169 = vmax.xlane.bf16.xlu1 %v2168_v20  ;;  %v3022_v20 = vsel %vm2440_vm2, %v3021_v53, %v3017_v49 }
 0x1a6   :  { %1977 = vmax.xlane.bf16.xlu0 %v1976_v14  ;;  %v7873_v0 = vpop.xlane.xlu1 %2193 }
 0x1a7   :  { %v2002_v35 = vpop.xlane.xlu0 %2001 }
 0x1a8   :  { %v3214_v14 = vunpack.c.l.b16 %v2002_v35  ;;  %v3215_v59 = vunpack.c.h.b16 %v2002_v35 }
 0x1aa   :  { %v3534_v33 = vrot.slane %v3214_v14, %v8962_v12 }
 0x1ad   :  { %1134 = vmax.xlane.bf16.xlu1 %v1133_v13  ;;  %v3538_v13 = vrot.slane %v3215_v59, %v8963_v1 }
 0x1ae   :  { %942 = vmax.xlane.bf16.xlu0 %v941_v9  ;;  %v919_v44 = vpop.xlane.xlu1 %918  ;;  %v5959_v9 = vld [vmem:[%s8911_s28 + $0x150] ss:$8 sps:$4 sm:$0xff]  }
 0x1af   :  { %v2351_v11 = vunpack.c.l.b16 %v919_v44  ;;  %v2352_v41 = vunpack.c.h.b16 %v919_v44  ;;  %v865_v40 = vpop.xlane.xlu0 %864  ;;  %v3539_v28 = vsel %vm2440_vm2, %v3538_v13, %v3534_v33  ;;  %v2226_v33 = vsel %vm1852_vm0, %v5970_v22, 4286644096  ;;  %v5971_v13 = vld [vmem:[%s8911_s28 + $0x1e0] ss:$8 sps:$4 sm:$0xff]  }
 0x1b0   :  { %v2334_v14 = vunpack.c.h.b16 %v865_v40 }
 0x1b1   :  { %v2710_v52 = vrot.slane %v2351_v11, %v8964_v43  ;;  %v2715_v23 = vrot.slane %v2352_v41, %v8965_v19  ;;  %v3278_v11 = vunpack.c.l.b16 %v7873_v0  ;;  %v3279_v41 = vunpack.c.h.b16 %v7873_v0 }
 0x1b2   :  { %v1137_v0 = vsel %vm762_vm1, %v5964_v55, 4286644096 }
 0x1b3   :  { %v2711_v61 = vsel %vm2447_vm3, %v2710_v52, %v2706_v42  ;;  %v1982_v52 = vmax.bf16 %v5959_v9, %v1980_v57  ;;  %v5962_v42 = vld [vmem:[%s8912_s19 + $0x3e0] ss:$8 sps:$4 sm:$0xff]   ;;  %v3854_v54 = vrot.slane %v3279_v41, %v8963_v1 }
 0x1b4   :  { %v7902_v3 = vsel %vm2454_vm4, %v2715_v23, %v2711_v61  ;;  %v1139_v2 = vmax.bf16 %v5962_v42, %v1137_v0  ;;  %v5976_v42 = vld [vmem:[%s8912_s19 + $0x364] ss:$8 sps:$4 sm:$0xff]  }
 0x1b5   :  { %2223 = vmax.xlane.bf16.xlu1 %v2222_v8  ;;  %v5979_v0 = vld [vmem:[%s8912_s19 + $0x164] ss:$8 sps:$4 sm:$0xff]  }
 0x1b6   :  { %2031 = vmax.xlane.bf16.xlu0 %v2030_v26  ;;  %v1111_v30 = vpop.xlane.xlu1 %1110  ;;  %v3850_v26 = vrot.slane %v3278_v11, %v8962_v12  ;;  %v897_v22 = vsel %vm762_vm1, %v5979_v0, 4286644096 }
 0x1b7   :  { %v2415_v25 = vunpack.c.l.b16 %v1111_v30  ;;  %v2416_v58 = vunpack.c.h.b16 %v1111_v30  ;;  %v1057_v23 = vpop.xlane.xlu0 %1056  ;;  %v945_v30 = vsel %vm762_vm1, %v5967_v37, 4286644096 }
 0x1b8   :  { %v2397_v34 = vunpack.c.l.b16 %v1057_v23  ;;  %v2398_v35 = vunpack.c.h.b16 %v1057_v23 }
 0x1b9   :  { %v3026_v15 = vrot.slane %v2415_v25, %v8964_v43  ;;  %v3031_v21 = vrot.slane %v2416_v58, %v8965_v19 }
 0x1ba   :  { %v2938_v6 = vrot.slane %v2397_v34, %v8962_v12  ;;  %v2942_v17 = vrot.slane %v2398_v35, %v8963_v1 }
 0x1bb   :  { %v3027_v63 = vsel %vm2447_vm3, %v3026_v15, %v3022_v20  ;;  %v3855_v15 = vsel %vm2440_vm2, %v3854_v54, %v3850_v26  ;;  %v2333_v20 = vunpack.c.l.b16 %v865_v40  ;;  %v2626_v40 = vrot.slane %v2334_v14, %v8963_v1 }
 0x1bc   :  { %v7925_v56 = vsel %vm2454_vm4, %v3031_v21, %v3027_v63  ;;  %v947_v21 = vmax.bf16 %v5965_v60, %v945_v30  ;;  %v5968_v63 = vld [vmem:[%s8911_s28 + $0x3e0] ss:$8 sps:$4 sm:$0xff]   ;;  %v2943_v55 = vsel %vm2440_vm2, %v2942_v17, %v2938_v6 }
 0x1bd   :  { %1086 = vmax.xlane.bf16.xlu1 %v1085_v45  ;;  %v5973_v45 = vld [vmem:[%s8911_s28 + $0x1e4] ss:$8 sps:$4 sm:$0xff]   ;;  %v2622_v9 = vrot.slane %v2333_v20, %v8962_v12 }
 0x1be   :  { %894 = vmax.xlane.bf16.xlu0 %v893_v5  ;;  %v2008_v31 = vpop.xlane.xlu1 %2007  ;;  %v2034_v50 = vsel %vm1852_vm0, %v5973_v45, 4286644096 }
 0x1bf   :  { %v3216_v18 = vunpack.c.l.b16 %v2008_v31  ;;  %v3217_v46 = vunpack.c.h.b16 %v2008_v31  ;;  %v7961_v10 = vpop.xlane.xlu0 %1953  ;;  %v2627_v26 = vsel %vm2440_vm2, %v2626_v40, %v2622_v9  ;;  %v5985_v40 = vld [vmem:[%s8911_s28 + $0x164] ss:$8 sps:$4 sm:$0xff]  }
 0x1c0   :  { %v3198_v54 = vunpack.c.l.b16 %v7961_v10 }
 0x1c1   :  { %v3543_v7 = vrot.slane %v3216_v18, %v8964_v43  ;;  %v3548_v44 = vrot.slane %v3217_v46, %v8965_v19 }
 0x1c3   :  { %v3544_v8 = vsel %vm2447_vm3, %v3543_v7, %v3539_v28  ;;  %v2036_v28 = vmax.bf16 %v5971_v13, %v2034_v50 }
 0x1c4   :  { %v7950_v32 = vsel %vm2454_vm4, %v3548_v44, %v3544_v8 }
 0x1c5   :  { %2175 = vmax.xlane.bf16.xlu1 %v2174_v47  ;;  %v2228_v47 = vmax.bf16 %v5968_v63, %v2226_v33 }
 0x1c6   :  { %1983 = vmax.xlane.bf16.xlu0 %v1982_v52  ;;  %v2200_v61 = vpop.xlane.xlu1 %2199 }
 0x1c7   :  { %v3280_v49 = vunpack.c.l.b16 %v2200_v61  ;;  %v3281_v53 = vunpack.c.h.b16 %v2200_v61  ;;  %v2146_v5 = vpop.xlane.xlu0 %2145  ;;  %v3199_v61 = vunpack.c.h.b16 %v7961_v10 }
 0x1c8   :  { %v3262_v52 = vunpack.c.l.b16 %v2146_v5  ;;  %v3263_v23 = vunpack.c.h.b16 %v2146_v5 }
 0x1c9   :  { %v3859_v25 = vrot.slane %v3280_v49, %v8964_v43  ;;  %v3864_v58 = vrot.slane %v3281_v53, %v8965_v19 }
 0x1ca   :  { %v3771_v34 = vrot.slane %v3262_v52, %v8962_v12  ;;  %v3775_v35 = vrot.slane %v3263_v23, %v8963_v1  ;;  %v6012_v23 = vld [vmem:[%s8861_s2 + $0x104] ss:$8 sps:$4 sm:$0xff]  }
 0x1cb   :  { %v3860_v59 = vsel %vm2447_vm3, %v3859_v25, %v3855_v15  ;;  %v1089_v25 = vsel %vm762_vm1, %v5976_v42, 4286644096  ;;  %v3455_v15 = vrot.slane %v3198_v54, %v8962_v12  ;;  %v5982_v12 = vld [vmem:[%s8911_s28 + $0x364] ss:$8 sps:$4 sm:$0xff]   ;;  %v8967_v42 = vld [vmem:[#allocation16_spill] sm:$0xff]  ;;  %4389 = vmatprep.subr.bf16.mxu0 %v6012_v23 }
 0x1cc   :  { %v7975_v27 = vsel %vm2454_vm4, %v3864_v58, %v3860_v59  ;;  %v5977_v58 = vld [vmem:[%s8912_s19 + $0x160] ss:$8 sps:$4 sm:$0xff]   ;;  %v3776_v33 = vsel %vm2440_vm2, %v3775_v35, %v3771_v34  ;;  %v5991_v35 = vld [vmem:[%s8912_s19 + $0x1f4] ss:$8 sps:$4 sm:$0xff]  }
 0x1cd   :  { %1140 = vmax.xlane.bf16.xlu1 %v1139_v2  ;;  %v5974_v2 = vld [vmem:[%s8912_s19 + $0x360] ss:$8 sps:$4 sm:$0xff]   ;;  %v899_v50 = vmax.bf16 %v5977_v58, %v897_v22  ;;  %v6015_v58 = vld [vmem:[%s8861_s2 + $0x114] ss:$8 sps:$4 sm:$0xff]  }
 0x1ce   :  { %948 = vmax.xlane.bf16.xlu0 %v947_v21  ;;  %v1063_v31 = vpop.xlane.xlu1 %1062  ;;  %v3459_v21 = vrot.slane %v3199_v61, %v8963_v1  ;;  %v1091_v17 = vmax.bf16 %v5974_v2, %v1089_v25  ;;  %v6010_v54 = vld [vmem:[%s8861_s2 + $0x100] ss:$8 sps:$4 sm:$0xff]   ;;  %v5988_v2 = vld [vmem:[%s8912_s19 + $0x3f4] ss:$8 sps:$4 sm:$0xff]  }
 0x1cf   :  { %v2399_v18 = vunpack.c.l.b16 %v1063_v31  ;;  %v2400_v46 = vunpack.c.h.b16 %v1063_v31  ;;  %v871_v57 = vpop.xlane.xlu0 %870  ;;  %4390 = vmatpush1.bf16.msra.mxu0 %v6010_v54  ;;  %v6024_v54 = vld [vmem:[%s8861_s2 + $0x144] ss:$8 sps:$4 sm:$0xff]  }
 0x1d0   :  { %v2335_v7 = vunpack.c.l.b16 %v871_v57  ;;  %v2336_v44 = vunpack.c.h.b16 %v871_v57  ;;  %v3460_v1 = vsel %vm2440_vm2, %v3459_v21, %v3455_v15  ;;  %v6013_v15 = vld [vmem:[%s8861_s2 + $0x110] ss:$8 sps:$4 sm:$0xff]   ;;  %4391 = vmatprep.subr.bf16.mxu0 %v6015_v58  ;;  %v6000_v58 = vld [vmem:[%s8912_s19 + $0x374] ss:$8 sps:$4 sm:$0xff]   ;;  %vm8969_vm2 = vcmask 523712  }
 0x1d1   :  { %v2947_v11 = vrot.slane %v2399_v18, %v8964_v43  ;;  %v2952_v41 = vrot.slane %v2400_v46, %v8965_v19  ;;  %v5980_v46 = vld [vmem:[%s8911_s28 + $0x360] ss:$8 sps:$4 sm:$0xff]  }
 0x1d2   :  { %v2631_v8 = vrot.slane %v2335_v7, %v8964_v43  ;;  %v2636_v37 = vrot.slane %v2336_v44, %v8965_v19  ;;  %v2178_v7 = vsel %vm1852_vm0, %v5982_v12, 4286644096  ;;  %v5983_v44 = vld [vmem:[%s8911_s28 + $0x160] ss:$8 sps:$4 sm:$0xff]  }
 0x1d3   :  { %v2948_v60 = vsel %vm2447_vm3, %v2947_v11, %v2943_v55  ;;  %4392 = vmatpush1.bf16.msra.mxu0 %v6013_v15  ;;  %v6003_v15 = vld [vmem:[%s8912_s19 + $0x174] ss:$8 sps:$4 sm:$0xff]  }
 0x1d4   :  { %v8005_v49 = vsel %vm2454_vm4, %v2952_v41, %v2948_v60  ;;  %v2632_v53 = vsel %vm2447_vm3, %v2631_v8, %v2627_v26  ;;  %v1986_v41 = vsel %vm1852_vm0, %v5985_v40, 4286644096  ;;  %v8966_v8 = vld [vmem:[#allocation15_spill] sm:$0xff]  ;;  %v2180_v26 = vmax.bf16 %v5980_v46, %v2178_v7 }
 0x1d5   :  { %v8009_v30 = vsel %vm2454_vm4, %v2636_v37, %v2632_v53  ;;  %2229 = vmax.xlane.bf16.xlu1 %v2228_v47  ;;  %v1988_v53 = vmax.bf16 %v5983_v44, %v1986_v41  ;;  %v5994_v40 = vld [vmem:[%s8911_s28 + $0x3f4] ss:$8 sps:$4 sm:$0xff]   ;;  %v5995_v41 = vld [vmem:[%s8911_s28 + $0x1f0] ss:$8 sps:$4 sm:$0xff]  }
 0x1d6   :  { %2037 = vmax.xlane.bf16.xlu0 %v2036_v28  ;;  %v2152_v10 = vpop.xlane.xlu1 %2151  ;;  %v5997_v46 = vld [vmem:[%s8911_s28 + $0x1f4] ss:$8 sps:$4 sm:$0xff]  }
 0x1d7   :  { %v3264_v45 = vunpack.c.l.b16 %v2152_v10  ;;  %v3265_v20 = vunpack.c.h.b16 %v2152_v10  ;;  %v1960_v14 = vpop.xlane.xlu0 %1959  ;;  %v6021_v44 = vld [vmem:[%s8861_s2 + $0x134] ss:$8 sps:$4 sm:$0xff]  }
 0x1d8   :  { %v3200_v59 = vunpack.c.l.b16 %v1960_v14  ;;  %v3201_v5 = vunpack.c.h.b16 %v1960_v14 }
 0x1d9   :  { %v3780_v63 = vrot.slane %v3264_v45, %v8964_v43  ;;  %v3785_v6 = vrot.slane %v3265_v20, %v8965_v19  ;;  %v5989_v45 = vld [vmem:[%s8912_s19 + $0x1f0] ss:$8 sps:$4 sm:$0xff]  }
 0x1da   :  { %v3464_v13 = vrot.slane %v3200_v59, %v8964_v43  ;;  %v3469_v31 = vrot.slane %v3201_v5, %v8965_v19  ;;  %v951_v5 = vsel %vm762_vm1, %v5991_v35, 4286644096 }
 0x1db   :  { %v3781_v9 = vsel %vm2447_vm3, %v3780_v63, %v3776_v33 }
 0x1dc   :  { %v8037_v18 = vsel %vm2454_vm4, %v3785_v6, %v3781_v9  ;;  %v3465_v43 = vsel %vm2447_vm3, %v3464_v13, %v3460_v1  ;;  %v953_v9 = vmax.bf16 %v5989_v45, %v951_v5  ;;  %v6027_v45 = vld [vmem:[%s8861_s2 + $0x154] ss:$8 sps:$4 sm:$0xff]   ;;  %v6001_v5 = vld [vmem:[%s8912_s19 + $0x170] ss:$8 sps:$4 sm:$0xff]  }
 0x1dd   :  { %v8041_v19 = vsel %vm2454_vm4, %v3469_v31, %v3465_v43  ;;  %1092 = vmax.xlane.bf16.xlu1 %v1091_v17  ;;  %v6018_v17 = vld [vmem:[%s8861_s2 + $0x124] ss:$8 sps:$4 sm:$0xff]   ;;  %vm8971_vm4 = vmmov %vm8969_vm2 }
 0x1de   :  { %900 = vmax.xlane.bf16.xlu0 %v899_v50  ;;  %v1117_v57 = vpop.xlane.xlu1 %1116  ;;  %v6016_v50 = vld [vmem:[%s8861_s2 + $0x120] ss:$8 sps:$4 sm:$0xff]   ;;  %4393 = vmatprep.subr.bf16.mxu0 %v6018_v17 }
 0x1df   :  { %v2417_v47 = vunpack.c.l.b16 %v1117_v57  ;;  %v2418_v55 = vunpack.c.h.b16 %v1117_v57  ;;  %v925_v11 = vpop.xlane.xlu0 %924  ;;  %4394 = vmatpush1.bf16.msra.mxu0 %v6016_v50  ;;  %v6030_v50 = vld [vmem:[%s8861_s2 + $0x164] ss:$8 sps:$4 sm:$0xff]  }
 0x1e0   :  { %v2353_v28 = vunpack.c.l.b16 %v925_v11  ;;  %v2354_v52 = vunpack.c.h.b16 %v925_v11  ;;  %4395 = vmatprep.subr.bf16.mxu0 %v6021_v44  ;;  %v6006_v44 = vld [vmem:[%s8911_s28 + $0x374] ss:$8 sps:$4 sm:$0xff]  }
 0x1e1   :  { %v3036_v37 = vrot.slane %v2417_v47, %v8966_v8  ;;  %v3041_v0 = vrot.slane %v2418_v55, %v8967_v42  ;;  %v6019_v55 = vld [vmem:[%s8861_s2 + $0x130] ss:$8 sps:$4 sm:$0xff]  }
 0x1e2   :  { %v2720_v61 = vrot.slane %v2353_v28, %v8966_v8  ;;  %v2725_v60 = vrot.slane %v2354_v52, %v8967_v42 }
 0x1e3   :  { %v3037_v34 = vsel %vm2461_vm5, %v3036_v37, %v7925_v56  ;;  %v5986_v56 = vld [vmem:[%s8912_s19 + $0x3f0] ss:$8 sps:$4 sm:$0xff]   ;;  %v2040_v37 = vsel %vm1852_vm0, %v5997_v46, 4286644096  ;;  %4396 = vmatpush1.bf16.msra.mxu0 %v6019_v55  ;;  %v6009_v55 = vld [vmem:[%s8911_s28 + $0x174] ss:$8 sps:$4 sm:$0xff]  }
 0x1e4   :  { %v8070_v10 = vsel %vm2468_vm6, %v3041_v0, %v3037_v34  ;;  %v2721_v25 = vsel %vm2461_vm5, %v2720_v61, %v7902_v3  ;;  %v1143_v3 = vsel %vm762_vm1, %v5988_v2, 4286644096  ;;  %v6022_v2 = vld [vmem:[%s8861_s2 + $0x140] ss:$8 sps:$4 sm:$0xff]   ;;  %4397 = vmatprep.subr.bf16.mxu0 %v6024_v54  ;;  %v6039_v54 = vld [vmem:[%s8861_s2 + $0x194] ss:$8 sps:$4 sm:$0xff]  }
 0x1e5   :  { %v8078_v22 = vsel %vm2468_vm6, %v2725_v60, %v2721_v25  ;;  %2181 = vmax.xlane.bf16.xlu1 %v2180_v26  ;;  %v1145_v31 = vmax.bf16 %v5986_v56, %v1143_v3  ;;  %v2042_v25 = vmax.bf16 %v5995_v41, %v2040_v37  ;;  %v6031_v41 = vld [vmem:[%s8861_s2 + $0x170] ss:$8 sps:$4 sm:$0xff]  }
 0x1e6   :  { %1989 = vmax.xlane.bf16.xlu0 %v1988_v53  ;;  %v2206_v21 = vpop.xlane.xlu1 %2205 }
 0x1e7   :  { %v3282_v20 = vunpack.c.l.b16 %v2206_v21  ;;  %v3283_v14 = vunpack.c.h.b16 %v2206_v21  ;;  %v2014_v59 = vpop.xlane.xlu0 %2013  ;;  %4398 = vmatpush1.bf16.msra.mxu0 %v6022_v2  ;;  %v6042_v2 = vld [vmem:[%s8861_s2 + $0x1a4] ss:$8 sps:$4 sm:$0xff]  }
 0x1e8   :  { %v3218_v63 = vunpack.c.l.b16 %v2014_v59  ;;  %v3219_v6 = vunpack.c.h.b16 %v2014_v59  ;;  %4399 = vmatprep.subr.bf16.mxu0 %v6027_v45 }
 0x1e9   :  { %v3869_v33 = vrot.slane %v3282_v20, %v8966_v8  ;;  %v3874_v13 = vrot.slane %v3283_v14, %v8967_v42  ;;  %v6025_v14 = vld [vmem:[%s8861_s2 + $0x150] ss:$8 sps:$4 sm:$0xff]  }
 0x1ea   :  { %v3553_v12 = vrot.slane %v3218_v63, %v8966_v8  ;;  %v3558_v1 = vrot.slane %v3219_v6, %v8967_v42 }
 0x1eb   :  { %v3870_v43 = vsel %vm2461_vm5, %v3869_v33, %v7975_v27  ;;  %v5992_v27 = vld [vmem:[%s8911_s28 + $0x3f0] ss:$8 sps:$4 sm:$0xff]   ;;  %v903_v33 = vsel %vm762_vm1, %v6003_v15, 4286644096  ;;  %4400 = vmatpush1.bf16.msra.mxu0 %v6025_v14 }
 0x1ec   :  { %v8110_v57 = vsel %vm2468_vm6, %v3874_v13, %v3870_v43  ;;  %v3554_v7 = vsel %vm2461_vm5, %v3553_v12, %v7950_v32  ;;  %v2232_v32 = vsel %vm1852_vm0, %v5994_v40, 4286644096  ;;  %v6028_v40 = vld [vmem:[%s8861_s2 + $0x160] ss:$8 sps:$4 sm:$0xff]   ;;  %4401 = vmatprep.subr.bf16.mxu0 %v6030_v50 }
 0x1ed   :  { %v8118_v47 = vsel %vm2468_vm6, %v3558_v1, %v3554_v7  ;;  %1146 = vmax.xlane.bf16.xlu1 %v1145_v31  ;;  %v2234_v53 = vmax.bf16 %v5992_v27, %v2232_v32  ;;  %v905_v7 = vmax.bf16 %v6001_v5, %v903_v33 }
 0x1ee   :  { %954 = vmax.xlane.bf16.xlu0 %v953_v9  ;;  %v1069_v11 = vpop.xlane.xlu1 %1068 }
 0x1ef   :  { %v2401_v28 = vunpack.c.l.b16 %v1069_v11  ;;  %v2402_v52 = vunpack.c.h.b16 %v1069_v11  ;;  %v877_v23 = vpop.xlane.xlu0 %876  ;;  %4402 = vmatpush1.bf16.msra.mxu0 %v6028_v40 }
 0x1f0   :  { %v2337_v0 = vunpack.c.l.b16 %v877_v23  ;;  %v2338_v26 = vunpack.c.h.b16 %v877_v23  ;;  %v6036_v23 = vld [vmem:[%s8861_s2 + $0x184] ss:$8 sps:$4 sm:$0xff]  }
 0x1f1   :  { %v2957_v61 = vrot.slane %v2401_v28, %v8966_v8  ;;  %v2962_v60 = vrot.slane %v2402_v52, %v8967_v42  ;;  %v2184_v28 = vsel %vm1852_vm0, %v6006_v44, 4286644096  ;;  %v1992_v52 = vsel %vm1852_vm0, %v6009_v55, 4286644096 }
 0x1f2   :  { %v2641_v34 = vrot.slane %v2337_v0, %v8966_v8  ;;  %v2646_v35 = vrot.slane %v2338_v26, %v8967_v42  ;;  %v6034_v0 = vld [vmem:[%s8861_s2 + $0x180] ss:$8 sps:$4 sm:$0xff]  }
 0x1f3   :  { %v2958_v56 = vsel %vm2461_vm5, %v2957_v61, %v8005_v49  ;;  %v5998_v49 = vld [vmem:[%s8912_s19 + $0x370] ss:$8 sps:$4 sm:$0xff]  }
 0x1f4   :  { %v8150_v21 = vsel %vm2468_vm6, %v2962_v60, %v2958_v56  ;;  %v2642_v3 = vsel %vm2461_vm5, %v2641_v34, %v8009_v30  ;;  %v1095_v30 = vsel %vm762_vm1, %v6000_v58, 4286644096  ;;  %v6037_v61 = vld [vmem:[%s8861_s2 + $0x190] ss:$8 sps:$4 sm:$0xff]   ;;  %v6040_v34 = vld [vmem:[%s8861_s2 + $0x1a0] ss:$8 sps:$4 sm:$0xff]  }
 0x1f5   :  { %v8158_v20 = vsel %vm2468_vm6, %v2646_v35, %v2642_v3  ;;  %2235 = vmax.xlane.bf16.xlu1 %v2234_v53  ;;  %v1097_v9 = vmax.bf16 %v5998_v49, %v1095_v30  ;;  %v6045_v58 = vld [vmem:[%s8861_s2 + $0x1b4] ss:$8 sps:$4 sm:$0xff]   ;;  %v6043_v56 = vld [vmem:[%s8861_s2 + $0x1b0] ss:$8 sps:$4 sm:$0xff]   ;;  %v6048_v30 = vld [vmem:[%s8861_s2 + $0x1c4] ss:$8 sps:$4 sm:$0xff]  }
 0x1f6   :  { %2043 = vmax.xlane.bf16.xlu0 %v2042_v25  ;;  %v2158_v59 = vpop.xlane.xlu1 %2157  ;;  %vm8968_vm1 = vcmask 458112  }
 0x1f7   :  { %v3266_v63 = vunpack.c.l.b16 %v2158_v59  ;;  %v3267_v6 = vunpack.c.h.b16 %v2158_v59  ;;  %v1966_v17 = vpop.xlane.xlu0 %1965  ;;  %vm8970_vm3 = vmmov %vm8968_vm1 }
 0x1f8   :  { %v3202_v13 = vunpack.c.l.b16 %v1966_v17  ;;  %v3203_v31 = vunpack.c.h.b16 %v1966_v17 }
 0x1f9   :  { %v3790_v12 = vrot.slane %v3266_v63, %v8966_v8  ;;  %v3795_v1 = vrot.slane %v3267_v6, %v8967_v42  ;;  %v6046_v6 = vld [vmem:[%s8861_s2 + $0x1c0] ss:$8 sps:$4 sm:$0xff]  }
 0x1fa   :  { %v3474_v43 = vrot.slane %v3202_v13, %v8966_v8  ;;  %v3479_v46 = vrot.slane %v3203_v31, %v8967_v42  ;;  %v6033_v42 = vld [vmem:[%s8861_s2 + $0x174] ss:$8 sps:$4 sm:$0xff]  }
 0x1fb   :  { %v3791_v27 = vsel %vm2461_vm5, %v3790_v12, %v8037_v18  ;;  %v6004_v18 = vld [vmem:[%s8911_s28 + $0x370] ss:$8 sps:$4 sm:$0xff]   ;;  %4403 = vmatprep.subr.bf16.mxu0 %v6033_v42  ;;  %v6051_v12 = vld [vmem:[%s8861_s2 + $0x1d4] ss:$8 sps:$4 sm:$0xff]  }
 0x1fc   :  { %v8190_v11 = vsel %vm2468_vm6, %v3795_v1, %v3791_v27  ;;  %v3475_v8 = vsel %vm2461_vm5, %v3474_v43, %v8041_v19  ;;  %v6007_v19 = vld [vmem:[%s8911_s28 + $0x170] ss:$8 sps:$4 sm:$0xff]   ;;  %4404 = vmatpush1.bf16.msra.mxu0 %v6031_v41  ;;  %v2186_v37 = vmax.bf16 %v6004_v18, %v2184_v28  ;;  %vm8972_vm5 = vmmov %vm8968_vm1 }
 0x1fd   :  { %v8198_v32 = vsel %vm2468_vm6, %v3479_v46, %v3475_v8  ;;  %1098 = vmax.xlane.bf16.xlu1 %v1097_v9  ;;  %v1994_v26 = vmax.bf16 %v6007_v19, %v1992_v52  ;;  %4405 = vmatprep.subr.bf16.mxu0 %v6036_v23  ;;  %v6049_v9 = vld [vmem:[%s8861_s2 + $0x1d0] ss:$8 sps:$4 sm:$0xff]   ;;  %v6052_v8 = vld [vmem:[%s8861_s2 + $0x1e0] ss:$8 sps:$4 sm:$0xff]   ;;  %vm8973_vm6 = vmmov %vm8969_vm2 }
 0x1fe   :  { %906 = vmax.xlane.bf16.xlu0 %v905_v7  ;;  %v8223_v60 = vpop.xlane.xlu1 %1122  ;;  %v6057_v52 = vld [vmem:[%s8861_s2 + $0x1f4] ss:$8 sps:$4 sm:$0xff]  }
 0x1ff   :  { %v8225_v53 = vpop.xlane.xlu0 %930 }
 0x200   :  { %4406 = vmatpush1.bf16.msra.mxu0 %v6034_v0  ;;  %v4434_v0 = vld [vmem:[%s8863_s4] sm:$0xff] }
 0x201   :  { %4407 = vmatprep.subr.bf16.mxu0 %v6039_v54  ;;  %v4436_v54 = vld [vmem:[%s8863_s4 + $0x10] sm:$0xff] }
 0x204   :  { %4408 = vmatpush1.bf16.msra.mxu0 %v6037_v61  ;;  %v4439_v61 = vld [vmem:[%s8863_s4 + $0x28] sm:$0xff] }
 0x205   :  { %2187 = vmax.xlane.bf16.xlu1 %v2186_v37  ;;  %4409 = vmatprep.subr.bf16.mxu0 %v6042_v2  ;;  %v6055_v37 = vld [vmem:[%s8861_s2 + $0x1f0] ss:$8 sps:$4 sm:$0xff]  }
 0x206   :  { %1995 = vmax.xlane.bf16.xlu0 %v1994_v26  ;;  %v8233_v35 = vpop.xlane.xlu1 %2211  ;;  %v4441_v2 = vld [vmem:[%s8863_s4 + $0x38] sm:$0xff] }
 0x207   :  { %v8235_v25 = vpop.xlane.xlu0 %2019 }
 0x208   :  { %4410 = vmatpush1.bf16.msra.mxu0 %v6040_v34  ;;  %v5472_v34 = vpack.c.bf16 %v4436_v54, %v4434_v0 }
 0x209   :  { %4411 = vmatprep.subr.bf16.mxu0 %v6045_v58  ;;  %v5474_v58 = vpack.c.bf16 %v4441_v2, %v4439_v61  ;;  %v2419_v61 = vunpack.c.l.b16 %v8223_v60  ;;  %v2355_v2 = vunpack.c.l.b16 %v8225_v53 }
 0x20c   :  { %4412 = vmatpush1.bf16.msra.mxu0 %v6043_v56  ;;  %v4438_v56 = vld [vmem:[%s8863_s4 + $0x20] sm:$0xff] }
 0x20d   :  { %4413 = vmatprep.subr.bf16.mxu0 %v6048_v30  ;;  %v4444_v30 = vld [vmem:[%s8863_s4 + $0x50] sm:$0xff] }
 0x20e   :  { %v1075_v15 = vpop.xlane.xlu1 %1074 }
 0x20f   :  { %v2403_v3 = vunpack.c.l.b16 %v1075_v15  ;;  %v2404_v45 = vunpack.c.h.b16 %v1075_v15  ;;  %v883_v49 = vpop.xlane.xlu0 %882  ;;  %v4440_v15 = vld [vmem:[%s8863_s4 + $0x30] sm:$0xff] }
 0x210   :  { %v2339_v14 = vunpack.c.l.b16 %v883_v49  ;;  %v2340_v59 = vunpack.c.h.b16 %v883_v49  ;;  %4414 = vmatpush1.bf16.msra.mxu0 %v6046_v6  ;;  %v5476_v49 = vpack.c.bf16 %v4440_v15, %v4438_v56  ;;  %v2420_v56 = vunpack.c.h.b16 %v8223_v60 }
 0x211   :  { %v2967_v5 = vrot.slane %v2403_v3, %v6934_v39  ;;  %v2972_v63 = vrot.slane %v2404_v45, %v6937_v51  ;;  %4415 = vmatprep.subr.bf16.mxu0 %v6051_v12  ;;  %v4443_v3 = vld [vmem:[%s8863_s4 + $0x48] sm:$0xff]  ;;  %v4445_v45 = vld [vmem:[%s8863_s4 + $0x58] sm:$0xff]  ;;  %v2356_v15 = vunpack.c.h.b16 %v8225_v53 }
 0x212   :  { %v2651_v17 = vrot.slane %v2339_v14, %v6934_v39  ;;  %v2656_v33 = vrot.slane %v2340_v59, %v6937_v51  ;;  %v5478_v14 = vpack.c.bf16 %v4445_v45, %v4443_v3  ;;  %v4442_v59 = vld [vmem:[%s8863_s4 + $0x40] sm:$0xff]  ;;  %v4453_v12 = vld [vmem:[%s8863_s4 + $0x98] sm:$0xff]  ;;  %v3284_v3 = vunpack.c.l.b16 %v8233_v35 }
 0x213   :  { %v2968_v13 = vsel %vm8968_vm1, %v2967_v5, %v8150_v21  ;;  %v4447_v5 = vld [vmem:[%s8863_s4 + $0x68] sm:$0xff]  ;;  %v5480_v6 = vpack.c.bf16 %v4444_v30, %v4442_v59  ;;  %v3046_v45 = vrot.slane %v2419_v61, %v6934_v39  ;;  %v3220_v59 = vunpack.c.l.b16 %v8235_v25 }
 0x214   :  { %v8256_v31 = vsel %vm8969_vm2, %v2972_v63, %v2968_v13  ;;  %v2652_v50 = vsel %vm8970_vm3, %v2651_v17, %v8158_v20  ;;  %4416 = vmatpush1.bf16.msra.mxu0 %v6049_v9  ;;  %v6054_v20 = vld [vmem:[%s8861_s2 + $0x1e4] ss:$8 sps:$4 sm:$0xff]   ;;  %v4449_v63 = vld [vmem:[%s8863_s4 + $0x78] sm:$0xff]  ;;  %v4448_v13 = vld [vmem:[%s8863_s4 + $0x70] sm:$0xff]  ;;  %v3051_v60 = vrot.slane %v2420_v56, %v6937_v51  ;;  %v2735_v53 = vrot.slane %v2356_v15, %v6937_v51 }
 0x215   :  { %v8264_v1 = vsel %vm8971_vm4, %v2656_v33, %v2652_v50  ;;  %4417 = vmatprep.subr.bf16.mxu0 %v6054_v20  ;;  %v5482_v17 = vpack.c.bf16 %v4449_v63, %v4447_v5  ;;  %v4446_v33 = vld [vmem:[%s8863_s4 + $0x60] sm:$0xff]  ;;  %v4451_v50 = vld [vmem:[%s8863_s4 + $0x88] sm:$0xff]  ;;  %v3285_v63 = vunpack.c.h.b16 %v8233_v35  ;;  %vm8974_vm3 = vmmov %vm8968_vm1  ;;  %v3563_v35 = vrot.slane %v3220_v59, %v6934_v39 }
 0x216   :  { %v2164_v40 = vpop.xlane.xlu1 %2163  ;;  %v5484_v9 = vpack.c.bf16 %v4448_v13, %v4446_v33  ;;  %v3047_v13 = vsel %vm8974_vm3, %v3046_v45, %v8070_v10  ;;  %vm8975_vm4 = vmmov %vm8968_vm1 }
 0x217   :  { %v3268_v21 = vunpack.c.l.b16 %v2164_v40  ;;  %v3269_v43 = vunpack.c.h.b16 %v2164_v40  ;;  %v1972_v46 = vpop.xlane.xlu0 %1971  ;;  %v5486_v40 = vpack.c.bf16 %v4453_v12, %v4451_v50  ;;  %v3221_v12 = vunpack.c.h.b16 %v8235_v25 }
 0x218   :  { %v3204_v7 = vunpack.c.l.b16 %v1972_v46  ;;  %v3205_v44 = vunpack.c.h.b16 %v1972_v46  ;;  %4418 = vmatpush1.bf16.msra.mxu0 %v6052_v8  ;;  %v4455_v46 = vld [vmem:[%s8863_s4 + $0xa8] sm:$0xff] }
 0x219   :  { %v3800_v27 = vrot.slane %v3268_v21, %v6934_v39  ;;  %v3805_v55 = vrot.slane %v3269_v43, %v6937_v51  ;;  %4419 = vmatprep.subr.bf16.mxu0 %v6057_v52  ;;  %v4450_v21 = vld [vmem:[%s8863_s4 + $0x80] sm:$0xff]  ;;  %v4452_v43 = vld [vmem:[%s8863_s4 + $0x90] sm:$0xff]  ;;  %v4459_v8 = vld [vmem:[%s8863_s4 + $0xc8] sm:$0xff] }
 0x21a   :  { %v3484_v42 = vrot.slane %v3204_v7, %v6934_v39  ;;  %v3489_v18 = vrot.slane %v3205_v44, %v6937_v51  ;;  %v4457_v7 = vld [vmem:[%s8863_s4 + $0xb8] sm:$0xff]  ;;  %v5488_v44 = vpack.c.bf16 %v4452_v43, %v4450_v21 }
 0x21b   :  { %v3801_v41 = vsel %vm8972_vm5, %v3800_v27, %v8190_v11  ;;  %v4435_v11 = vld [vmem:[%s8863_s4 + $0x8] sm:$0xff]  ;;  %v5490_v20 = vpack.c.bf16 %v4457_v7, %v4455_v46  ;;  %v4454_v27 = vld [vmem:[%s8863_s4 + $0xa0] sm:$0xff]  ;;  %vm8976_vm5 = vmmov %vm8969_vm2 }
 0x21c   :  { %v8282_v28 = vsel %vm8973_vm6, %v3805_v55, %v3801_v41  ;;  %v3485_v19 = vsel %vm8968_vm1, %v3484_v42, %v8198_v32  ;;  %4420 = vmatpush1.bf16.msra.mxu0 %v6055_v37  ;;  %v4437_v32 = vld [vmem:[%s8863_s4 + $0x18] sm:$0xff]  ;;  %v4456_v55 = vld [vmem:[%s8863_s4 + $0xb0] sm:$0xff]  ;;  %vm8977_vm6 = vmmov %vm8968_vm1 }
 0x21d   :  { %v8290_v23 = vsel %vm8969_vm2, %v3489_v18, %v3485_v19  ;;  %v5470_v26 = vpack.c.bf16 %v4437_v32, %v4435_v11  ;;  %v4461_v42 = vld [vmem:[%s8863_s4 + $0xd8] sm:$0xff]  ;;  %v5492_v18 = vpack.c.bf16 %v4456_v55, %v4454_v27  ;;  %vm8978_vm1 = vmmov %vm8969_vm2 }
 0x21e   :  { %v5494_v41 = vpack.c.bf16 %v4461_v42, %v4459_v8  ;;  %v1129_v19 = vpop.xlane.xlu1 %1128  ;;  %v3568_v8 = vrot.slane %v3221_v12, %v6937_v51  ;;  %vm8979_vm2 = vmmov %vm8974_vm3  ;;  %vm8980_vm3 = vcmask 589312  }
 0x21f   :  { %5471 = vmatprep.subr.bf16.mxu1 %v5470_v26  ;;  %v937_v52 = vpop.xlane.xlu0 %936  ;;  %v2421_v30 = vunpack.c.l.b16 %v1129_v19 }
 0x220   :  { %5473 = vmatpush1.bf16.msra.mxu1 %v5472_v34  ;;  %v2358_v43 = vunpack.c.h.b16 %v937_v52 }
 0x221   :  { %5475 = vmatprep.subr.bf16.mxu1 %v5474_v58  ;;  %v3056_v21 = vrot.slane %v2421_v30, %v6949_v62 }
 0x224   :  { %5477 = vmatpush1.bf16.msra.mxu1 %v5476_v49  ;;  %v2730_v49 = vrot.slane %v2355_v2, %v6934_v39 }
 0x225   :  { %5479 = vmatprep.subr.bf16.mxu1 %v5478_v14 }
 0x226   :  { %v2218_v37 = vpop.xlane.xlu1 %2217  ;;  %v2731_v50 = vsel %vm8975_vm4, %v2730_v49, %v8078_v22  ;;  %v3052_v22 = vsel %vm8976_vm5, %v3051_v60, %v3047_v13  ;;  %vm8981_vm4 = vmmov %vm8978_vm1 }
 0x227   :  { %v2026_v11 = vpop.xlane.xlu0 %2025  ;;  %v3286_v33 = vunpack.c.l.b16 %v2218_v37  ;;  %v2736_v55 = vsel %vm8978_vm1, %v2735_v53, %v2731_v50  ;;  %vm8982_vm5 = vmmov %vm8980_vm3 }
 0x228   :  { %5481 = vmatpush1.bf16.msra.mxu1 %v5480_v6  ;;  %v2357_v6 = vunpack.c.l.b16 %v937_v52  ;;  %v3222_v46 = vunpack.c.l.b16 %v2026_v11  ;;  %v3057_v52 = vsel %vm8980_vm3, %v3056_v21, %v3052_v22 }
 0x229   :  { %5483 = vmatprep.subr.bf16.mxu1 %v5482_v17  ;;  %v3879_v17 = vrot.slane %v3284_v3, %v6934_v39  ;;  %v3889_v27 = vrot.slane %v3286_v33, %v6949_v62 }
 0x22a   :  { %v2740_v10 = vrot.slane %v2357_v6, %v6949_v62 }
 0x22b   :  { %v3880_v25 = vsel %vm8977_vm6, %v3879_v17, %v8110_v57  ;;  %v2745_v57 = vrot.slane %v2358_v43, %v8938_v4  ;;  %vm8983_vm6 = vmmov %vm8980_vm3 }
 0x22c   :  { %5485 = vmatpush1.bf16.msra.mxu1 %v5484_v9  ;;  %v2422_v9 = vunpack.c.h.b16 %v1129_v19  ;;  %v3564_v19 = vsel %vm8979_vm2, %v3563_v35, %v8118_v47  ;;  %vm8984_vm2 = vcmask 654912  }
 0x22d   :  { %5487 = vmatprep.subr.bf16.mxu1 %v5486_v40  ;;  %v3569_v45 = vsel %vm8978_vm1, %v3568_v8, %v3564_v19  ;;  %vm8985_vm3 = vmmov %vm8984_vm2 }
 0x22e   :  { %v8373_v32 = vpop.xlane.xlu1 %1080  ;;  %v3061_v42 = vrot.slane %v2422_v9, %v8938_v4  ;;  %vm8989_vm1 = vmmov %vm8984_vm2 }
 0x22f   :  { %v8375_v0 = vpop.xlane.xlu0 %888  ;;  %v2405_v39 = vunpack.c.l.b16 %v8373_v32 }
 0x230   :  { %5489 = vmatpush1.bf16.msra.mxu1 %v5488_v44  ;;  %v3884_v44 = vrot.slane %v3285_v63, %v6937_v51  ;;  %v2741_v51 = vsel %vm8982_vm5, %v2740_v10, %v2736_v55  ;;  %v2341_v3 = vunpack.c.l.b16 %v8375_v0  ;;  %v3062_v49 = vsel %vm8984_vm2, %v3061_v42, %v3057_v52 }
 0x231   :  { %5491 = vmatprep.subr.bf16.mxu1 %v5490_v20  ;;  %v3287_v20 = vunpack.c.h.b16 %v2218_v37  ;;  %v3573_v37 = vrot.slane %v3222_v46, %v6949_v62  ;;  %v2977_v47 = vrot.slane %v2405_v39, %v6949_v62  ;;  %v2746_v6 = vsel %vm8985_vm3, %v2745_v57, %v2741_v51 }
 0x232   :  { %v3885_v2 = vsel %vm8981_vm4, %v3884_v44, %v3880_v25  ;;  %vm8986_vm4 = vmmov %vm8982_vm5  ;;  %v2342_v60 = vunpack.c.h.b16 %v8375_v0  ;;  %v2661_v35 = vrot.slane %v2341_v3, %v6949_v62 }
 0x233   :  { %v3894_v56 = vrot.slane %v3287_v20, %v8938_v4  ;;  %v3890_v15 = vsel %vm8983_vm6, %v3889_v27, %v3885_v2  ;;  %vm8987_vm5 = vmmov %vm8984_vm2 }
 0x234   :  { %5493 = vmatpush1.bf16.msra.mxu1 %v5492_v18  ;;  %v3223_v18 = vunpack.c.h.b16 %v2026_v11  ;;  %v2406_v11 = vunpack.c.h.b16 %v8373_v32  ;;  %v3574_v32 = vsel %vm8986_vm4, %v3573_v37, %v3569_v45  ;;  %vm8988_vm6 = vmmov %vm8986_vm4  ;;  %v2666_v22 = vrot.slane %v2342_v60, %v8938_v4 }
 0x235   :  { %5495 = vmatprep.subr.bf16.mxu1 %v5494_v41  ;;  %v3895_v33 = vsel %vm8987_vm5, %v3894_v56, %v3890_v15  ;;  %v2978_v9 = vsel %vm8988_vm6, %v2977_v47, %v8256_v31  ;;  %vm8990_vm2 = vmmov %vm8989_vm1 }
 0x236   :  { %v8377_v26 = vpop.xlane.xlu1 %2169  ;;  %v3578_v59 = vrot.slane %v3223_v18, %v8938_v4  ;;  %v2982_v13 = vrot.slane %v2406_v11, %v8938_v4  ;;  %vm8991_vm3 = vmmov %vm8986_vm4 }
 0x237   :  { %v8379_v54 = vpop.xlane.xlu0 %1977  ;;  %v3270_v30 = vunpack.c.l.b16 %v8377_v26  ;;  %v3271_v21 = vunpack.c.h.b16 %v8377_v26  ;;  %v2662_v42 = vsel %vm8991_vm3, %v2661_v35, %v8264_v1  ;;  %vm8992_vm4 = vmmov %vm8991_vm3 }
 0x238   :  { %v3206_v53 = vunpack.c.l.b16 %v8379_v54  ;;  %v3579_v43 = vsel %vm8989_vm1, %v3578_v59, %v3574_v32  ;;  %v3207_v44 = vunpack.c.h.b16 %v8379_v54  ;;  %v2983_v39 = vsel %vm8990_vm2, %v2982_v13, %v2978_v9  ;;  %vm8993_vm5 = vmmov %vm8991_vm3 }
 0x239   :  { %v3810_v46 = vrot.slane %v3270_v30, %v6949_v62  ;;  %v3815_v18 = vrot.slane %v3271_v21, %v8938_v4  ;;  %vm8994_vm6 = vmmov %vm8989_vm1 }
 0x23a   :  { %v3494_v31 = vrot.slane %v3206_v53, %v6949_v62  ;;  %v3499_v19 = vrot.slane %v3207_v44, %v8938_v4  ;;  %v2667_v32 = vsel %vm8994_vm6, %v2666_v22, %v2662_v42  ;;  %vm8995_vm2 = vmmov %vm8989_vm1 }
 0x23c   :  { %v3495_v1 = vsel %vm8993_vm5, %v3494_v31, %v8290_v23 }
 0x23d   :  { %v8517_v13 = vsel %vm8995_vm2, %v3499_v19, %v3495_v1 }
 0x23e   :  { %v8383_v34 = vpop.xlane.xlu1 %1134 }
 0x23f   :  { %v8385_v58 = vpop.xlane.xlu0 %942  ;;  %v2423_v50 = vunpack.c.l.b16 %v8383_v34  ;;  %v2424_v25 = vunpack.c.h.b16 %v8383_v34 }
 0x240   :  { %v2359_v12 = vunpack.c.l.b16 %v8385_v58  ;;  %v2360_v26 = vunpack.c.h.b16 %v8385_v58  ;;  %v3811_v58 = vsel %vm8992_vm4, %v3810_v46, %v8282_v28 }
 0x241   :  { %v3066_v55 = vrot.slane %v2423_v50, %v8941_v16  ;;  %v8510_v60 = vsel %vm8989_vm1, %v3815_v18, %v3811_v58 }
 0x242   :  { %v2750_v54 = vrot.slane %v2359_v12, %v8941_v16  ;;  %v2755_v2 = vrot.slane %v2360_v26, %v8945_v24 }
 0x243   :  { %v3067_v28 = vsel %vm2503_vm11, %v3066_v55, %v3062_v49 }
 0x244   :  { %v2751_v4 = vsel %vm2503_vm11, %v2750_v54, %v2746_v6 }
 0x246   :  { %v8392_v14 = vpop.xlane.xlu1 %2223 }
 0x247   :  { %v8395_v5 = vpop.xlane.xlu0 %2031  ;;  %v3288_v0 = vunpack.c.l.b16 %v8392_v14  ;;  %v3289_v8 = vunpack.c.h.b16 %v8392_v14  ;;  %v3071_v14 = vrot.slane %v2424_v25, %v8945_v24 }
 0x248   :  { %v3224_v10 = vunpack.c.l.b16 %v8395_v5  ;;  %v3225_v34 = vunpack.c.h.b16 %v8395_v5 }
 0x249   :  { %v3899_v62 = vrot.slane %v3288_v0, %v8941_v16  ;;  %v3904_v56 = vrot.slane %v3289_v8, %v8945_v24 }
 0x24a   :  { %v3583_v52 = vrot.slane %v3224_v10, %v8941_v16  ;;  %v3588_v23 = vrot.slane %v3225_v34, %v8945_v24 }
 0x24b   :  { %v3900_v15 = vsel %vm2503_vm11, %v3899_v62, %v3895_v33 }
 0x24c   :  { %v3584_v45 = vsel %vm2503_vm11, %v3583_v52, %v3579_v43  ;;  %v3905_v12 = vsel %vm2510_vm12, %v3904_v56, %v3900_v15 }
 0x24d   :  { %v3589_v9 = vsel %vm2510_vm12, %v3588_v23, %v3584_v45 }
 0x24e   :  { %v8406_v40 = vpop.xlane.xlu1 %1086 }
 0x24f   :  { %v8410_v7 = vpop.xlane.xlu0 %894  ;;  %v2407_v57 = vunpack.c.l.b16 %v8406_v40  ;;  %v2408_v47 = vunpack.c.h.b16 %v8406_v40 }
 0x250   :  { %v2343_v3 = vunpack.c.l.b16 %v8410_v7  ;;  %v2344_v49 = vunpack.c.h.b16 %v8410_v7  ;;  %v3072_v7 = vsel %vm2510_vm12, %v3071_v14, %v3067_v28 }
 0x251   :  { %v2987_v59 = vrot.slane %v2407_v57, %v8941_v16  ;;  %v2992_v35 = vrot.slane %v2408_v47, %v8945_v24 }
 0x252   :  { %v2671_v21 = vrot.slane %v2343_v3, %v8941_v16  ;;  %v2676_v0 = vrot.slane %v2344_v49, %v8945_v24 }
 0x256   :  { %v8422_v41 = vpop.xlane.xlu1 %2175 }
 0x257   :  { %v8429_v61 = vpop.xlane.xlu0 %1983  ;;  %v3272_v1 = vunpack.c.l.b16 %v8422_v41 }
 0x258   :  { %v3208_v15 = vunpack.c.l.b16 %v8429_v61 }
 0x25e   :  { %v8442_v63 = vpop.xlane.xlu1 %1140 }
 0x25f   :  { %v8448_v17 = vpop.xlane.xlu0 %948  ;;  %v2425_v5 = vunpack.c.l.b16 %v8442_v63  ;;  %v2426_v30 = vunpack.c.h.b16 %v8442_v63  ;;  %v2756_v63 = vsel %vm2510_vm12, %v2755_v2, %v2751_v4 }
 0x260   :  { %v2361_v11 = vunpack.c.l.b16 %v8448_v17  ;;  %v2362_v40 = vunpack.c.h.b16 %v8448_v17  ;;  %v2988_v17 = vsel %vm2503_vm11, %v2987_v59, %v2983_v39 }
 0x261   :  { %v3076_v53 = vrot.slane %v2425_v5, %v8946_v36  ;;  %v3081_v43 = vrot.slane %v2426_v30, %v8950_v48  ;;  %v2993_v42 = vsel %vm2510_vm12, %v2992_v35, %v2988_v17  ;;  %v2672_v5 = vsel %vm2503_vm11, %v2671_v21, %v2667_v32 }
 0x262   :  { %v2760_v50 = vrot.slane %v2361_v11, %v8946_v36  ;;  %v2765_v22 = vrot.slane %v2362_v40, %v8950_v48  ;;  %v3273_v11 = vunpack.c.h.b16 %v8422_v41  ;;  %v3820_v30 = vrot.slane %v3272_v1, %v8941_v16 }
 0x263   :  { %v3077_v10 = vsel %vm2517_vm13, %v3076_v53, %v3072_v7 }
 0x264   :  { %v2761_v55 = vsel %vm2517_vm13, %v2760_v50, %v2756_v63  ;;  %v3082_v58 = vsel %vm2524_vm14, %v3081_v43, %v3077_v10  ;;  %v2677_v10 = vsel %vm2510_vm12, %v2676_v0, %v2672_v5 }
 0x265   :  { %v2766_v14 = vsel %vm2524_vm14, %v2765_v22, %v2761_v55  ;;  %v3825_v22 = vrot.slane %v3273_v11, %v8945_v24 }
 0x266   :  { %v8463_v20 = vpop.xlane.xlu1 %2229 }
 0x267   :  { %v8469_v27 = vpop.xlane.xlu0 %2037  ;;  %v3290_v46 = vunpack.c.l.b16 %v8463_v20  ;;  %v3291_v18 = vunpack.c.h.b16 %v8463_v20 }
 0x268   :  { %v3226_v54 = vunpack.c.l.b16 %v8469_v27  ;;  %v3227_v2 = vunpack.c.h.b16 %v8469_v27  ;;  %v3209_v27 = vunpack.c.h.b16 %v8429_v61 }
 0x269   :  { %v3909_v19 = vrot.slane %v3290_v46, %v8946_v36  ;;  %v3914_v23 = vrot.slane %v3291_v18, %v8950_v48 }
 0x26a   :  { %v3593_v28 = vrot.slane %v3226_v54, %v8946_v36  ;;  %v3598_v32 = vrot.slane %v3227_v2, %v8950_v48  ;;  %v3821_v54 = vsel %vm2503_vm11, %v3820_v30, %v8510_v60 }
 0x26b   :  { %v3910_v3 = vsel %vm2517_vm13, %v3909_v19, %v3905_v12  ;;  %v3826_v30 = vsel %vm2510_vm12, %v3825_v22, %v3821_v54  ;;  %v4463_v54 = vld [vmem:[%s8863_s4 + $0xe8] sm:$0xff] }
 0x26c   :  { %v3594_v7 = vsel %vm2517_vm13, %v3593_v28, %v3589_v9  ;;  %v3915_v12 = vsel %vm2524_vm14, %v3914_v23, %v3910_v3 }
 0x26e   :  { %v8485_v37 = vpop.xlane.xlu1 %1092 }
 0x26f   :  { %v8492_v51 = vpop.xlane.xlu0 %900  ;;  %v2409_v45 = vunpack.c.l.b16 %v8485_v37  ;;  %v2410_v35 = vunpack.c.h.b16 %v8485_v37 }
 0x270   :  { %v2345_v63 = vunpack.c.l.b16 %v8492_v51  ;;  %v2346_v46 = vunpack.c.h.b16 %v8492_v51 }
 0x271   :  { %v2997_v43 = vrot.slane %v2409_v45, %v8946_v36  ;;  %v3002_v0 = vrot.slane %v2410_v35, %v8950_v48 }
 0x273   :  { %v2998_v18 = vsel %vm2517_vm13, %v2997_v43, %v2993_v42 }
 0x276   :  { %v8506_v6 = vpop.xlane.xlu1 %2181 }
 0x277   :  { %v8514_v33 = vpop.xlane.xlu0 %1989  ;;  %v3275_v11 = vunpack.c.h.b16 %v8506_v6 }
 0x27e   :  { %v1147_v44 = vpop.xlane.xlu1 %1146 }
 0x27f   :  { %v2427_v31 = vunpack.c.l.b16 %v1147_v44  ;;  %v2428_v25 = vunpack.c.h.b16 %v1147_v44  ;;  %v955_v26 = vpop.xlane.xlu0 %954 }
 0x280   :  { %v2363_v8 = vunpack.c.l.b16 %v955_v26  ;;  %v2364_v39 = vunpack.c.h.b16 %v955_v26  ;;  %v2681_v26 = vrot.slane %v2345_v63, %v8946_v36 }
 0x281   :  { %v3086_v62 = vrot.slane %v2427_v31, %v7444_v29  ;;  %v3091_v34 = vrot.slane %v2428_v25, %v7489_v38  ;;  %v3599_v31 = vsel %vm2524_vm14, %v3598_v32, %v3594_v7  ;;  %v3504_v25 = vrot.slane %v3208_v15, %v8941_v16 }
 0x282   :  { %v2770_v52 = vrot.slane %v2363_v8, %v7444_v29  ;;  %v2775_v57 = vrot.slane %v2364_v39, %v7489_v38  ;;  %v3509_v8 = vrot.slane %v3209_v27, %v8945_v24  ;;  %v3274_v16 = vunpack.c.l.b16 %v8506_v6 }
 0x283   :  { %v3087_v20 = vsel %vm2531_vm15, %v3086_v62, %v3082_v58  ;;  %v2686_v62 = vrot.slane %v2346_v46, %v8950_v48  ;;  %v2682_v24 = vsel %vm2517_vm13, %v2681_v26, %v2677_v10  ;;  %v3505_v42 = vsel %vm2503_vm11, %v3504_v25, %v8517_v13 }
 0x284   :  { %v3092_v4 = vsel %vm2538_vm10, %v3091_v34, %v3087_v20  ;;  %v2771_v56 = vsel %vm2531_vm15, %v2770_v52, %v2766_v14  ;;  %v3210_v14 = vunpack.c.l.b16 %v8514_v33  ;;  %v3830_v27 = vrot.slane %v3274_v16, %v8946_v36 }
 0x285   :  { %v2776_v47 = vsel %vm2538_vm10, %v2775_v57, %v2771_v56  ;;  %v3003_v56 = vsel %vm2524_vm14, %v3002_v0, %v2998_v18  ;;  %v3211_v13 = vunpack.c.h.b16 %v8514_v33  ;;  %v3510_v32 = vsel %vm2510_vm12, %v3509_v8, %v3505_v42  ;;  %v4465_v8 = vld [vmem:[%s8863_s4 + $0xf8] sm:$0xff]  ;;  %v4464_v18 = vld [vmem:[%s8863_s4 + $0xf0] sm:$0xff] }
 0x286   :  { %v2236_v59 = vpop.xlane.xlu1 %2235  ;;  %v3097_v49 = vsel %vm3093_vm9, %v3092_v4, %v2776_v47  ;;  %v2687_v47 = vsel %vm2524_vm14, %v2686_v62, %v2682_v24  ;;  %v3514_v45 = vrot.slane %v3210_v14, %v8946_v36  ;;  %v3831_v33 = vsel %vm2517_vm13, %v3830_v27, %v3826_v30  ;;  %v4629_v27 = vld [vmem:[%s8867_s8 + $0x18] sm:$0xff] }
 0x287   :  { %v3292_v41 = vunpack.c.l.b16 %v2236_v59  ;;  %v3293_v53 = vunpack.c.h.b16 %v2236_v59  ;;  %v2044_v40 = vpop.xlane.xlu0 %2043  ;;  %v3101_v1 = vpack.c.b16 %v3097_v49, %v3097_v49  ;;  %v3519_v7 = vrot.slane %v3211_v13, %v8950_v48 }
 0x288   :  { %v3228_v50 = vunpack.c.l.b16 %v2044_v40  ;;  %v3229_v61 = vunpack.c.h.b16 %v2044_v40  ;;  %v5498_v0 = vpack.c.bf16 %v4465_v8, %v4463_v54  ;;  %v6140_v16 = vmov 0.0  }
 0x289   :  { %v3919_v21 = vrot.slane %v3292_v41, %v7444_v29  ;;  %v3924_v17 = vrot.slane %v3293_v53, %v7489_v38  ;;  %v3835_v41 = vrot.slane %v3275_v11, %v8950_v48  ;;  %4542 = vmatprep.mubr.f32.mxu1 %v6140_v16  ;;  %v4627_v11 = vld [vmem:[%s8867_s8 + $0x8] sm:$0xff]  ;;  %vm4825_vm11 = vcmask 392192  }
 0x28a   :  { %v3603_v44 = vrot.slane %v3228_v50, %v7444_v29  ;;  %v3608_v9 = vrot.slane %v3229_v61, %v7489_v38  ;;  %v3515_v61 = vsel %vm2517_vm13, %v3514_v45, %v3510_v32  ;;  %v4631_v45 = vld [vmem:[%s8867_s8 + $0x28] sm:$0xff]  ;;  %v4634_v32 = vld [vmem:[%s8867_s8 + $0x40] sm:$0xff] }
 0x28b   :  { %v3920_v37 = vsel %vm2531_vm15, %v3919_v21, %v3915_v12  ;;  %v3836_v43 = vsel %vm2524_vm14, %v3835_v41, %v3831_v33  ;;  %v4635_v41 = vld [vmem:[%s8867_s8 + $0x48] sm:$0xff]  ;;  %v4637_v33 = vld [vmem:[%s8867_s8 + $0x58] sm:$0xff] }
 0x28c   :  { %v3925_v55 = vsel %vm2538_vm10, %v3924_v17, %v3920_v37  ;;  %v3604_v51 = vsel %vm2531_vm15, %v3603_v44, %v3599_v31 }
 0x28d   :  { %v3609_v39 = vsel %vm2538_vm10, %v3608_v9, %v3604_v51  ;;  %v3520_v9 = vsel %vm2524_vm14, %v3519_v7, %v3515_v61  ;;  %v4640_v61 = vld [vmem:[%s8867_s8 + $0x70] sm:$0xff] }
 0x28e   :  { %v1099_v34 = vpop.xlane.xlu1 %1098  ;;  %v3930_v58 = vsel %vm3926_vm8, %v3925_v55, %v3609_v39  ;;  %v4462_v39 = vld [vmem:[%s8863_s4 + $0xe0] sm:$0xff] }
 0x28f   :  { %v2411_v19 = vunpack.c.l.b16 %v1099_v34  ;;  %v2412_v52 = vunpack.c.h.b16 %v1099_v34  ;;  %v907_v57 = vpop.xlane.xlu0 %906  ;;  %v3934_v60 = vpack.c.b16 %v3930_v58, %v3930_v58  ;;  %v5500_v62 = vpack.c.bf16 %v4464_v18, %v4462_v39  ;;  %v8996_v34 = vld [vmem:[#allocation10_spill] sm:$0xff] }
 0x290   :  { %v2347_v2 = vunpack.c.l.b16 %v907_v57  ;;  %v2348_v20 = vunpack.c.h.b16 %v907_v57  ;;  %v8645_v58 = vsub.s32 0, %v8996_v34 }
 0x291   :  { %v3007_v5 = vrot.slane %v2411_v19, %v7444_v29  ;;  %v3012_v28 = vrot.slane %v2412_v52, %v7489_v38  ;;  %v3950_v4 = vsel %vm3935_vm7, %v3101_v1, %v3934_v60  ;;  %v4016_v19 = vld [vmem:[%s8862_s3] sm:$0x3]  ;;  %v8651_v52 = vsub.s32 1, %v8996_v34 }
 0x292   :  { %v2691_v15 = vrot.slane %v2347_v2, %v7444_v29  ;;  %v2696_v23 = vrot.slane %v2348_v20, %v7489_v38  ;;  %4421 = vmatprep.mubr.bf16.mxu0 %v3950_v4  ;;  %v4021_v57 = vrot.slane %v4016_v19, %v8645_v58 }
 0x293   :  { %v3008_v3 = vsel %vm2531_vm15, %v3007_v5, %v3003_v56  ;;  %v4025_v1 = vrot.slane %v4016_v19, %v8651_v52  ;;  %v4626_v56 = vld [vmem:[%s8867_s8] sm:$0xff] }
 0x294   :  { %v3013_v59 = vsel %vm2538_vm10, %v3012_v28, %v3008_v3  ;;  %v2692_v49 = vsel %vm2531_vm15, %v2691_v15, %v2687_v47  ;;  %v5503_v15 = vpack.c.bf16 %v4627_v11, %v4626_v56  ;;  %v4628_v47 = vld [vmem:[%s8867_s8 + $0x10] sm:$0xff]  ;;  %v4630_v3 = vld [vmem:[%s8867_s8 + $0x20] sm:$0xff] }
 0x295   :  { %v2697_v6 = vsel %vm2538_vm10, %v2696_v23, %v2692_v49  ;;  %v6141_v23 = vmov 0.0|0.0   ;;  %v5506_v13 = vpack.c.bf16 %v4629_v27, %v4628_v47  ;;  %v4632_v49 = vld [vmem:[%s8867_s8 + $0x30] sm:$0xff] }
 0x296   :  { %v2188_v53 = vpop.xlane.xlu1 %2187  ;;  %v3096_v40 = vsel %vm3093_vm9, %v3013_v59, %v2697_v6  ;;  %v5509_v59 = vpack.c.bf16 %v4631_v45, %v4630_v3  ;;  %v4633_v6 = vld [vmem:[%s8867_s8 + $0x38] sm:$0xff]  ;;  %vm4821_vm9 = vcmask 130048  }
 0x297   :  { %v3276_v36 = vunpack.c.l.b16 %v2188_v53  ;;  %v3277_v63 = vunpack.c.h.b16 %v2188_v53  ;;  %v1996_v50 = vpop.xlane.xlu0 %1995  ;;  %v3100_v25 = vpack.c.b16 %v3096_v40, %v3096_v40  ;;  %v5512_v30 = vpack.c.bf16 %v4633_v6, %v4632_v49  ;;  %v4636_v40 = vld [vmem:[%s8867_s8 + $0x50] sm:$0xff]  ;;  %v4595_v6 = vld [vmem:[%s8865_s6] sm:$0x3] }
 0x298   :  { %v3212_v12 = vunpack.c.l.b16 %v1996_v50  ;;  %v3213_v35 = vunpack.c.h.b16 %v1996_v50  ;;  %v5515_v53 = vpack.c.bf16 %v4635_v41, %v4634_v32  ;;  %v5518_v7 = vpack.c.bf16 %v4637_v33, %v4636_v40 }
 0x299   :  { %v3840_v21 = vrot.slane %v3276_v36, %v7444_v29  ;;  %v3845_v17 = vrot.slane %v3277_v63, %v7489_v38  ;;  %v4638_v36 = vld [vmem:[%s8867_s8 + $0x60] sm:$0xff]  ;;  %v4639_v63 = vld [vmem:[%s8867_s8 + $0x68] sm:$0xff]  ;;  %v4600_v32 = vrot.slane %v4595_v6, %v8645_v58  ;;  %v4604_v33 = vrot.slane %v4595_v6, %v8651_v52 }
 0x29a   :  { %v3524_v46 = vrot.slane %v3212_v12, %v7444_v29  ;;  %v3529_v44 = vrot.slane %v3213_v35, %v7489_v38  ;;  %v4458_v29 = vld [vmem:[%s8863_s4 + $0xc0] sm:$0xff]  ;;  %v4460_v38 = vld [vmem:[%s8863_s4 + $0xd0] sm:$0xff]  ;;  %v5521_v50 = vpack.c.bf16 %v4639_v63, %v4638_v36  ;;  %v4641_v12 = vld [vmem:[%s8867_s8 + $0x78] sm:$0xff]  ;;  %s6149_s8 = smov 16  }
 0x29b   :  { %v3841_v48 = vsel %vm2531_vm15, %v3840_v21, %v3836_v43  ;;  %v5496_v51 = vpack.c.bf16 %v4460_v38, %v4458_v29  ;;  %v5524_v35 = vpack.c.bf16 %v4641_v12, %v4640_v61  ;;  %v4466_v21 = vld [vmem:[%s8864_s5] sm:$0x3]  ;;  %s6147_s5 = smov 112  }
 0x29c   :  { %v3846_v10 = vsel %vm2538_vm10, %v3845_v17, %v3841_v48  ;;  %v3525_v22 = vsel %vm2531_vm15, %v3524_v46, %v3520_v9  ;;  %v4471_v17 = vrot.slane %v4466_v21, %v8645_v58  ;;  %v4475_v43 = vrot.slane %v4466_v21, %v8651_v52  ;;  %v4713_v21 = vld [vmem:[%s8868_s9 + $0x8] sm:$0xff] }
 0x29d   :  { %v3530_v31 = vsel %vm2538_vm10, %v3529_v44, %v3525_v22  ;;  %5497 = vmatpush1.bf16.msra.mxu1 %v5496_v51  ;;  %vm4823_vm10 = vcmask 261120  }
 0x29e   :  { %v3929_v37 = vsel %vm3926_vm8, %v3846_v10, %v3530_v31  ;;  %5499 = vmatprep.subr.bf16.mxu1 %v5498_v0  ;;  %vm6142_vm8 = vmmov 0  }
 0x29f   :  { %v3933_v26 = vpack.c.b16 %v3929_v37, %v3929_v37 }
 0x2a1   :  { %v3946_v55 = vsel %vm3935_vm7, %v3100_v25, %v3933_v26  ;;  %5501 = vmatpush1.bf16.msra.mxu1 %v5500_v62  ;;  %vm4432_vm7 = vcmask 1041408  }
 0x2a2   :  { %4422 = vmatmul.mubr.bf16.vlgmr.msra.gmra.mrb[0].mxu0 %v3946_v55  ;;  %5502 = vmatprep.subr.bf16.mxu1 %v6141_v23 }
 0x375   :  { %v4423_v60 = vpop.f32.mrb[0].mxu0 }
 0x376   :  { %v5550_v24 = vadd.f32 %v4423_v60, %v4021_v57  ;;  %v4425_v14 = vpop.f32.mrb[1].mxu0 }
 0x377   :  { %v5551_v2 = vadd.f32 %v4425_v14, %v4025_v1  ;;  %v4427_v20 = vpop.f32.mrb[2].mxu0 }
 0x378   :  { %v4430_v42 = vmax.f32 %v5550_v24, 0.0  ;;  %v4428_v5 = vpop.f32.mrb[3].mxu0 }
 0x379   :  { %v4431_v28 = vmax.f32 %v5551_v2, 0.0 }
 0x37b   :  { %v4433_v4 = vsel %vm4432_vm7, %v4430_v42, %v4431_v28 }
 0x37c   :  { %4543 = vmatmul.mubr.f32.vlgmr.msra.gmra.mrb[0].mxu1 %v4433_v4 }
 0x37d   :  { %5504 = vmatpush3.bf16.msra.mxu1 %v5503_v15  ;;  %5429 = vmatprep.mubr.msk.f32.mxu1 %vm6142_vm8, %v6140_v16 }
 0x37e   :  { %5505 = vmatprep.subr.bf16.mxu1 %v6141_v23 }
 0x381   :  { %5507 = vmatpush3.bf16.msra.mxu1 %v5506_v13 }
 0x382   :  { %5508 = vmatprep.subr.bf16.mxu1 %v6141_v23 }
 0x385   :  { %5510 = vmatpush3.bf16.msra.mxu1 %v5509_v59 }
 0x386   :  { %5511 = vmatprep.subr.bf16.mxu1 %v6141_v23 }
 0x389   :  { %5513 = vmatpush3.bf16.msra.mxu1 %v5512_v30  ;;  %v4609_v30 = vld [vmem:[%s8866_s7] sm:$0x3] }
 0x38a   :  { %5514 = vmatprep.subr.bf16.mxu1 %v6141_v23  ;;  %v4614_v40 = vrot.slane %v4609_v30, %v8645_v58 }
 0x38d   :  { %5516 = vmatpush3.bf16.msra.mxu1 %v5515_v53 }
 0x38e   :  { %5517 = vmatprep.subr.bf16.mxu1 %v6141_v23 }
 0x391   :  { %5519 = vmatpush3.bf16.msra.mxu1 %v5518_v7 }
 0x392   :  { %5520 = vmatprep.subr.bf16.mxu1 %v6141_v23 }
 0x395   :  { %5522 = vmatpush3.bf16.msra.mxu1 %v5521_v50  ;;  %v4618_v50 = vrot.slane %v4609_v30, %v8651_v52  ;;  %v4715_v52 = vld [vmem:[%s8868_s9 + $0x18] sm:$0xff] }
 0x396   :  { %5523 = vmatprep.subr.bf16.mxu1 %v6141_v23 }
 0x399   :  { %5525 = vmatpush3.bf16.msra.mxu1 %v5524_v35  ;;  %v4712_v35 = vld [vmem:[%s8868_s9] sm:$0xff] }
 0x39a   :  { %5526 = vmatprep.subr.bf16.mxu1 %v6141_v23  ;;  %v5527_v58 = vpack.c.bf16 %v4713_v21, %v4712_v35 }
 0x44f   :  { %v4544_v46 = vpop.f32.mrb[0].mxu1 }
 0x450   :  { %v4545_v44 = vadd.f32 %v4544_v46, %v4471_v17  ;;  %v4546_v9 = vpop.f32.mrb[1].mxu1  ;;  %v4714_v46 = vld [vmem:[%s8868_s9 + $0x10] sm:$0xff] }
 0x451   :  { %v4547_v48 = vadd.f32 %v4546_v9, %v4475_v43  ;;  %v4716_v9 = vld [vmem:[%s8868_s9 + $0x20] sm:$0xff] }
 0x452   :  { %v4552_v10 = vsel %vm4432_vm7, %v4545_v44, 0.0 }
 0x453   :  { %v4553_v22 = vrot.slane %v4552_v10, 4  ;;  %v4550_v31 = vrot.slane %v4547_v48, 2  ;;  %v4717_v48 = vld [vmem:[%s8868_s9 + $0x28] sm:$0xff] }
 0x455   :  { %v4554_v37 = vadd.f32 %v4553_v22, %v4552_v10  ;;  %v4559_v25 = vsel %vm4432_vm7, %v4550_v31, 0.0  ;;  %v5533_v10 = vpack.c.bf16 %v4717_v48, %v4716_v9  ;;  %v4718_v22 = vld [vmem:[%s8868_s9 + $0x30] sm:$0xff] }
 0x456   :  { %v4560_v26 = vrot.slane %v4559_v25, 4 }
 0x457   :  { %v4555_v55 = vrot.slane %v4554_v37, 2 }
 0x458   :  { %v4561_v29 = vadd.f32 %v4560_v26, %v4559_v25  ;;  %v5355_v25 = vld [vmem:[#allocation2] ss:$0 sm:$0xff]  ;;  %v6143_v26 = vmov 0  }
 0x459   :  { %v4556_v38 = vadd.f32 %v4555_v55, %v4554_v37  ;;  %5572 = vset.pattern.permute.xlu0 %v6143_v26  ;;  %5573 = vset.pattern.permute.xlu1 %v6143_v26 }
 0x45a   :  { %v4562_v51 = vrot.slane %v4561_v29, 2  ;;  %4727 = vperm.xlu0 %5572, %v5355_v25  }
 0x45b   :  { %v4557_v54 = vrot.slane %v4556_v38, 1 }
 0x45c   :  { %v4563_v8 = vadd.f32 %v4562_v51, %v4561_v29 }
 0x45d   :  { %v4558_v0 = vadd.f32 %v4557_v54, %v4556_v38  ;;  %v6144_v38 = vmov 3  }
 0x45e   :  { %v4564_v39 = vrot.slane %v4563_v8, 1  ;;  %5577 = vset.pattern.permute.xlu0 %v6144_v38 }
 0x45f   :  { %v4567_v18 = vmul.f32 0.5, %v4558_v0 }
 0x460   :  { %v4565_v62 = vadd.f32 %v4564_v39, %v4563_v8 }
 0x461   :  { %v4569_v34 = vsub.f32 %v4545_v44, %v4567_v18  ;;  %v5530_v44 = vpack.c.bf16 %v4715_v52, %v4714_v46  ;;  %v6145_v18 = vmov 1   ;;  %v4910_v52 = vld [vmem:[%s8872_s13 + $0x30] sm:$0xff] }
 0x462   :  { %v4568_v19 = vmul.f32 0.5, %v4565_v62  ;;  %v6146_v62 = vmov 2  }
 0x463   :  { %v4571_v57 = vmul.f32 %v4569_v34, %v4569_v34 }
 0x464   :  { %v4570_v1 = vsub.f32 %v4550_v31, %v4568_v19  ;;  %v4719_v31 = vld [vmem:[%s8868_s9 + $0x38] sm:$0xff] }
 0x465   :  { %v4573_v60 = vsel %vm4432_vm7, %v4571_v57, 0.0  ;;  %v5536_v37 = vpack.c.bf16 %v4719_v31, %v4718_v22 }
 0x466   :  { %v4574_v24 = vrot.slane %v4573_v60, 4  ;;  %v4572_v14 = vmul.f32 %v4570_v1, %v4570_v1 }
 0x468   :  { %v4575_v2 = vadd.f32 %v4574_v24, %v4573_v60  ;;  %v4580_v20 = vsel %vm4432_vm7, %v4572_v14, 0.0  ;;  %v5358_v14 = vld [vmem:[%s8871_s12] ss:$0 sm:$0xff]  ;;  %s6150_s12 = smov 32  }
 0x469   :  { %v4581_v42 = vrot.slane %v4580_v20, 4 }
 0x46a   :  { %v4576_v5 = vrot.slane %v4575_v2, 2 }
 0x46b   :  { %v4582_v28 = vadd.f32 %v4581_v42, %v4580_v20 }
 0x46c   :  { %v4577_v4 = vadd.f32 %v4576_v5, %v4575_v2 }
 0x46d   :  { %v4583_v56 = vrot.slane %v4582_v28, 2 }
 0x46e   :  { %v4578_v11 = vrot.slane %v4577_v4, 1 }
 0x46f   :  { %v4584_v15 = vadd.f32 %v4583_v56, %v4582_v28 }
 0x470   :  { %v4579_v47 = vadd.f32 %v4578_v11, %v4577_v4 }
 0x471   :  { %v4585_v27 = vrot.slane %v4584_v15, 1 }
 0x472   :  { %v4587_v13 = vmul.f32 0.5, %v4579_v47 }
 0x473   :  { %v4586_v3 = vadd.f32 %v4585_v27, %v4584_v15 }
 0x474   :  { %v4589_v45 = vadd.f32 1e-05, %v4587_v13 }
 0x475   :  { %v4588_v59 = vmul.f32 0.5, %v4586_v3 }
 0x476   :  { %6058 = vrsqrt.f32 %v4589_v45 }
 0x477   :  { %v4590_v49 = vadd.f32 1e-05, %v4588_v59 }
 0x479   :  { %6060 = vrsqrt.f32 %v4590_v49 }
 0x480   :  { %v6059_v41 = vpop.eup %6058 }
 0x481   :  { %v4593_v53 = vmul.f32 %v6059_v41, %v4569_v34 }
 0x483   :  { %v6061_v7 = vpop.eup %6060  ;;  %v4607_v36 = vmul.f32 %v4600_v32, %v4593_v53  ;;  %v4904_v53 = vld [vmem:[%s8872_s13] sm:$0xff] }
 0x484   :  { %v4594_v63 = vmul.f32 %v6061_v7, %v4570_v1  ;;  %v5357_v1 = vld [vmem:[%s8870_s11] ss:$0 sm:$0xff]  ;;  %s6148_s11 = smov 96  }
 0x485   :  { %v4621_v61 = vadd.f32 %v4614_v40, %v4607_v36  ;;  %v4905_v40 = vld [vmem:[%s8872_s13 + $0x8] sm:$0xff]  ;;  %v4907_v36 = vld [vmem:[%s8872_s13 + $0x18] sm:$0xff] }
 0x486   :  { %v4608_v12 = vmul.f32 %v4604_v33, %v4594_v63  ;;  %v4906_v33 = vld [vmem:[%s8872_s13 + $0x10] sm:$0xff]  ;;  %v5539_v7 = vpack.c.bf16 %v4905_v40, %v4904_v53 }
 0x487   :  { %4623 = vst [vmem:[#allocation5] sm:$0x3] %v4621_v61  ;;  %v5542_v63 = vpack.c.bf16 %v4907_v36, %v4906_v33 }
 0x488   :  { %v4622_v17 = vadd.f32 %v4618_v50, %v4608_v12 }
 0x48a   :  { %4624 = vst [vmem:[#allocation7] sm:$0x3] %v4622_v17  ;;  %v4625_v43 = vadd.f32 %v4622_v17, %v4621_v61  ;;  %v4908_v17 = vld [vmem:[%s8872_s13 + $0x20] sm:$0xff] }
 0x48c   :  { %5430 = vmatmul.mubr.f32.vlgmr.msra.gmra.mrb[2].mxu1 %v4625_v43 }
 0x48d   :  { %5528 = vmatpush3.bf16.msra.mxu1 %v5527_v58  ;;  %5448 = vmatprep.mubr.msk.f32.mxu1 %vm6142_vm8, %v6140_v16  ;;  %v4909_v58 = vld [vmem:[%s8872_s13 + $0x28] sm:$0xff] }
 0x48e   :  { %5529 = vmatprep.subr.bf16.mxu1 %v6141_v23  ;;  %v5545_v46 = vpack.c.bf16 %v4909_v58, %v4908_v17 }
 0x491   :  { %5531 = vmatpush3.bf16.msra.mxu1 %v5530_v44  ;;  %v4911_v44 = vld [vmem:[%s8872_s13 + $0x38] sm:$0xff]  ;;  %s6153_s13 = smov [#allocation5]  }
 0x492   :  { %5532 = vmatprep.subr.bf16.mxu1 %v6141_v23  ;;  %v5548_v9 = vpack.c.bf16 %v4911_v44, %v4910_v52  ;;  %s5010_s9 = sshll.u32 %s6153_s13, 4  ;;  %s5011_s9 = int_to_ptr.vmem [resolvable:$true] %s5010_s9 }
 0x493   :  { %s6070_s2 = scalar_lea.vmem %s5011_s9, 32  ;;  %p6075_p1 = scmp.lt.s32.totalorder %s5011_s9, %s5011_s9 }
 0x494   :  { %p6071_p0 = scmp.ne.s32.totalorder %s5011_s9, %s6070_s2  ;;  %p6076_p2 = scmp.lt.s32.totalorder %s6070_s2, %s6070_s2 }
 0x495   :  { %5534 = vmatpush3.bf16.msra.mxu1 %v5533_v10 }
 0x496   :  { %5535 = vmatprep.subr.bf16.mxu1 %v6141_v23  ;;  %p6077_p3 = por %p6076_p2, %p6075_p1 }
 0x498   :  { %p6078_p4 = pnand %p6077_p3, %p6071_p0 }
 0x499   :  { %5537 = vmatpush3.bf16.msra.mxu1 %v5536_v37 }
 0x49a   :  { %5538 = vmatprep.subr.bf16.mxu1 %v6141_v23 }
 0x4d9   :  { %v4728_v51 = vpop.permute.xlu0 %4727 }
 0x55f   :  { %v8764_v55 = vpop.f32.mrb[2].mxu1 }
 0x560   :  { %v5431_v29 = vpop.f32.mrb[3].mxu1  ;;  %5449 = vmatmul.mubr.msk.f32.vlgmr.msra.gmra.mrb[4].mxu1 %vm1852_vm0, %v8764_v55 }
 0x561   :  { %5467 = vmatprep.mubr.msk.f32.mxu1 %vm6142_vm8, %v6140_v16  ;;  %5540 = vmatpush3.bf16.msra.mxu1 %v5539_v7 }
 0x562   :  { %5541 = vmatprep.subr.bf16.mxu1 %v6141_v23 }
 0x565   :  { %5543 = vmatpush3.bf16.msra.mxu1 %v5542_v63 }
 0x566   :  { %5544 = vmatprep.subr.bf16.mxu1 %v6141_v23 }
 0x569   :  { %5546 = vmatpush3.bf16.msra.mxu1 %v5545_v46 }
 0x56a   :  { %5547 = vmatprep.subr.bf16.mxu1 %v6141_v23 }
 0x56d   :  { %5549 = vmatpush3.bf16.msra.mxu1 %v5548_v9 }
 0x633   :  { %v4799_v54 = vpop.f32.mrb[4].mxu1 }
 0x634   :  { %v4800_v8 = vadd.f32 %v4799_v54, %v4728_v51  ;;  %v5450_v0 = vpop.f32.mrb[5].mxu1 }
 0x636   :  { %v4803_v39 = vmax.f32 %v4800_v8, 0.0 }
 0x638   :  { %4806 = vperm.xlu1 %5573, %v4803_v39  }
 0x63c   :  { %5574 = vset.pattern.permute.xlu1 %v6145_v18 }
 0x63d   :  { %4810 = vperm.xlu1 %5574, %v4803_v39  }
 0x641   :  { %5575 = vset.pattern.permute.xlu1 %v6146_v62 }
 0x642   :  { %4814 = vperm.xlu1 %5575, %v4803_v39  }
 0x646   :  { %5576 = vset.pattern.permute.xlu1 %v6144_v38 }
 0x647   :  { %4818 = vperm.xlu1 %5576, %v4803_v39  }
 0x6b7   :  { %v4807_v34 = vpop.permute.xlu1 %4806 }
 0x6bc   :  { %v4811_v19 = vpop.permute.xlu1 %4810 }
 0x6bd   :  { %v4822_v16 = vsel %vm4821_vm9, %v4807_v34, %v4811_v19 }
 0x6c1   :  { %v4815_v57 = vpop.permute.xlu1 %4814 }
 0x6c2   :  { %v4824_v60 = vsel %vm4823_vm10, %v4822_v16, %v4815_v57 }
 0x6c6   :  { %v4819_v24 = vpop.permute.xlu1 %4818 }
 0x6c7   :  { %v4826_v2 = vsel %vm4825_vm11, %v4824_v60, %v4819_v24 }
 0x6c8   :  { %v4834_v20 = vmul.f32 %v5357_v1, %v4826_v2 }
 0x6ca   :  { %v4842_v42 = vadd.f32 %v5358_v14, %v4834_v20 }
 0x6cc   :  { %v5359_v5 = vmul.f32 -1.442695, %v4842_v42 }
 0x6ce   :  { %6062 = vpow2.f32 %v5359_v5 }
 0x6d8   :  { %v6063_v28 = vpop.eup %6062 }
 0x6d9   :  { %v4846_v4 = vadd.f32 1.0, %v6063_v28 }
 0x6db   :  { %6064 = vrcp.f32 %v4846_v4 }
 0x6e5   :  { %v6065_v56 = vpop.eup %6064 }
 0x6e6   :  { %4850 = vrot.lane.b32.xlu1 %v6065_v56, %s6147_s5 }
 0x758   :  { %v4851_v11 = vpop.permute.xlu1 %4850 }
 0x759   :  { %v4853_v15 = vmax.f32 %v6065_v56, %v4851_v11 }
 0x75b   :  { %4855 = vrot.lane.b32.xlu1 %v4853_v15, %s6148_s11 }
 0x7cd   :  { %v4856_v47 = vpop.permute.xlu1 %4855 }
 0x7ce   :  { %v4858_v27 = vmax.f32 %v4853_v15, %v4856_v47 }
 0x7d0   :  { %4860 = vrot.lane.b32.xlu1 %v4858_v27, %s6149_s8 }
 0x7d4   :  { %4863 = vrot.lane.b32.xlu1 %v4858_v27, %s6150_s12 }
 0x7d8   :  { %4866 = vrot.lane.b32.xlu1 %v4858_v27, %s6151_s25 }
 0x842   :  { %v4861_v13 = vpop.permute.xlu1 %4860 }
 0x843   :  { %v4869_v45 = vsel %vm4821_vm9, %v4858_v27, %v4861_v13 }
 0x846   :  { %v4864_v3 = vpop.permute.xlu1 %4863 }
 0x847   :  { %v4870_v59 = vsel %vm4823_vm10, %v4869_v45, %v4864_v3 }
 0x84a   :  { %v4867_v49 = vpop.permute.xlu1 %4866 }
 0x84b   :  { %v4871_v6 = vsel %vm4825_vm11, %v4870_v59, %v4867_v49 }
 0x84c   :  { %v4872_v30 = vsub.f32 %v6065_v56, %v4871_v6 }
 0x84e   :  { %v4873_v32 = vmul.f32 1.442695, %v4872_v30 }
 0x850   :  { %6066 = vpow2.f32 %v4873_v32 }
 0x85a   :  { %v6067_v41 = vpop.eup %6066 }
 0x85b   :  { %4880 = vrot.lane.b32.xlu1 %v6067_v41, %s6148_s11  ;;  %4876 = vrot.lane.b32.xlu0 %v6067_v41, %s6147_s5 }
 0x85f   :  { %4884 = vrot.lane.b32.xlu0 %v6067_v41, %s6152_s26 }
 0x8cd   :  { %v4877_v50 = vpop.permute.xlu0 %4876  ;;  %v4881_v12 = vpop.permute.xlu1 %4880 }
 0x8ce   :  { %v4879_v61 = vadd.f32 %v6067_v41, %v4877_v50 }
 0x8d0   :  { %v4883_v35 = vadd.f32 %v4881_v12, %v4879_v61 }
 0x8d1   :  { %v4885_v21 = vpop.permute.xlu0 %4884 }
 0x8d2   :  { %v4887_v43 = vadd.f32 %v4885_v21, %v4883_v35 }
 0x8d4   :  { %6068 = vrcp.f32 %v4887_v43 }
 0x8de   :  { %v6069_v48 = vpop.eup %6068 }
 0x8df   :  { %4893 = vrot.lane.b32.xlu0 %v6069_v48, %s6150_s12  ;;  %4890 = vrot.lane.b32.xlu1 %v6069_v48, %s6149_s8 }
 0x8e3   :  { %4896 = vrot.lane.b32.xlu1 %v6069_v48, %s6151_s25 }
 0x951   :  { %v4891_v10 = vpop.permute.xlu1 %4890  ;;  %v4894_v22 = vpop.permute.xlu0 %4893 }
 0x952   :  { %v4899_v23 = vsel %vm4821_vm9, %v6069_v48, %v4891_v10 }
 0x953   :  { %v4900_v31 = vsel %vm4823_vm10, %v4899_v23, %v4894_v22 }
 0x955   :  { %v4897_v37 = vpop.permute.xlu1 %4896 }
 0x956   :  { %v4901_v25 = vsel %vm4825_vm11, %v4900_v31, %v4897_v37 }
 0x957   :  { %v4902_v26 = vmul.f32 %v6067_v41, %v4901_v25 }
 0x959   :  { %v4903_v29 = vmul.f32 %v4902_v26, %v8764_v55 }
 0x95b   :  { %5468 = vmatmul.mubr.msk.f32.vlgmr.msra.gmra.mrb[6].mxu1 %vm1852_vm0, %v4903_v29 }
 0x95c   :  { %6081 = shalt.err (!%p6078_p4)
}
 0x95d   :  { %s6082_s5 = scalar_lea.hbm %s8875_s16, 32 }
 0x95e   :  { %p6083_p5 = scmp.ne.s32.totalorder %s8875_s16, %s6082_s5  ;;  %p6086_p6 = scmp.lt.u32.totalorder %s6082_s5, %s8875_s16 }
 0x960   :  { %p6088_p7 = pnand %p6086_p6, %p6083_p5 }
 0x962   :  { %6091 = shalt.err (!%p6088_p7)
}
 0x963   :  { %5013 = dma.vmem_to_hbm [thread:$0]  %s5011_s9, 32, %s8875_s16, [#allocation6]  }
 0x964   :  { %s6154_s27 = smov [#allocation7]  }
 0x965   :  { %s5020_s7 = sshll.u32 %s6154_s27, 4  ;;  %s5021_s7 = int_to_ptr.vmem [resolvable:$true] %s5020_s7 }
 0x966   :  { %s6092_s29 = scalar_lea.vmem %s5021_s7, 32  ;;  %p6097_p9 = scmp.lt.s32.totalorder %s5021_s7, %s5021_s7 }
 0x967   :  { %p6093_p8 = scmp.ne.s32.totalorder %s5021_s7, %s6092_s29  ;;  %p6098_p10 = scmp.lt.s32.totalorder %s6092_s29, %s6092_s29 }
 0x969   :  { %p6099_p11 = por %p6098_p10, %p6097_p9 }
 0x96b   :  { %p6100_p12 = pnand %p6099_p11, %p6093_p8 }
 0x96d   :  { %6103 = shalt.err (!%p6100_p12)
}
 0x96e   :  { %s6104_s0 = scalar_lea.hbm %s8876_s17, 32 }
 0x96f   :  { %p6105_p13 = scmp.ne.s32.totalorder %s8876_s17, %s6104_s0  ;;  %p6108_p0 = scmp.lt.u32.totalorder %s6104_s0, %s8876_s17 }
 0x971   :  { %p6110_p1 = pnand %p6108_p0, %p6105_p13 }
 0x973   :  { %6113 = shalt.err (!%p6110_p1)
}
 0x974   :  { %5023 = dma.vmem_to_hbm [thread:$0]  %s5021_s7, 32, %s8876_s17, [#allocation6]   ;;  %v5360_v55 = vld [vmem:[%s8873_s14] ss:$0 sm:$0xff]  ;;  %vm4992_vm0 = vcmask 17408  }
 0x975   :  { %s6155_s28 = smov [#allocation3]  }
 0x976   :  { %s5000_s22 = sshll.u32 %s6155_s28, 4  ;;  %s5001_s22 = int_to_ptr.vmem [resolvable:$true] %s5000_s22 }
 0x977   :  { %s6114_s13 = scalar_lea.vmem %s5001_s22, 32  ;;  %p6119_p3 = scmp.lt.s32.totalorder %s5001_s22, %s5001_s22 }
 0x978   :  { %p6115_p2 = scmp.ne.s32.totalorder %s5001_s22, %s6114_s13  ;;  %p6120_p4 = scmp.lt.s32.totalorder %s6114_s13, %s6114_s13 }
 0x97a   :  { %p6121_p5 = por %p6120_p4, %p6119_p3 }
 0x97c   :  { %p6122_p6 = pnand %p6121_p5, %p6115_p2 }
 0xa2e   :  { %v4988_v38 = vpop.f32.mrb[6].mxu1 }
 0xa2f   :  { %v4989_v51 = vadd.f32 %v5360_v55, %v4988_v38  ;;  %v5469_v54 = vpop.f32.mrb[7].mxu1 }
 0xa31   :  { %4993 = vst.msk [vmem:[#allocation3] sm:$0x3] %vm4992_vm0, %v4989_v51 }
 0xa32   :  { %6125 = shalt.err (!%p6122_p6)
}
 0xa33   :  { %s6126_s2 = scalar_lea.hbm %s8874_s15, 32 }
 0xa34   :  { %p6127_p7 = scmp.ne.s32.totalorder %s8874_s15, %s6126_s2  ;;  %p6130_p8 = scmp.lt.u32.totalorder %s6126_s2, %s8874_s15 }
 0xa36   :  { %p6132_p9 = pnand %p6130_p8, %p6127_p7 }
 0xa38   :  { %6135 = shalt.err (!%p6132_p9)
}
 0xa39   :  { %5003 = dma.vmem_to_hbm [thread:$0]  %s5001_s22, 32, %s8874_s15, [#allocation4]  }
 0xa3a   :  { %6136 = dma.done.wait [#allocation4], 32  }
 0xa3b   :  { %6137 = vsyncadd [#allocation4], 4294967264 }
 0xa3c   :  { %6138 = dma.done.wait [#allocation6], 64  }
 0xa3d   :  { %6139 = vsyncadd [#allocation6], 4294967232 }
 0xa3e   :  { %5033 = vsyncpa [#allocation4], 1 }
 0xa3f   :  { %5034 = vsyncpa [#allocation6], 1 }

</bundles_post_ra>
